<compile_context>
chip_gen: v5e
topology: v5e:2x2
jax: 0.10.0
libtpu: 0.0.40
codegen_flags: <defaults>
</compile_context>

<pallas_src>
import math
import functools

import jax
import jax.numpy as jnp
from jax.experimental import pallas as pl
from jax.experimental.pallas import tpu as pltpu


def _round_up(x, m):
    return ((x + m - 1) // m) * m


# --------------------------------------------------------------------------
# Kernel
# --------------------------------------------------------------------------
def _attn_layer(x, wqkv_ref, bqkv_ref, wp_ref, bp_ref, o_ref, qkv_scr, mrg_scr,
                *, T, H, D, CP, mask_bias):
    """One OpenAIGPT attention layer for a single batch element.

    x:         (T, CP)     f32 zero-padded input slab
    wqkv_ref:  (CP, 3*CP)  bf16 fused [Q|K|V] weights (1/sqrt(D) folded into Q)
    bqkv_ref:  (1, 3*CP)   f32 fused bias
    wp_ref:    (CP, CP)    bf16 zero-padded output projection
    bp_ref:    (1, CP)     f32
    o_ref:     (1, T, CP)  output block
    qkv_scr:   (T, 3*CP)   f32 VMEM scratch
    mrg_scr:   (T, CP)     f32 VMEM scratch (merged heads)
    mask_bias: (T, T) additive attention mask for this batch element, or None
    """
    f32 = jnp.float32
    bf16 = jnp.bfloat16

    # 1) Fused lane-dense QKV projection: ONE 2-D MXU pass (K = CP).
    qkv_scr[...] = jnp.dot(x.astype(bf16), wqkv_ref[...],
                           preferred_element_type=f32) + bqkv_ref[...]

    # 2) Head split via static lane-window reads of the scratch ref
    #    (avoids minor-dim reshapes inside the kernel).
    q_l, k_l, v_l = [], [], []
    for h in range(H):
        lo = h * D
        q_l.append(qkv_scr[:, lo:lo + D])
        k_l.append(qkv_scr[:, CP + lo:CP + lo + D])
        v_l.append(qkv_scr[:, 2 * CP + lo:2 * CP + lo + D])
    qh = jnp.stack(q_l, axis=0).astype(bf16)      # (H, T, D)
    kh = jnp.stack(k_l, axis=0).astype(bf16)      # (H, T, D)
    vh = jnp.stack(v_l, axis=0).astype(bf16)      # (H, T, D)

    # 3) Scores + exact HF masking: w*b + (-1e4)*(1-b) [+ attention_mask].
    s = jnp.einsum('htd,hsd->hts', qh, kh,
                   preferred_element_type=f32)    # (H, T, T)
    row = jax.lax.broadcasted_iota(jnp.int32, (T, T), 0)
    col = jax.lax.broadcasted_iota(jnp.int32, (T, T), 1)
    causal = (col <= row)[None, :, :]             # (1, T, T)
    s = jnp.where(causal, s, jnp.float32(-1e4))
    if mask_bias is not None:
        s = s + mask_bias[None, :, :]

    # 4) Numerically stable softmax (exact division -> matches f32 reference).
    m = jnp.max(s, axis=-1, keepdims=True)
    e = jnp.exp(s - m)
    p = e / jnp.sum(e, axis=-1, keepdims=True)

    # 5) Per-head attention output, merged back into a lane-dense (T, CP) slab.
    a = jnp.einsum('hts,hsd->htd', p.astype(bf16), vh,
                   preferred_element_type=f32)    # (H, T, D)
    mrg_scr[...] = jnp.zeros_like(mrg_scr)        # keep padding columns at 0
    for h in range(H):
        mrg_scr[:, h * D:(h + 1) * D] = a[h]

    # 6) Single merged output projection: ONE 2-D MXU pass (K = CP).
    out = jnp.dot(mrg_scr[...].astype(bf16), wp_ref[...],
                  preferred_element_type=f32) + bp_ref[...]
    o_ref[0, :, :] = out.astype(o_ref.dtype)


def _fused_kernel(x0_ref, wqkv0_ref, bqkv0_ref, wp0_ref, bp0_ref,
                  x1_ref, wqkv1_ref, bqkv1_ref, wp1_ref, bp1_ref, mb1_ref,
                  o0_ref, o1_ref,
                  qkv0_scr, mrg0_scr, qkv1_scr, mrg1_scr,
                  *, T, cfg0, cfg1):
    # Layer 0 (n_embd=256, n_head=8): no attention mask.
    _attn_layer(x0_ref[0, :, :], wqkv0_ref, bqkv0_ref, wp0_ref, bp0_ref,
                o0_ref, qkv0_scr, mrg0_scr, T=T, mask_bias=None, **cfg0)
    # Layer 1 (n_embd=66, n_head=11): additive HF attention mask.
    _attn_layer(x1_ref[0, :, :], wqkv1_ref, bqkv1_ref, wp1_ref, bp1_ref,
                o1_ref, qkv1_scr, mrg1_scr, T=T, mask_bias=mb1_ref[0, :, :],
                **cfg1)


# --------------------------------------------------------------------------
# Wrapper (single jitted dispatch, single pallas_call for both layers)
# --------------------------------------------------------------------------
def _forward(x, y, mask,
             wqkv0, bqkv0, wp0, bp0,
             wqkv1, bqkv1, wp1, bp1,
             *, cfg0, cfg1, C0, C1):
    B, T, _ = x.shape
    CP0, CP1 = cfg0["CP"], cfg1["CP"]
    f32 = jnp.float32

    x0 = x if C0 == CP0 else jnp.pad(x, ((0, 0), (0, 0), (0, CP0 - C0)))
    x1 = y if C1 == CP1 else jnp.pad(y, ((0, 0), (0, 0), (0, CP1 - C1)))
    # HF additive attention mask (B,1,1,T) -> per-(t,s) bias (B,T,T).
    mb1 = jnp.broadcast_to(mask.reshape(B, 1, T).astype(f32), (B, T, T))

    kernel = functools.partial(_fused_kernel, T=T, cfg0=cfg0, cfg1=cfg1)

    const2 = lambda b: (0, 0)
    in_specs = [
        pl.BlockSpec((1, T, CP0), lambda b: (b, 0, 0)),   # x0
        pl.BlockSpec(wqkv0.shape, const2),
        pl.BlockSpec(bqkv0.shape, const2),
        pl.BlockSpec(wp0.shape, const2),
        pl.BlockSpec(bp0.shape, const2),
        pl.BlockSpec((1, T, CP1), lambda b: (b, 0, 0)),   # x1
        pl.BlockSpec(wqkv1.shape, const2),
        pl.BlockSpec(bqkv1.shape, const2),
        pl.BlockSpec(wp1.shape, const2),
        pl.BlockSpec(bp1.shape, const2),
        pl.BlockSpec((1, T, T), lambda b: (b, 0, 0)),     # mask bias
    ]
    out_specs = [
        pl.BlockSpec((1, T, CP0), lambda b: (b, 0, 0)),
        pl.BlockSpec((1, T, CP1), lambda b: (b, 0, 0)),
    ]
    out_shape = (jax.ShapeDtypeStruct((B, T, CP0), x.dtype),
                 jax.ShapeDtypeStruct((B, T, CP1), y.dtype))
    scratch_shapes = [
        pltpu.VMEM((T, 3 * CP0), f32), pltpu.VMEM((T, CP0), f32),
        pltpu.VMEM((T, 3 * CP1), f32), pltpu.VMEM((T, CP1), f32),
    ]

    out0, out1 = pl.pallas_call(
        kernel,
        grid=(B,),                                         # real parallel axis
        in_specs=in_specs,
        out_specs=out_specs,
        out_shape=out_shape,
        scratch_shapes=scratch_shapes,
        compiler_params=pltpu.CompilerParams(
            dimension_semantics=("parallel",)),
    )(x0, wqkv0, bqkv0, wp0, bp0, x1, wqkv1, bqkv1, wp1, bp1, mb1)

    return out0[..., :C0], out1[..., :C1]


# --------------------------------------------------------------------------
# Init-time weight packing (hoisted out of the per-call path)
# --------------------------------------------------------------------------
def _pack_layer(w_attn, b_attn, w_proj, b_proj, n_head, scale=True):
    C = w_attn.shape[0]
    H = n_head
    D = C // H
    CP = _round_up(C, 128)
    f32, bf16 = jnp.float32, jnp.bfloat16

    wq = w_attn[:, :C]
    wk = w_attn[:, C:2 * C]
    wv = w_attn[:, 2 * C:]
    bq = b_attn[:C]
    bk = b_attn[C:2 * C]
    bv = b_attn[2 * C:]
    if scale:                       # fold 1/sqrt(D) into the Q projection
        inv = 1.0 / math.sqrt(D)
        wq = wq * inv
        bq = bq * inv

    wqkv = jnp.zeros((CP, 3 * CP), f32)
    wqkv = wqkv.at[:C, 0:C].set(wq)
    wqkv = wqkv.at[:C, CP:CP + C].set(wk)
    wqkv = wqkv.at[:C, 2 * CP:2 * CP + C].set(wv)
    bqkv = jnp.zeros((1, 3 * CP), f32)
    bqkv = bqkv.at[0, 0:C].set(bq)
    bqkv = bqkv.at[0, CP:CP + C].set(bk)
    bqkv = bqkv.at[0, 2 * CP:2 * CP + C].set(bv)

    wp = jnp.zeros((CP, CP), f32).at[:C, :C].set(w_proj)
    bp = jnp.zeros((1, CP), f32).at[0, :C].set(b_proj)

    cfg = dict(H=H, D=D, CP=CP)
    return wqkv.astype(bf16), bqkv, wp.astype(bf16), bp, cfg


# --------------------------------------------------------------------------
# Pure-JAX f32 reference mirroring the PyTorch module exactly
# --------------------------------------------------------------------------
def _ref_attention(x, w_attn, b_attn, w_proj, b_proj, n_head, scale, mask):
    B, T, C = x.shape
    D = C // n_head
    qkv = x @ w_attn + b_attn
    q, k, v = qkv[..., :C], qkv[..., C:2 * C], qkv[..., 2 * C:]

    def split(t):
        return t.reshape(B, T, n_head, D).transpose(0, 2, 1, 3)

    qh, kh, vh = split(q), split(k), split(v)
    w = jnp.einsum("bhtd,bhsd->bhts", qh, kh)
    if scale:
        w = w / math.sqrt(D)
    cb = jnp.tril(jnp.ones((T, T), jnp.float32))
    w = w * cb + (-1e4) * (1.0 - cb)
    if mask is not None:
        w = w + mask
    w = jax.nn.softmax(w, axis=-1)
    a = jnp.einsum("bhts,bhsd->bhtd", w, vh)
    a = a.transpose(0, 2, 1, 3).reshape(B, T, C)
    return a @ w_proj + b_proj


class PallasModel:
    """Mirrors Model.__init__ / Model.forward of the PyTorch module."""

    def __init__(self, key):
        ks = jax.random.split(key, 8)
        init = lambda k, shape: (0.02 * jax.random.normal(k, shape)).astype(jnp.float32)
        # attn0: n_embd=256, n_head=8
        self.c0 = dict(n_head=8,
                       w_attn=init(ks[0], (256, 3 * 256)),
                       b_attn=init(ks[1], (3 * 256,)),
                       w_proj=init(ks[2], (256, 256)),
                       b_proj=init(ks[3], (256,)))
        # attn1: n_embd=66, n_head=11
        self.c1 = dict(n_head=11,
                       w_attn=init(ks[4], (66, 3 * 66)),
                       b_attn=init(ks[5], (3 * 66,)),
                       w_proj=init(ks[6], (66, 66)),
                       b_proj=init(ks[7], (66,)))

        # Pack weights ONCE at init (review: hoist repacking out of the call path).
        wqkv0, bqkv0, wp0, bp0, cfg0 = _pack_layer(**self.c0, scale=True)
        wqkv1, bqkv1, wp1, bp1, cfg1 = _pack_layer(**self.c1, scale=True)
        self._packed = (wqkv0, bqkv0, wp0, bp0, wqkv1, bqkv1, wp1, bp1)
        self._fwd = jax.jit(functools.partial(
            _forward, cfg0=cfg0, cfg1=cfg1, C0=256, C1=66))

    def __call__(self, x, y, mask):
        return self._fwd(x, y, mask, *self._packed)

    def reference(self, x, y, mask):
        r0 = _ref_attention(x, self.c0["w_attn"], self.c0["b_attn"],
                            self.c0["w_proj"], self.c0["b_proj"],
                            self.c0["n_head"], True, None)
        r1 = _ref_attention(y, self.c1["w_attn"], self.c1["b_attn"],
                            self.c1["w_proj"], self.c1["b_proj"],
                            self.c1["n_head"], True, mask)
        return r0, r1


if __name__ == "__main__":
    key = jax.random.PRNGKey(0)
    kp, kx, ky, km = jax.random.split(key, 4)

    model = PallasModel(kp)

    B, T = 2, 8
    x = jax.random.normal(kx, (B, T, 256), dtype=jnp.float32)
    y = jax.random.normal(ky, (B, T, 66), dtype=jnp.float32)
    # HF-style additive attention mask (B, 1, 1, T): 0 = keep, -1e4 = drop.
    keep = (jax.random.uniform(km, (B, 1, 1, T)) > 0.3).astype(jnp.float32)
    mask = (1.0 - keep) * -10000.0

    out0, out1 = model(x, y, mask)
    out0, out1 = jax.block_until_ready(out0), jax.block_until_ready(out1)

    ref0, ref1 = model.reference(x, y, mask)
    # bf16 matmul operands with f32 accumulation -> bf16-level tolerance.
    assert jnp.allclose(out0, ref0, rtol=1e-2, atol=1e-2), "layer0 mismatch"
    assert jnp.allclose(out1, ref1, rtol=1e-2, atol=1e-2), "layer1 mismatch"

    print("KERNEL_OK")
</pallas_src>

<mosaic_0001>
module attributes {stable_mosaic.version = 11 : i64} {
  func.func @_fused_kernel(%arg0: i32, %arg1: memref<1x8x256xf32, #tpu.memory_space<vmem>>, %arg2: memref<256x768xbf16, #tpu.memory_space<vmem>>, %arg3: memref<1x768xf32, #tpu.memory_space<vmem>>, %arg4: memref<256x256xbf16, #tpu.memory_space<vmem>>, %arg5: memref<1x256xf32, #tpu.memory_space<vmem>>, %arg6: memref<1x8x128xf32, #tpu.memory_space<vmem>>, %arg7: memref<128x384xbf16, #tpu.memory_space<vmem>>, %arg8: memref<1x384xf32, #tpu.memory_space<vmem>>, %arg9: memref<128x128xbf16, #tpu.memory_space<vmem>>, %arg10: memref<1x128xf32, #tpu.memory_space<vmem>>, %arg11: memref<1x8x8xf32, #tpu.memory_space<vmem>>, %arg12: memref<1x8x256xf32, #tpu.memory_space<vmem>>, %arg13: memref<1x8x128xf32, #tpu.memory_space<vmem>>, %arg14: memref<8x768xf32, #tpu.memory_space<vmem>>, %arg15: memref<8x256xf32, #tpu.memory_space<vmem>>, %arg16: memref<8x384xf32, #tpu.memory_space<vmem>>, %arg17: memref<8x128xf32, #tpu.memory_space<vmem>>) attributes {dimension_semantics = [#tpu.dimension_semantics<parallel>], iteration_bounds = array<i64: 2>, scalar_prefetch = 0 : i64, scratch_operands = 4 : i64, tpu.core_type = #tpu.core_type<tc>, window_params = [{transform_indices = @transform_0, window_bounds = array<i64: 1, 8, 256>}, {pipeline_mode = #tpu.pipeline_mode<synchronous>, transform_indices = @transform_1, window_bounds = array<i64: 256, 768>}, {pipeline_mode = #tpu.pipeline_mode<synchronous>, transform_indices = @transform_2, window_bounds = array<i64: 1, 768>}, {pipeline_mode = #tpu.pipeline_mode<synchronous>, transform_indices = @transform_3, window_bounds = array<i64: 256, 256>}, {pipeline_mode = #tpu.pipeline_mode<synchronous>, transform_indices = @transform_4, window_bounds = array<i64: 1, 256>}, {transform_indices = @transform_5, window_bounds = array<i64: 1, 8, 128>}, {pipeline_mode = #tpu.pipeline_mode<synchronous>, transform_indices = @transform_6, window_bounds = array<i64: 128, 384>}, {pipeline_mode = #tpu.pipeline_mode<synchronous>, transform_indices = @transform_7, window_bounds = array<i64: 1, 384>}, {pipeline_mode = #tpu.pipeline_mode<synchronous>, transform_indices = @transform_8, window_bounds = array<i64: 128, 128>}, {pipeline_mode = #tpu.pipeline_mode<synchronous>, transform_indices = @transform_9, window_bounds = array<i64: 1, 128>}, {transform_indices = @transform_10, window_bounds = array<i64: 1, 8, 8>}, {transform_indices = @transform_11, window_bounds = array<i64: 1, 8, 256>}, {transform_indices = @transform_12, window_bounds = array<i64: 1, 8, 128>}]} {
    %c0 = arith.constant 0 : index
    %c0_0 = arith.constant 0 : index
    %c0_1 = arith.constant 0 : index
    %0 = vector.load %arg1[%c0, %c0_0, %c0_1] : memref<1x8x256xf32, #tpu.memory_space<vmem>>, vector<1x8x256xf32>
    %1 = vector.shape_cast %0 : vector<1x8x256xf32> to vector<8x256xf32>
    %2 = arith.truncf %1 : vector<8x256xf32> to vector<8x256xbf16>
    %c0_2 = arith.constant 0 : index
    %c0_3 = arith.constant 0 : index
    %3 = vector.load %arg2[%c0_2, %c0_3] : memref<256x768xbf16, #tpu.memory_space<vmem>>, vector<256x768xbf16>
    %cst = arith.constant dense<0.000000e+00> : vector<8x768xf32>
    %4 = tpu.matmul %2, %3, %cst {dimension_numbers = #tpu.dot_dimension_numbers<[1], [0], [0], [1], [0, 0, 1, 1], [], []>} : vector<8x256xbf16>, vector<256x768xbf16>, vector<8x768xf32> -> vector<8x768xf32>
    %c0_4 = arith.constant 0 : index
    %c0_5 = arith.constant 0 : index
    %5 = vector.load %arg3[%c0_4, %c0_5] : memref<1x768xf32, #tpu.memory_space<vmem>>, vector<1x768xf32>
    %6 = vector.broadcast %5 : vector<1x768xf32> to vector<8x768xf32>
    %7 = arith.addf %4, %6 : vector<8x768xf32>
    %c0_6 = arith.constant 0 : index
    %c0_7 = arith.constant 0 : index
    %8 = vector.load %arg14[%c0_6, %c0_7] : memref<8x768xf32, #tpu.memory_space<vmem>>, vector<8x768xf32>
    tpu.vector_store %arg14[%c0_6, %c0_7], %7 {strides = array<i32>} : memref<8x768xf32, #tpu.memory_space<vmem>>, vector<8x768xf32>,
    %c0_8 = arith.constant 0 : index
    %c0_9 = arith.constant 0 : index
    %9 = vector.load %arg14[%c0_8, %c0_9] : memref<8x768xf32, #tpu.memory_space<vmem>>, vector<8x32xf32>
    %c0_10 = arith.constant 0 : index
    %c256 = arith.constant 256 : index
    %10 = vector.load %arg14[%c0_10, %c256] : memref<8x768xf32, #tpu.memory_space<vmem>>, vector<8x32xf32>
    %c0_11 = arith.constant 0 : index
    %c512 = arith.constant 512 : index
    %11 = vector.load %arg14[%c0_11, %c512] : memref<8x768xf32, #tpu.memory_space<vmem>>, vector<8x32xf32>
    %c0_12 = arith.constant 0 : index
    %c32 = arith.constant 32 : index
    %12 = vector.load %arg14[%c0_12, %c32] : memref<8x768xf32, #tpu.memory_space<vmem>>, vector<8x32xf32>
    %c0_13 = arith.constant 0 : index
    %c288 = arith.constant 288 : index
    %13 = vector.load %arg14[%c0_13, %c288] : memref<8x768xf32, #tpu.memory_space<vmem>>, vector<8x32xf32>
    %c0_14 = arith.constant 0 : index
    %c544 = arith.constant 544 : index
    %14 = vector.load %arg14[%c0_14, %c544] : memref<8x768xf32, #tpu.memory_space<vmem>>, vector<8x32xf32>
    %c0_15 = arith.constant 0 : index
    %c64 = arith.constant 64 : index
    %15 = vector.load %arg14[%c0_15, %c64] : memref<8x768xf32, #tpu.memory_space<vmem>>, vector<8x32xf32>
    %c0_16 = arith.constant 0 : index
    %c320 = arith.constant 320 : index
    %16 = vector.load %arg14[%c0_16, %c320] : memref<8x768xf32, #tpu.memory_space<vmem>>, vector<8x32xf32>
    %c0_17 = arith.constant 0 : index
    %c576 = arith.constant 576 : index
    %17 = vector.load %arg14[%c0_17, %c576] : memref<8x768xf32, #tpu.memory_space<vmem>>, vector<8x32xf32>
    %c0_18 = arith.constant 0 : index
    %c96 = arith.constant 96 : index
    %18 = vector.load %arg14[%c0_18, %c96] : memref<8x768xf32, #tpu.memory_space<vmem>>, vector<8x32xf32>
    %c0_19 = arith.constant 0 : index
    %c352 = arith.constant 352 : index
    %19 = vector.load %arg14[%c0_19, %c352] : memref<8x768xf32, #tpu.memory_space<vmem>>, vector<8x32xf32>
    %c0_20 = arith.constant 0 : index
    %c608 = arith.constant 608 : index
    %20 = vector.load %arg14[%c0_20, %c608] : memref<8x768xf32, #tpu.memory_space<vmem>>, vector<8x32xf32>
    %c0_21 = arith.constant 0 : index
    %c128 = arith.constant 128 : index
    %21 = vector.load %arg14[%c0_21, %c128] : memref<8x768xf32, #tpu.memory_space<vmem>>, vector<8x32xf32>
    %c0_22 = arith.constant 0 : index
    %c384 = arith.constant 384 : index
    %22 = vector.load %arg14[%c0_22, %c384] : memref<8x768xf32, #tpu.memory_space<vmem>>, vector<8x32xf32>
    %c0_23 = arith.constant 0 : index
    %c640 = arith.constant 640 : index
    %23 = vector.load %arg14[%c0_23, %c640] : memref<8x768xf32, #tpu.memory_space<vmem>>, vector<8x32xf32>
    %c0_24 = arith.constant 0 : index
    %c160 = arith.constant 160 : index
    %24 = vector.load %arg14[%c0_24, %c160] : memref<8x768xf32, #tpu.memory_space<vmem>>, vector<8x32xf32>
    %c0_25 = arith.constant 0 : index
    %c416 = arith.constant 416 : index
    %25 = vector.load %arg14[%c0_25, %c416] : memref<8x768xf32, #tpu.memory_space<vmem>>, vector<8x32xf32>
    %c0_26 = arith.constant 0 : index
    %c672 = arith.constant 672 : index
    %26 = vector.load %arg14[%c0_26, %c672] : memref<8x768xf32, #tpu.memory_space<vmem>>, vector<8x32xf32>
    %c0_27 = arith.constant 0 : index
    %c192 = arith.constant 192 : index
    %27 = vector.load %arg14[%c0_27, %c192] : memref<8x768xf32, #tpu.memory_space<vmem>>, vector<8x32xf32>
    %c0_28 = arith.constant 0 : index
    %c448 = arith.constant 448 : index
    %28 = vector.load %arg14[%c0_28, %c448] : memref<8x768xf32, #tpu.memory_space<vmem>>, vector<8x32xf32>
    %c0_29 = arith.constant 0 : index
    %c704 = arith.constant 704 : index
    %29 = vector.load %arg14[%c0_29, %c704] : memref<8x768xf32, #tpu.memory_space<vmem>>, vector<8x32xf32>
    %c0_30 = arith.constant 0 : index
    %c224 = arith.constant 224 : index
    %30 = vector.load %arg14[%c0_30, %c224] : memref<8x768xf32, #tpu.memory_space<vmem>>, vector<8x32xf32>
    %c0_31 = arith.constant 0 : index
    %c480 = arith.constant 480 : index
    %31 = vector.load %arg14[%c0_31, %c480] : memref<8x768xf32, #tpu.memory_space<vmem>>, vector<8x32xf32>
    %c0_32 = arith.constant 0 : index
    %c736 = arith.constant 736 : index
    %32 = vector.load %arg14[%c0_32, %c736] : memref<8x768xf32, #tpu.memory_space<vmem>>, vector<8x32xf32>
    %33 = vector.shape_cast %9 : vector<8x32xf32> to vector<1x8x32xf32>
    %34 = vector.shape_cast %12 : vector<8x32xf32> to vector<1x8x32xf32>
    %35 = vector.shape_cast %15 : vector<8x32xf32> to vector<1x8x32xf32>
    %36 = vector.shape_cast %18 : vector<8x32xf32> to vector<1x8x32xf32>
    %37 = vector.shape_cast %21 : vector<8x32xf32> to vector<1x8x32xf32>
    %38 = vector.shape_cast %24 : vector<8x32xf32> to vector<1x8x32xf32>
    %39 = vector.shape_cast %27 : vector<8x32xf32> to vector<1x8x32xf32>
    %40 = vector.shape_cast %30 : vector<8x32xf32> to vector<1x8x32xf32>
    %41 = tpu.concatenate %33, %34, %35, %36, %37, %38, %39, %40 in 0 : vector<1x8x32xf32>, vector<1x8x32xf32>, vector<1x8x32xf32>, vector<1x8x32xf32>, vector<1x8x32xf32>, vector<1x8x32xf32>, vector<1x8x32xf32>, vector<1x8x32xf32> -> vector<8x8x32xf32>
    %42 = arith.truncf %41 : vector<8x8x32xf32> to vector<8x8x32xbf16>
    %43 = vector.shape_cast %10 : vector<8x32xf32> to vector<1x8x32xf32>
    %44 = vector.shape_cast %13 : vector<8x32xf32> to vector<1x8x32xf32>
    %45 = vector.shape_cast %16 : vector<8x32xf32> to vector<1x8x32xf32>
    %46 = vector.shape_cast %19 : vector<8x32xf32> to vector<1x8x32xf32>
    %47 = vector.shape_cast %22 : vector<8x32xf32> to vector<1x8x32xf32>
    %48 = vector.shape_cast %25 : vector<8x32xf32> to vector<1x8x32xf32>
    %49 = vector.shape_cast %28 : vector<8x32xf32> to vector<1x8x32xf32>
    %50 = vector.shape_cast %31 : vector<8x32xf32> to vector<1x8x32xf32>
    %51 = tpu.concatenate %43, %44, %45, %46, %47, %48, %49, %50 in 0 : vector<1x8x32xf32>, vector<1x8x32xf32>, vector<1x8x32xf32>, vector<1x8x32xf32>, vector<1x8x32xf32>, vector<1x8x32xf32>, vector<1x8x32xf32>, vector<1x8x32xf32> -> vector<8x8x32xf32>
    %52 = arith.truncf %51 : vector<8x8x32xf32> to vector<8x8x32xbf16>
    %53 = vector.shape_cast %11 : vector<8x32xf32> to vector<1x8x32xf32>
    %54 = vector.shape_cast %14 : vector<8x32xf32> to vector<1x8x32xf32>
    %55 = vector.shape_cast %17 : vector<8x32xf32> to vector<1x8x32xf32>
    %56 = vector.shape_cast %20 : vector<8x32xf32> to vector<1x8x32xf32>
    %57 = vector.shape_cast %23 : vector<8x32xf32> to vector<1x8x32xf32>
    %58 = vector.shape_cast %26 : vector<8x32xf32> to vector<1x8x32xf32>
    %59 = vector.shape_cast %29 : vector<8x32xf32> to vector<1x8x32xf32>
    %60 = vector.shape_cast %32 : vector<8x32xf32> to vector<1x8x32xf32>
    %61 = tpu.concatenate %53, %54, %55, %56, %57, %58, %59, %60 in 0 : vector<1x8x32xf32>, vector<1x8x32xf32>, vector<1x8x32xf32>, vector<1x8x32xf32>, vector<1x8x32xf32>, vector<1x8x32xf32>, vector<1x8x32xf32>, vector<1x8x32xf32> -> vector<8x8x32xf32>
    %62 = arith.truncf %61 : vector<8x8x32xf32> to vector<8x8x32xbf16>
    "tpu.trace_start"() <{level = 10 : i32, message = "htd,hsd->hts"}> : () -> ()
    %cst_33 = arith.constant dense<0.000000e+00> : vector<8x8x8xf32>
    %63 = tpu.matmul %42, %52, %cst_33 {dimension_numbers = #tpu.dot_dimension_numbers<[2], [2], [1], [1], [0, 0, 0, 1, 1, 1], [0], [0]>} : vector<8x8x32xbf16>, vector<8x8x32xbf16>, vector<8x8x8xf32> -> vector<8x8x8xf32>
    "tpu.trace_stop"() : () -> ()
    %64 = tpu.iota {dimensions = array<i32: 0>} : vector<8x8xi32>
    %65 = tpu.iota {dimensions = array<i32: 1>} : vector<8x8xi32>
    %66 = arith.cmpi sle, %65, %64 : vector<8x8xi32>
    %67 = vector.shape_cast %66 : vector<8x8xi1> to vector<1x8x8xi1>
    %cst_34 = arith.constant -1.000000e+04 : f32
    %68 = vector.shape_cast %67 : vector<1x8x8xi1> to vector<1x8x8xi1>
    %69 = vector.broadcast %68 : vector<1x8x8xi1> to vector<8x8x8xi1>
    %70 = vector.broadcast %cst_34 : f32 to vector<8x8x8xf32>
    %71 = arith.select %69, %63, %70 : vector<8x8x8xi1>, vector<8x8x8xf32>
    %cst_35 = arith.constant dense<0xFF800000> : vector<8x8xf32>
    %72 = vector.multi_reduction <maximumf>, %71, %cst_35 [2] : vector<8x8x8xf32> to vector<8x8xf32>
    %73 = vector.shape_cast %72 : vector<8x8xf32> to vector<8x8x1xf32>
    %74 = vector.broadcast %73 : vector<8x8x1xf32> to vector<8x8x8xf32>
    %75 = arith.subf %71, %74 : vector<8x8x8xf32>
    %76 = math.exp %75 : vector<8x8x8xf32>
    %cst_36 = arith.constant dense<0.000000e+00> : vector<8x8xf32>
    %77 = vector.multi_reduction <add>, %76, %cst_36 [2] : vector<8x8x8xf32> to vector<8x8xf32>
    %78 = vector.shape_cast %77 : vector<8x8xf32> to vector<8x8x1xf32>
    %79 = vector.broadcast %78 : vector<8x8x1xf32> to vector<8x8x8xf32>
    %80 = arith.divf %76, %79 : vector<8x8x8xf32>
    %81 = arith.truncf %80 : vector<8x8x8xf32> to vector<8x8x8xbf16>
    "tpu.trace_start"() <{level = 10 : i32, message = "hts,hsd->htd"}> : () -> ()
    %cst_37 = arith.constant dense<0.000000e+00> : vector<8x8x32xf32>
    %82 = tpu.matmul %81, %62, %cst_37 {dimension_numbers = #tpu.dot_dimension_numbers<[2], [1], [1], [2], [0, 0, 0, 1, 1, 2], [0], [0]>} : vector<8x8x8xbf16>, vector<8x8x32xbf16>, vector<8x8x32xf32> -> vector<8x8x32xf32>
    %cst_38 = arith.constant 0.000000e+00 : f32
    "tpu.trace_stop"() : () -> ()
    %83 = vector.broadcast %cst_38 : f32 to vector<8x256xf32>
    %c0_39 = arith.constant 0 : index
    %c0_40 = arith.constant 0 : index
    %84 = vector.load %arg15[%c0_39, %c0_40] : memref<8x256xf32, #tpu.memory_space<vmem>>, vector<8x256xf32>
    tpu.vector_store %arg15[%c0_39, %c0_40], %83 {strides = array<i32>} : memref<8x256xf32, #tpu.memory_space<vmem>>, vector<8x256xf32>,
    %85 = vector.extract_strided_slice %82 {offsets = [0, 0, 0], sizes = [1, 8, 32], strides = [1, 1, 1]} : vector<8x8x32xf32> to vector<1x8x32xf32>
    %86 = vector.shape_cast %85 : vector<1x8x32xf32> to vector<8x32xf32>
    %c0_41 = arith.constant 0 : index
    %c0_42 = arith.constant 0 : index
    %87 = vector.load %arg15[%c0_41, %c0_42] : memref<8x256xf32, #tpu.memory_space<vmem>>, vector<8x32xf32>
    tpu.vector_store %arg15[%c0_41, %c0_42], %86 {strides = array<i32>} : memref<8x256xf32, #tpu.memory_space<vmem>>, vector<8x32xf32>,
    %88 = vector.extract_strided_slice %82 {offsets = [1, 0, 0], sizes = [1, 8, 32], strides = [1, 1, 1]} : vector<8x8x32xf32> to vector<1x8x32xf32>
    %89 = vector.shape_cast %88 : vector<1x8x32xf32> to vector<8x32xf32>
    %c0_43 = arith.constant 0 : index
    %c32_44 = arith.constant 32 : index
    %90 = vector.load %arg15[%c0_43, %c32_44] : memref<8x256xf32, #tpu.memory_space<vmem>>, vector<8x32xf32>
    tpu.vector_store %arg15[%c0_43, %c32_44], %89 {strides = array<i32>} : memref<8x256xf32, #tpu.memory_space<vmem>>, vector<8x32xf32>,
    %91 = vector.extract_strided_slice %82 {offsets = [2, 0, 0], sizes = [1, 8, 32], strides = [1, 1, 1]} : vector<8x8x32xf32> to vector<1x8x32xf32>
    %92 = vector.shape_cast %91 : vector<1x8x32xf32> to vector<8x32xf32>
    %c0_45 = arith.constant 0 : index
    %c64_46 = arith.constant 64 : index
    %93 = vector.load %arg15[%c0_45, %c64_46] : memref<8x256xf32, #tpu.memory_space<vmem>>, vector<8x32xf32>
    tpu.vector_store %arg15[%c0_45, %c64_46], %92 {strides = array<i32>} : memref<8x256xf32, #tpu.memory_space<vmem>>, vector<8x32xf32>,
    %94 = vector.extract_strided_slice %82 {offsets = [3, 0, 0], sizes = [1, 8, 32], strides = [1, 1, 1]} : vector<8x8x32xf32> to vector<1x8x32xf32>
    %95 = vector.shape_cast %94 : vector<1x8x32xf32> to vector<8x32xf32>
    %c0_47 = arith.constant 0 : index
    %c96_48 = arith.constant 96 : index
    %96 = vector.load %arg15[%c0_47, %c96_48] : memref<8x256xf32, #tpu.memory_space<vmem>>, vector<8x32xf32>
    tpu.vector_store %arg15[%c0_47, %c96_48], %95 {strides = array<i32>} : memref<8x256xf32, #tpu.memory_space<vmem>>, vector<8x32xf32>,
    %97 = vector.extract_strided_slice %82 {offsets = [4, 0, 0], sizes = [1, 8, 32], strides = [1, 1, 1]} : vector<8x8x32xf32> to vector<1x8x32xf32>
    %98 = vector.shape_cast %97 : vector<1x8x32xf32> to vector<8x32xf32>
    %c0_49 = arith.constant 0 : index
    %c128_50 = arith.constant 128 : index
    %99 = vector.load %arg15[%c0_49, %c128_50] : memref<8x256xf32, #tpu.memory_space<vmem>>, vector<8x32xf32>
    tpu.vector_store %arg15[%c0_49, %c128_50], %98 {strides = array<i32>} : memref<8x256xf32, #tpu.memory_space<vmem>>, vector<8x32xf32>,
    %100 = vector.extract_strided_slice %82 {offsets = [5, 0, 0], sizes = [1, 8, 32], strides = [1, 1, 1]} : vector<8x8x32xf32> to vector<1x8x32xf32>
    %101 = vector.shape_cast %100 : vector<1x8x32xf32> to vector<8x32xf32>
    %c0_51 = arith.constant 0 : index
    %c160_52 = arith.constant 160 : index
    %102 = vector.load %arg15[%c0_51, %c160_52] : memref<8x256xf32, #tpu.memory_space<vmem>>, vector<8x32xf32>
    tpu.vector_store %arg15[%c0_51, %c160_52], %101 {strides = array<i32>} : memref<8x256xf32, #tpu.memory_space<vmem>>, vector<8x32xf32>,
    %103 = vector.extract_strided_slice %82 {offsets = [6, 0, 0], sizes = [1, 8, 32], strides = [1, 1, 1]} : vector<8x8x32xf32> to vector<1x8x32xf32>
    %104 = vector.shape_cast %103 : vector<1x8x32xf32> to vector<8x32xf32>
    %c0_53 = arith.constant 0 : index
    %c192_54 = arith.constant 192 : index
    %105 = vector.load %arg15[%c0_53, %c192_54] : memref<8x256xf32, #tpu.memory_space<vmem>>, vector<8x32xf32>
    tpu.vector_store %arg15[%c0_53, %c192_54], %104 {strides = array<i32>} : memref<8x256xf32, #tpu.memory_space<vmem>>, vector<8x32xf32>,
    %106 = vector.extract_strided_slice %82 {offsets = [7, 0, 0], sizes = [1, 8, 32], strides = [1, 1, 1]} : vector<8x8x32xf32> to vector<1x8x32xf32>
    %107 = vector.shape_cast %106 : vector<1x8x32xf32> to vector<8x32xf32>
    %c0_55 = arith.constant 0 : index
    %c224_56 = arith.constant 224 : index
    %108 = vector.load %arg15[%c0_55, %c224_56] : memref<8x256xf32, #tpu.memory_space<vmem>>, vector<8x32xf32>
    tpu.vector_store %arg15[%c0_55, %c224_56], %107 {strides = array<i32>} : memref<8x256xf32, #tpu.memory_space<vmem>>, vector<8x32xf32>,
    %c0_57 = arith.constant 0 : index
    %c0_58 = arith.constant 0 : index
    %109 = vector.load %arg15[%c0_57, %c0_58] : memref<8x256xf32, #tpu.memory_space<vmem>>, vector<8x256xf32>
    %110 = arith.truncf %109 : vector<8x256xf32> to vector<8x256xbf16>
    %c0_59 = arith.constant 0 : index
    %c0_60 = arith.constant 0 : index
    %111 = vector.load %arg4[%c0_59, %c0_60] : memref<256x256xbf16, #tpu.memory_space<vmem>>, vector<256x256xbf16>
    %cst_61 = arith.constant dense<0.000000e+00> : vector<8x256xf32>
    %112 = tpu.matmul %110, %111, %cst_61 {dimension_numbers = #tpu.dot_dimension_numbers<[1], [0], [0], [1], [0, 0, 1, 1], [], []>} : vector<8x256xbf16>, vector<256x256xbf16>, vector<8x256xf32> -> vector<8x256xf32>
    %c0_62 = arith.constant 0 : index
    %c0_63 = arith.constant 0 : index
    %113 = vector.load %arg5[%c0_62, %c0_63] : memref<1x256xf32, #tpu.memory_space<vmem>>, vector<1x256xf32>
    %114 = vector.broadcast %113 : vector<1x256xf32> to vector<8x256xf32>
    %115 = arith.addf %112, %114 : vector<8x256xf32>
    %c0_64 = arith.constant 0 : index
    %c0_65 = arith.constant 0 : index
    %c0_66 = arith.constant 0 : index
    %116 = vector.load %arg12[%c0_64, %c0_65, %c0_66] : memref<1x8x256xf32, #tpu.memory_space<vmem>>, vector<1x8x256xf32>
    %117 = vector.shape_cast %116 : vector<1x8x256xf32> to vector<8x256xf32>
    %118 = vector.shape_cast %115 : vector<8x256xf32> to vector<1x8x256xf32>
    tpu.vector_store %arg12[%c0_64, %c0_65, %c0_66], %118 {strides = array<i32>} : memref<1x8x256xf32, #tpu.memory_space<vmem>>, vector<1x8x256xf32>,
    %c0_67 = arith.constant 0 : index
    %c0_68 = arith.constant 0 : index
    %c0_69 = arith.constant 0 : index
    %119 = vector.load %arg6[%c0_67, %c0_68, %c0_69] : memref<1x8x128xf32, #tpu.memory_space<vmem>>, vector<1x8x128xf32>
    %120 = vector.shape_cast %119 : vector<1x8x128xf32> to vector<8x128xf32>
    %c0_70 = arith.constant 0 : index
    %c0_71 = arith.constant 0 : index
    %c0_72 = arith.constant 0 : index
    %121 = vector.load %arg11[%c0_70, %c0_71, %c0_72] : memref<1x8x8xf32, #tpu.memory_space<vmem>>, vector<1x8x8xf32>
    %122 = vector.shape_cast %121 : vector<1x8x8xf32> to vector<8x8xf32>
    %123 = arith.truncf %120 : vector<8x128xf32> to vector<8x128xbf16>
    %c0_73 = arith.constant 0 : index
    %c0_74 = arith.constant 0 : index
    %124 = vector.load %arg7[%c0_73, %c0_74] : memref<128x384xbf16, #tpu.memory_space<vmem>>, vector<128x384xbf16>
    %cst_75 = arith.constant dense<0.000000e+00> : vector<8x384xf32>
    %125 = tpu.matmul %123, %124, %cst_75 {dimension_numbers = #tpu.dot_dimension_numbers<[1], [0], [0], [1], [0, 0, 1, 1], [], []>} : vector<8x128xbf16>, vector<128x384xbf16>, vector<8x384xf32> -> vector<8x384xf32>
    %c0_76 = arith.constant 0 : index
    %c0_77 = arith.constant 0 : index
    %126 = vector.load %arg8[%c0_76, %c0_77] : memref<1x384xf32, #tpu.memory_space<vmem>>, vector<1x384xf32>
    %127 = vector.broadcast %126 : vector<1x384xf32> to vector<8x384xf32>
    %128 = arith.addf %125, %127 : vector<8x384xf32>
    %c0_78 = arith.constant 0 : index
    %c0_79 = arith.constant 0 : index
    %129 = vector.load %arg16[%c0_78, %c0_79] : memref<8x384xf32, #tpu.memory_space<vmem>>, vector<8x384xf32>
    tpu.vector_store %arg16[%c0_78, %c0_79], %128 {strides = array<i32>} : memref<8x384xf32, #tpu.memory_space<vmem>>, vector<8x384xf32>,
    %c0_80 = arith.constant 0 : index
    %c0_81 = arith.constant 0 : index
    %130 = vector.load %arg16[%c0_80, %c0_81] : memref<8x384xf32, #tpu.memory_space<vmem>>, vector<8x6xf32>
    %c0_82 = arith.constant 0 : index
    %c128_83 = arith.constant 128 : index
    %131 = vector.load %arg16[%c0_82, %c128_83] : memref<8x384xf32, #tpu.memory_space<vmem>>, vector<8x6xf32>
    %c0_84 = arith.constant 0 : index
    %c256_85 = arith.constant 256 : index
    %132 = vector.load %arg16[%c0_84, %c256_85] : memref<8x384xf32, #tpu.memory_space<vmem>>, vector<8x6xf32>
    %c0_86 = arith.constant 0 : index
    %c6 = arith.constant 6 : index
    %133 = vector.load %arg16[%c0_86, %c6] : memref<8x384xf32, #tpu.memory_space<vmem>>, vector<8x6xf32>
    %c0_87 = arith.constant 0 : index
    %c134 = arith.constant 134 : index
    %134 = vector.load %arg16[%c0_87, %c134] : memref<8x384xf32, #tpu.memory_space<vmem>>, vector<8x6xf32>
    %c0_88 = arith.constant 0 : index
    %c262 = arith.constant 262 : index
    %135 = vector.load %arg16[%c0_88, %c262] : memref<8x384xf32, #tpu.memory_space<vmem>>, vector<8x6xf32>
    %c0_89 = arith.constant 0 : index
    %c12 = arith.constant 12 : index
    %136 = vector.load %arg16[%c0_89, %c12] : memref<8x384xf32, #tpu.memory_space<vmem>>, vector<8x6xf32>
    %c0_90 = arith.constant 0 : index
    %c140 = arith.constant 140 : index
    %137 = vector.load %arg16[%c0_90, %c140] : memref<8x384xf32, #tpu.memory_space<vmem>>, vector<8x6xf32>
    %c0_91 = arith.constant 0 : index
    %c268 = arith.constant 268 : index
    %138 = vector.load %arg16[%c0_91, %c268] : memref<8x384xf32, #tpu.memory_space<vmem>>, vector<8x6xf32>
    %c0_92 = arith.constant 0 : index
    %c18 = arith.constant 18 : index
    %139 = vector.load %arg16[%c0_92, %c18] : memref<8x384xf32, #tpu.memory_space<vmem>>, vector<8x6xf32>
    %c0_93 = arith.constant 0 : index
    %c146 = arith.constant 146 : index
    %140 = vector.load %arg16[%c0_93, %c146] : memref<8x384xf32, #tpu.memory_space<vmem>>, vector<8x6xf32>
    %c0_94 = arith.constant 0 : index
    %c274 = arith.constant 274 : index
    %141 = vector.load %arg16[%c0_94, %c274] : memref<8x384xf32, #tpu.memory_space<vmem>>, vector<8x6xf32>
    %c0_95 = arith.constant 0 : index
    %c24 = arith.constant 24 : index
    %142 = vector.load %arg16[%c0_95, %c24] : memref<8x384xf32, #tpu.memory_space<vmem>>, vector<8x6xf32>
    %c0_96 = arith.constant 0 : index
    %c152 = arith.constant 152 : index
    %143 = vector.load %arg16[%c0_96, %c152] : memref<8x384xf32, #tpu.memory_space<vmem>>, vector<8x6xf32>
    %c0_97 = arith.constant 0 : index
    %c280 = arith.constant 280 : index
    %144 = vector.load %arg16[%c0_97, %c280] : memref<8x384xf32, #tpu.memory_space<vmem>>, vector<8x6xf32>
    %c0_98 = arith.constant 0 : index
    %c30 = arith.constant 30 : index
    %145 = vector.load %arg16[%c0_98, %c30] : memref<8x384xf32, #tpu.memory_space<vmem>>, vector<8x6xf32>
    %c0_99 = arith.constant 0 : index
    %c158 = arith.constant 158 : index
    %146 = vector.load %arg16[%c0_99, %c158] : memref<8x384xf32, #tpu.memory_space<vmem>>, vector<8x6xf32>
    %c0_100 = arith.constant 0 : index
    %c286 = arith.constant 286 : index
    %147 = vector.load %arg16[%c0_100, %c286] : memref<8x384xf32, #tpu.memory_space<vmem>>, vector<8x6xf32>
    %c0_101 = arith.constant 0 : index
    %c36 = arith.constant 36 : index
    %148 = vector.load %arg16[%c0_101, %c36] : memref<8x384xf32, #tpu.memory_space<vmem>>, vector<8x6xf32>
    %c0_102 = arith.constant 0 : index
    %c164 = arith.constant 164 : index
    %149 = vector.load %arg16[%c0_102, %c164] : memref<8x384xf32, #tpu.memory_space<vmem>>, vector<8x6xf32>
    %c0_103 = arith.constant 0 : index
    %c292 = arith.constant 292 : index
    %150 = vector.load %arg16[%c0_103, %c292] : memref<8x384xf32, #tpu.memory_space<vmem>>, vector<8x6xf32>
    %c0_104 = arith.constant 0 : index
    %c42 = arith.constant 42 : index
    %151 = vector.load %arg16[%c0_104, %c42] : memref<8x384xf32, #tpu.memory_space<vmem>>, vector<8x6xf32>
    %c0_105 = arith.constant 0 : index
    %c170 = arith.constant 170 : index
    %152 = vector.load %arg16[%c0_105, %c170] : memref<8x384xf32, #tpu.memory_space<vmem>>, vector<8x6xf32>
    %c0_106 = arith.constant 0 : index
    %c298 = arith.constant 298 : index
    %153 = vector.load %arg16[%c0_106, %c298] : memref<8x384xf32, #tpu.memory_space<vmem>>, vector<8x6xf32>
    %c0_107 = arith.constant 0 : index
    %c48 = arith.constant 48 : index
    %154 = vector.load %arg16[%c0_107, %c48] : memref<8x384xf32, #tpu.memory_space<vmem>>, vector<8x6xf32>
    %c0_108 = arith.constant 0 : index
    %c176 = arith.constant 176 : index
    %155 = vector.load %arg16[%c0_108, %c176] : memref<8x384xf32, #tpu.memory_space<vmem>>, vector<8x6xf32>
    %c0_109 = arith.constant 0 : index
    %c304 = arith.constant 304 : index
    %156 = vector.load %arg16[%c0_109, %c304] : memref<8x384xf32, #tpu.memory_space<vmem>>, vector<8x6xf32>
    %c0_110 = arith.constant 0 : index
    %c54 = arith.constant 54 : index
    %157 = vector.load %arg16[%c0_110, %c54] : memref<8x384xf32, #tpu.memory_space<vmem>>, vector<8x6xf32>
    %c0_111 = arith.constant 0 : index
    %c182 = arith.constant 182 : index
    %158 = vector.load %arg16[%c0_111, %c182] : memref<8x384xf32, #tpu.memory_space<vmem>>, vector<8x6xf32>
    %c0_112 = arith.constant 0 : index
    %c310 = arith.constant 310 : index
    %159 = vector.load %arg16[%c0_112, %c310] : memref<8x384xf32, #tpu.memory_space<vmem>>, vector<8x6xf32>
    %c0_113 = arith.constant 0 : index
    %c60 = arith.constant 60 : index
    %160 = vector.load %arg16[%c0_113, %c60] : memref<8x384xf32, #tpu.memory_space<vmem>>, vector<8x6xf32>
    %c0_114 = arith.constant 0 : index
    %c188 = arith.constant 188 : index
    %161 = vector.load %arg16[%c0_114, %c188] : memref<8x384xf32, #tpu.memory_space<vmem>>, vector<8x6xf32>
    %c0_115 = arith.constant 0 : index
    %c316 = arith.constant 316 : index
    %162 = vector.load %arg16[%c0_115, %c316] : memref<8x384xf32, #tpu.memory_space<vmem>>, vector<8x6xf32>
    %163 = vector.shape_cast %130 : vector<8x6xf32> to vector<1x8x6xf32>
    %164 = vector.shape_cast %133 : vector<8x6xf32> to vector<1x8x6xf32>
    %165 = vector.shape_cast %136 : vector<8x6xf32> to vector<1x8x6xf32>
    %166 = vector.shape_cast %139 : vector<8x6xf32> to vector<1x8x6xf32>
    %167 = vector.shape_cast %142 : vector<8x6xf32> to vector<1x8x6xf32>
    %168 = vector.shape_cast %145 : vector<8x6xf32> to vector<1x8x6xf32>
    %169 = vector.shape_cast %148 : vector<8x6xf32> to vector<1x8x6xf32>
    %170 = vector.shape_cast %151 : vector<8x6xf32> to vector<1x8x6xf32>
    %171 = vector.shape_cast %154 : vector<8x6xf32> to vector<1x8x6xf32>
    %172 = vector.shape_cast %157 : vector<8x6xf32> to vector<1x8x6xf32>
    %173 = vector.shape_cast %160 : vector<8x6xf32> to vector<1x8x6xf32>
    %174 = tpu.concatenate %163, %164, %165, %166, %167, %168, %169, %170, %171, %172, %173 in 0 : vector<1x8x6xf32>, vector<1x8x6xf32>, vector<1x8x6xf32>, vector<1x8x6xf32>, vector<1x8x6xf32>, vector<1x8x6xf32>, vector<1x8x6xf32>, vector<1x8x6xf32>, vector<1x8x6xf32>, vector<1x8x6xf32>, vector<1x8x6xf32> -> vector<11x8x6xf32>
    %175 = arith.truncf %174 : vector<11x8x6xf32> to vector<11x8x6xbf16>
    %176 = vector.shape_cast %131 : vector<8x6xf32> to vector<1x8x6xf32>
    %177 = vector.shape_cast %134 : vector<8x6xf32> to vector<1x8x6xf32>
    %178 = vector.shape_cast %137 : vector<8x6xf32> to vector<1x8x6xf32>
    %179 = vector.shape_cast %140 : vector<8x6xf32> to vector<1x8x6xf32>
    %180 = vector.shape_cast %143 : vector<8x6xf32> to vector<1x8x6xf32>
    %181 = vector.shape_cast %146 : vector<8x6xf32> to vector<1x8x6xf32>
    %182 = vector.shape_cast %149 : vector<8x6xf32> to vector<1x8x6xf32>
    %183 = vector.shape_cast %152 : vector<8x6xf32> to vector<1x8x6xf32>
    %184 = vector.shape_cast %155 : vector<8x6xf32> to vector<1x8x6xf32>
    %185 = vector.shape_cast %158 : vector<8x6xf32> to vector<1x8x6xf32>
    %186 = vector.shape_cast %161 : vector<8x6xf32> to vector<1x8x6xf32>
    %187 = tpu.concatenate %176, %177, %178, %179, %180, %181, %182, %183, %184, %185, %186 in 0 : vector<1x8x6xf32>, vector<1x8x6xf32>, vector<1x8x6xf32>, vector<1x8x6xf32>, vector<1x8x6xf32>, vector<1x8x6xf32>, vector<1x8x6xf32>, vector<1x8x6xf32>, vector<1x8x6xf32>, vector<1x8x6xf32>, vector<1x8x6xf32> -> vector<11x8x6xf32>
    %188 = arith.truncf %187 : vector<11x8x6xf32> to vector<11x8x6xbf16>
    %189 = vector.shape_cast %132 : vector<8x6xf32> to vector<1x8x6xf32>
    %190 = vector.shape_cast %135 : vector<8x6xf32> to vector<1x8x6xf32>
    %191 = vector.shape_cast %138 : vector<8x6xf32> to vector<1x8x6xf32>
    %192 = vector.shape_cast %141 : vector<8x6xf32> to vector<1x8x6xf32>
    %193 = vector.shape_cast %144 : vector<8x6xf32> to vector<1x8x6xf32>
    %194 = vector.shape_cast %147 : vector<8x6xf32> to vector<1x8x6xf32>
    %195 = vector.shape_cast %150 : vector<8x6xf32> to vector<1x8x6xf32>
    %196 = vector.shape_cast %153 : vector<8x6xf32> to vector<1x8x6xf32>
    %197 = vector.shape_cast %156 : vector<8x6xf32> to vector<1x8x6xf32>
    %198 = vector.shape_cast %159 : vector<8x6xf32> to vector<1x8x6xf32>
    %199 = vector.shape_cast %162 : vector<8x6xf32> to vector<1x8x6xf32>
    %200 = tpu.concatenate %189, %190, %191, %192, %193, %194, %195, %196, %197, %198, %199 in 0 : vector<1x8x6xf32>, vector<1x8x6xf32>, vector<1x8x6xf32>, vector<1x8x6xf32>, vector<1x8x6xf32>, vector<1x8x6xf32>, vector<1x8x6xf32>, vector<1x8x6xf32>, vector<1x8x6xf32>, vector<1x8x6xf32>, vector<1x8x6xf32> -> vector<11x8x6xf32>
    %201 = arith.truncf %200 : vector<11x8x6xf32> to vector<11x8x6xbf16>
    "tpu.trace_start"() <{level = 10 : i32, message = "htd,hsd->hts"}> : () -> ()
    %cst_116 = arith.constant dense<0.000000e+00> : vector<11x8x8xf32>
    %202 = tpu.matmul %175, %188, %cst_116 {dimension_numbers = #tpu.dot_dimension_numbers<[2], [2], [1], [1], [0, 0, 0, 1, 1, 1], [0], [0]>} : vector<11x8x6xbf16>, vector<11x8x6xbf16>, vector<11x8x8xf32> -> vector<11x8x8xf32>
    "tpu.trace_stop"() : () -> ()
    %203 = tpu.iota {dimensions = array<i32: 0>} : vector<8x8xi32>
    %204 = tpu.iota {dimensions = array<i32: 1>} : vector<8x8xi32>
    %205 = arith.cmpi sle, %204, %203 : vector<8x8xi32>
    %206 = vector.shape_cast %205 : vector<8x8xi1> to vector<1x8x8xi1>
    %cst_117 = arith.constant -1.000000e+04 : f32
    %207 = vector.shape_cast %206 : vector<1x8x8xi1> to vector<1x8x8xi1>
    %208 = vector.broadcast %207 : vector<1x8x8xi1> to vector<11x8x8xi1>
    %209 = vector.broadcast %cst_117 : f32 to vector<11x8x8xf32>
    %210 = arith.select %208, %202, %209 : vector<11x8x8xi1>, vector<11x8x8xf32>
    %211 = vector.shape_cast %122 : vector<8x8xf32> to vector<1x8x8xf32>
    %212 = vector.broadcast %211 : vector<1x8x8xf32> to vector<11x8x8xf32>
    %213 = arith.addf %210, %212 : vector<11x8x8xf32>
    %cst_118 = arith.constant dense<0xFF800000> : vector<11x8xf32>
    %214 = vector.multi_reduction <maximumf>, %213, %cst_118 [2] : vector<11x8x8xf32> to vector<11x8xf32>
    %215 = vector.shape_cast %214 : vector<11x8xf32> to vector<11x8x1xf32>
    %216 = vector.broadcast %215 : vector<11x8x1xf32> to vector<11x8x8xf32>
    %217 = arith.subf %213, %216 : vector<11x8x8xf32>
    %218 = math.exp %217 : vector<11x8x8xf32>
    %cst_119 = arith.constant dense<0.000000e+00> : vector<11x8xf32>
    %219 = vector.multi_reduction <add>, %218, %cst_119 [2] : vector<11x8x8xf32> to vector<11x8xf32>
    %220 = vector.shape_cast %219 : vector<11x8xf32> to vector<11x8x1xf32>
    %221 = vector.broadcast %220 : vector<11x8x1xf32> to vector<11x8x8xf32>
    %222 = arith.divf %218, %221 : vector<11x8x8xf32>
    %223 = arith.truncf %222 : vector<11x8x8xf32> to vector<11x8x8xbf16>
    "tpu.trace_start"() <{level = 10 : i32, message = "hts,hsd->htd"}> : () -> ()
    %cst_120 = arith.constant dense<0.000000e+00> : vector<11x8x6xf32>
    %224 = tpu.matmul %223, %201, %cst_120 {dimension_numbers = #tpu.dot_dimension_numbers<[2], [1], [1], [2], [0, 0, 0, 1, 1, 2], [0], [0]>} : vector<11x8x8xbf16>, vector<11x8x6xbf16>, vector<11x8x6xf32> -> vector<11x8x6xf32>
    %cst_121 = arith.constant 0.000000e+00 : f32
    "tpu.trace_stop"() : () -> ()
    %225 = vector.broadcast %cst_121 : f32 to vector<8x128xf32>
    %c0_122 = arith.constant 0 : index
    %c0_123 = arith.constant 0 : index
    %226 = vector.load %arg17[%c0_122, %c0_123] : memref<8x128xf32, #tpu.memory_space<vmem>>, vector<8x128xf32>
    tpu.vector_store %arg17[%c0_122, %c0_123], %225 {strides = array<i32>} : memref<8x128xf32, #tpu.memory_space<vmem>>, vector<8x128xf32>,
    %227 = vector.extract_strided_slice %224 {offsets = [0, 0, 0], sizes = [1, 8, 6], strides = [1, 1, 1]} : vector<11x8x6xf32> to vector<1x8x6xf32>
    %228 = vector.shape_cast %227 : vector<1x8x6xf32> to vector<8x6xf32>
    %c0_124 = arith.constant 0 : index
    %c0_125 = arith.constant 0 : index
    %229 = vector.load %arg17[%c0_124, %c0_125] : memref<8x128xf32, #tpu.memory_space<vmem>>, vector<8x6xf32>
    tpu.vector_store %arg17[%c0_124, %c0_125], %228 {strides = array<i32>} : memref<8x128xf32, #tpu.memory_space<vmem>>, vector<8x6xf32>,
    %230 = vector.extract_strided_slice %224 {offsets = [1, 0, 0], sizes = [1, 8, 6], strides = [1, 1, 1]} : vector<11x8x6xf32> to vector<1x8x6xf32>
    %231 = vector.shape_cast %230 : vector<1x8x6xf32> to vector<8x6xf32>
    %c0_126 = arith.constant 0 : index
    %c6_127 = arith.constant 6 : index
    %232 = vector.load %arg17[%c0_126, %c6_127] : memref<8x128xf32, #tpu.memory_space<vmem>>, vector<8x6xf32>
    tpu.vector_store %arg17[%c0_126, %c6_127], %231 {strides = array<i32>} : memref<8x128xf32, #tpu.memory_space<vmem>>, vector<8x6xf32>,
    %233 = vector.extract_strided_slice %224 {offsets = [2, 0, 0], sizes = [1, 8, 6], strides = [1, 1, 1]} : vector<11x8x6xf32> to vector<1x8x6xf32>
    %234 = vector.shape_cast %233 : vector<1x8x6xf32> to vector<8x6xf32>
    %c0_128 = arith.constant 0 : index
    %c12_129 = arith.constant 12 : index
    %235 = vector.load %arg17[%c0_128, %c12_129] : memref<8x128xf32, #tpu.memory_space<vmem>>, vector<8x6xf32>
    tpu.vector_store %arg17[%c0_128, %c12_129], %234 {strides = array<i32>} : memref<8x128xf32, #tpu.memory_space<vmem>>, vector<8x6xf32>,
    %236 = vector.extract_strided_slice %224 {offsets = [3, 0, 0], sizes = [1, 8, 6], strides = [1, 1, 1]} : vector<11x8x6xf32> to vector<1x8x6xf32>
    %237 = vector.shape_cast %236 : vector<1x8x6xf32> to vector<8x6xf32>
    %c0_130 = arith.constant 0 : index
    %c18_131 = arith.constant 18 : index
    %238 = vector.load %arg17[%c0_130, %c18_131] : memref<8x128xf32, #tpu.memory_space<vmem>>, vector<8x6xf32>
    tpu.vector_store %arg17[%c0_130, %c18_131], %237 {strides = array<i32>} : memref<8x128xf32, #tpu.memory_space<vmem>>, vector<8x6xf32>,
    %239 = vector.extract_strided_slice %224 {offsets = [4, 0, 0], sizes = [1, 8, 6], strides = [1, 1, 1]} : vector<11x8x6xf32> to vector<1x8x6xf32>
    %240 = vector.shape_cast %239 : vector<1x8x6xf32> to vector<8x6xf32>
    %c0_132 = arith.constant 0 : index
    %c24_133 = arith.constant 24 : index
    %241 = vector.load %arg17[%c0_132, %c24_133] : memref<8x128xf32, #tpu.memory_space<vmem>>, vector<8x6xf32>
    tpu.vector_store %arg17[%c0_132, %c24_133], %240 {strides = array<i32>} : memref<8x128xf32, #tpu.memory_space<vmem>>, vector<8x6xf32>,
    %242 = vector.extract_strided_slice %224 {offsets = [5, 0, 0], sizes = [1, 8, 6], strides = [1, 1, 1]} : vector<11x8x6xf32> to vector<1x8x6xf32>
    %243 = vector.shape_cast %242 : vector<1x8x6xf32> to vector<8x6xf32>
    %c0_134 = arith.constant 0 : index
    %c30_135 = arith.constant 30 : index
    %244 = vector.load %arg17[%c0_134, %c30_135] : memref<8x128xf32, #tpu.memory_space<vmem>>, vector<8x6xf32>
    tpu.vector_store %arg17[%c0_134, %c30_135], %243 {strides = array<i32>} : memref<8x128xf32, #tpu.memory_space<vmem>>, vector<8x6xf32>,
    %245 = vector.extract_strided_slice %224 {offsets = [6, 0, 0], sizes = [1, 8, 6], strides = [1, 1, 1]} : vector<11x8x6xf32> to vector<1x8x6xf32>
    %246 = vector.shape_cast %245 : vector<1x8x6xf32> to vector<8x6xf32>
    %c0_136 = arith.constant 0 : index
    %c36_137 = arith.constant 36 : index
    %247 = vector.load %arg17[%c0_136, %c36_137] : memref<8x128xf32, #tpu.memory_space<vmem>>, vector<8x6xf32>
    tpu.vector_store %arg17[%c0_136, %c36_137], %246 {strides = array<i32>} : memref<8x128xf32, #tpu.memory_space<vmem>>, vector<8x6xf32>,
    %248 = vector.extract_strided_slice %224 {offsets = [7, 0, 0], sizes = [1, 8, 6], strides = [1, 1, 1]} : vector<11x8x6xf32> to vector<1x8x6xf32>
    %249 = vector.shape_cast %248 : vector<1x8x6xf32> to vector<8x6xf32>
    %c0_138 = arith.constant 0 : index
    %c42_139 = arith.constant 42 : index
    %250 = vector.load %arg17[%c0_138, %c42_139] : memref<8x128xf32, #tpu.memory_space<vmem>>, vector<8x6xf32>
    tpu.vector_store %arg17[%c0_138, %c42_139], %249 {strides = array<i32>} : memref<8x128xf32, #tpu.memory_space<vmem>>, vector<8x6xf32>,
    %251 = vector.extract_strided_slice %224 {offsets = [8, 0, 0], sizes = [1, 8, 6], strides = [1, 1, 1]} : vector<11x8x6xf32> to vector<1x8x6xf32>
    %252 = vector.shape_cast %251 : vector<1x8x6xf32> to vector<8x6xf32>
    %c0_140 = arith.constant 0 : index
    %c48_141 = arith.constant 48 : index
    %253 = vector.load %arg17[%c0_140, %c48_141] : memref<8x128xf32, #tpu.memory_space<vmem>>, vector<8x6xf32>
    tpu.vector_store %arg17[%c0_140, %c48_141], %252 {strides = array<i32>} : memref<8x128xf32, #tpu.memory_space<vmem>>, vector<8x6xf32>,
    %254 = vector.extract_strided_slice %224 {offsets = [9, 0, 0], sizes = [1, 8, 6], strides = [1, 1, 1]} : vector<11x8x6xf32> to vector<1x8x6xf32>
    %255 = vector.shape_cast %254 : vector<1x8x6xf32> to vector<8x6xf32>
    %c0_142 = arith.constant 0 : index
    %c54_143 = arith.constant 54 : index
    %256 = vector.load %arg17[%c0_142, %c54_143] : memref<8x128xf32, #tpu.memory_space<vmem>>, vector<8x6xf32>
    tpu.vector_store %arg17[%c0_142, %c54_143], %255 {strides = array<i32>} : memref<8x128xf32, #tpu.memory_space<vmem>>, vector<8x6xf32>,
    %257 = vector.extract_strided_slice %224 {offsets = [10, 0, 0], sizes = [1, 8, 6], strides = [1, 1, 1]} : vector<11x8x6xf32> to vector<1x8x6xf32>
    %258 = vector.shape_cast %257 : vector<1x8x6xf32> to vector<8x6xf32>
    %c0_144 = arith.constant 0 : index
    %c60_145 = arith.constant 60 : index
    %259 = vector.load %arg17[%c0_144, %c60_145] : memref<8x128xf32, #tpu.memory_space<vmem>>, vector<8x6xf32>
    tpu.vector_store %arg17[%c0_144, %c60_145], %258 {strides = array<i32>} : memref<8x128xf32, #tpu.memory_space<vmem>>, vector<8x6xf32>,
    %c0_146 = arith.constant 0 : index
    %c0_147 = arith.constant 0 : index
    %260 = vector.load %arg17[%c0_146, %c0_147] : memref<8x128xf32, #tpu.memory_space<vmem>>, vector<8x128xf32>
    %261 = arith.truncf %260 : vector<8x128xf32> to vector<8x128xbf16>
    %c0_148 = arith.constant 0 : index
    %c0_149 = arith.constant 0 : index
    %262 = vector.load %arg9[%c0_148, %c0_149] : memref<128x128xbf16, #tpu.memory_space<vmem>>, vector<128x128xbf16>
    %cst_150 = arith.constant dense<0.000000e+00> : vector<8x128xf32>
    %263 = tpu.matmul %261, %262, %cst_150 {dimension_numbers = #tpu.dot_dimension_numbers<[1], [0], [0], [1], [0, 0, 1, 1], [], []>} : vector<8x128xbf16>, vector<128x128xbf16>, vector<8x128xf32> -> vector<8x128xf32>
    %c0_151 = arith.constant 0 : index
    %c0_152 = arith.constant 0 : index
    %264 = vector.load %arg10[%c0_151, %c0_152] : memref<1x128xf32, #tpu.memory_space<vmem>>, vector<1x128xf32>
    %265 = vector.broadcast %264 : vector<1x128xf32> to vector<8x128xf32>
    %266 = arith.addf %263, %265 : vector<8x128xf32>
    %c0_153 = arith.constant 0 : index
    %c0_154 = arith.constant 0 : index
    %c0_155 = arith.constant 0 : index
    %267 = vector.load %arg13[%c0_153, %c0_154, %c0_155] : memref<1x8x128xf32, #tpu.memory_space<vmem>>, vector<1x8x128xf32>
    %268 = vector.shape_cast %267 : vector<1x8x128xf32> to vector<8x128xf32>
    %269 = vector.shape_cast %266 : vector<8x128xf32> to vector<1x8x128xf32>
    tpu.vector_store %arg13[%c0_153, %c0_154, %c0_155], %269 {strides = array<i32>} : memref<1x8x128xf32, #tpu.memory_space<vmem>>, vector<1x8x128xf32>,
    return
  }
  func.func @transform_0(%arg0: i32) -> (i32, i32, i32) {
    %c0_i32 = arith.constant 0 : i32
    %c0_i32_0 = arith.constant 0 : i32
    %c0_i32_1 = arith.constant 0 : i32
    return %arg0, %c0_i32, %c0_i32_0 : i32, i32, i32
  }
  func.func @transform_1(%arg0: i32) -> (i32, i32) {
    %c0_i32 = arith.constant 0 : i32
    %c0_i32_0 = arith.constant 0 : i32
    %c0_i32_1 = arith.constant 0 : i32
    return %c0_i32, %c0_i32_0 : i32, i32
  }
  func.func @transform_2(%arg0: i32) -> (i32, i32) {
    %c0_i32 = arith.constant 0 : i32
    %c0_i32_0 = arith.constant 0 : i32
    %c0_i32_1 = arith.constant 0 : i32
    return %c0_i32, %c0_i32_0 : i32, i32
  }
  func.func @transform_3(%arg0: i32) -> (i32, i32) {
    %c0_i32 = arith.constant 0 : i32
    %c0_i32_0 = arith.constant 0 : i32
    %c0_i32_1 = arith.constant 0 : i32
    return %c0_i32, %c0_i32_0 : i32, i32
  }
  func.func @transform_4(%arg0: i32) -> (i32, i32) {
    %c0_i32 = arith.constant 0 : i32
    %c0_i32_0 = arith.constant 0 : i32
    %c0_i32_1 = arith.constant 0 : i32
    return %c0_i32, %c0_i32_0 : i32, i32
  }
  func.func @transform_5(%arg0: i32) -> (i32, i32, i32) {
    %c0_i32 = arith.constant 0 : i32
    %c0_i32_0 = arith.constant 0 : i32
    %c0_i32_1 = arith.constant 0 : i32
    return %arg0, %c0_i32, %c0_i32_0 : i32, i32, i32
  }
  func.func @transform_6(%arg0: i32) -> (i32, i32) {
    %c0_i32 = arith.constant 0 : i32
    %c0_i32_0 = arith.constant 0 : i32
    %c0_i32_1 = arith.constant 0 : i32
    return %c0_i32, %c0_i32_0 : i32, i32
  }
  func.func @transform_7(%arg0: i32) -> (i32, i32) {
    %c0_i32 = arith.constant 0 : i32
    %c0_i32_0 = arith.constant 0 : i32
    %c0_i32_1 = arith.constant 0 : i32
    return %c0_i32, %c0_i32_0 : i32, i32
  }
  func.func @transform_8(%arg0: i32) -> (i32, i32) {
    %c0_i32 = arith.constant 0 : i32
    %c0_i32_0 = arith.constant 0 : i32
    %c0_i32_1 = arith.constant 0 : i32
    return %c0_i32, %c0_i32_0 : i32, i32
  }
  func.func @transform_9(%arg0: i32) -> (i32, i32) {
    %c0_i32 = arith.constant 0 : i32
    %c0_i32_0 = arith.constant 0 : i32
    %c0_i32_1 = arith.constant 0 : i32
    return %c0_i32, %c0_i32_0 : i32, i32
  }
  func.func @transform_10(%arg0: i32) -> (i32, i32, i32) {
    %c0_i32 = arith.constant 0 : i32
    %c0_i32_0 = arith.constant 0 : i32
    %c0_i32_1 = arith.constant 0 : i32
    return %arg0, %c0_i32, %c0_i32_0 : i32, i32, i32
  }
  func.func @transform_11(%arg0: i32) -> (i32, i32, i32) {
    %c0_i32 = arith.constant 0 : i32
    %c0_i32_0 = arith.constant 0 : i32
    %c0_i32_1 = arith.constant 0 : i32
    return %arg0, %c0_i32, %c0_i32_0 : i32, i32, i32
  }
  func.func @transform_12(%arg0: i32) -> (i32, i32, i32) {
    %c0_i32 = arith.constant 0 : i32
    %c0_i32_0 = arith.constant 0 : i32
    %c0_i32_1 = arith.constant 0 : i32
    return %arg0, %c0_i32, %c0_i32_0 : i32, i32, i32
  }
}

</mosaic_0001>

<bundles_post_ra>
// kernel: _forward.1
= control target key start
LH: loop header
LB: loop body
LE: loop exit
PB: predicated region body
PF: predicated region fallthrough
CT: control target
= control target key end

     0   :  { %s5635_s0 = inlined_call_operand.vmem [shape: f32[2,8,256], index: 0, kind: input, shape index: {}]   ;;  %s5636_s1 = inlined_call_operand.hbm [shape: bf16[256,768], index: 1, kind: input, shape index: {}]   ;;  %s5637_s2 = inlined_call_operand.vmem [shape: f32[1,768], index: 2, kind: input, shape index: {}]   ;;  %s5638_s3 = inlined_call_operand.hbm [shape: bf16[256,256], index: 3, kind: input, shape index: {}]   ;;  %s5639_s4 = inlined_call_operand.vmem [shape: f32[1,256], index: 4, kind: input, shape index: {}]   ;;  %s5640_s5 = inlined_call_operand.vmem [shape: f32[2,8,128], index: 5, kind: input, shape index: {}]   ;;  %s5641_s6 = inlined_call_operand.hbm [shape: bf16[128,384], index: 6, kind: input, shape index: {}]   ;;  %s5642_s7 = inlined_call_operand.vmem [shape: f32[1,384], index: 7, kind: input, shape index: {}]   ;;  %s5643_s8 = inlined_call_operand.hbm [shape: bf16[128,128], index: 8, kind: input, shape index: {}]   ;;  %s5644_s9 = inlined_call_operand.vmem [shape: f32[1,128], index: 9, kind: input, shape index: {}]   ;;  %s5645_s10 = inlined_call_operand.vmem [shape: f32[2,8,8], index: 10, kind: input, shape index: {}]   ;;  %s5646_s11 = inlined_call_operand.hbm [shape: f32[2,8,256], index: 11, kind: output, shape index: {0}]   ;;  %s5647_s12 = inlined_call_operand.hbm [shape: f32[2,8,128], index: 12, kind: output, shape index: {1}]  }
   0x1   :  { %5654 = sst [smem:[#allocation28_spill]] %s5636_s1 }
   0x2   :  { %5655 = sst [smem:[#allocation29_spill]] %s5638_s3 }
   0x3   :  { %5656 = sst [smem:[#allocation30_spill]] %s5644_s9 }
   0x4   :  { %18 = vsyncpa [#allocation7], 0 }
   0x5   :  { %19 = vsyncpa [#allocation10], 0 }
   0x6   :  { %20 = vsyncpa [#allocation13], 0 }
   0x7   :  { %21 = vsyncpa [#allocation8], 0 }
   0x8   :  { %23 = vsyncpa [#allocation8 + $0x1], 0 }
   0x9   :  { %24 = vsyncpa [#allocation16], 0 }
   0xa   :  { %26 = vsyncpa [#allocation16 + $0x1], 0  ;;  %s4996_s21 = smov 0   ;;  %s4998_s22 = smov 0  }
   0xb   :  { %s5000_s23 = smov 0   ;;  %s5002_s24 = smov 0  }
   0xc LB: > { %5657 = sst [smem:[#allocation22_spill]] %s4881_s21  ;;  %s5017_s25 = sadd.s32 4294967295, %s4893_s24   ;;  %s4893_s24 = sphi %s5002_s24, %s5675_s24   ;;  %s4889_s23 = sphi %s5000_s23, %s5677_s23   ;;  %s4885_s22 = sphi %s4998_s22, %s5679_s22   ;;  %s4881_s21 = sphi %s4996_s21, %s5678_s21  }
   0xd   : > { %5658 = sst [smem:[#allocation23_spill]] %s4889_s23  ;;  %s3583_s26 = sadd.s32 4294967294, %s4893_s24  }
   0xe   : > { %5659 = sst [smem:[#allocation24_spill]] %s4893_s24  ;;  %s5021_s27 = sadd.s32 1, %s4893_s24  }
   0xf   : > { %5660 = sst [smem:[#allocation25_spill]] %s5021_s27  ;;  %s285_s28 = sadd.s32 1, %s4889_s23 }
  0x10   : > { %s282_s29 = ssub.s32 %s4893_s24, %s5021_s27  ;;  %p295_p0 = scmp.ne.s32.totalorder %s4889_s23, %s4885_s22 }
  0x11   : > { %p283_p1 = scmp.eq.s32.totalorder %s282_s29, 0  ;;  %p296_p2 = scmp.eq.s32.totalorder %s5017_s25, 1 }
  0x12   : > { %p301_p3 = scmp.ne.s32.totalorder %s4885_s22, %s4881_s21  ;;  %p302_p4 = scmp.eq.s32.totalorder %s3583_s26, 1 }
  0x13   : > { %s5032_s30 = scalar_select %p283_p1, %s4889_s23, %s285_s28  }
  0x14   : > { %p5034_p5 = por %p296_p2, %p295_p0  ;;  %p5038_p6 = por %p302_p4, %p301_p3 }
  0x15   : > { %5661 = sst [smem:[#allocation26_spill]] %s5032_s30  ;;  %p3584_p7 = scmp.ge.s32.totalorder %s4893_s24, 1 }
  0x16   : > { %s5663_s14 = scalar_select %p5038_p6, 1, 0 }
  0x17   : > { %p335_p8 = scmp.lt.s32.totalorder %s4893_s24, 3  ;;  %p4488_p9 = scmp.eq.s32.totalorder %s5017_s25, 0 }
  0x18   : > { %5664 = sst [smem:[#allocation27_spill]] %s5663_s14  ;;  %s4895_s19 = smov [#allocation9]  }
  0x19   : > { %p5045_p10 = pnand %p3584_p7, %p335_p8  ;;  %s5666_s3 = sld [smem:[#allocation29_spill]] }
  0x1a   : > { %s365_s20 = sshll.u32 %s4895_s19, 4  ;;  %s5668_s1 = sld [smem:[#allocation28_spill]]  ;;  %s366_s20 = int_to_ptr.vmem [resolvable:$true] %s365_s20 }
  0x1b   : > { %p4468_p11 = pneg %p5045_p10  ;;  %s4896_s16 = smov 128  }
  0x1c   : > { %s4897_s17 = smov 8   ;;  %s4899_s23 = smov 384  }
  0x1d   : > { %p5056_p12 = pnand %p4488_p9, %p4468_p11  ;;  %s4900_s27 = smov 24  }
  0x1e   : > { %s380_s28 = sshll.u32 %s5641_s6, 4  ;;  %s4901_s29 = smov [#allocation11]   ;;  %s381_s28 = int_to_ptr.hbm [resolvable:$true] %s380_s28 }
  0x1f   : > { %s363_s18 = sshll.u32 %s5666_s3, 4  ;;  %s4898_s3 = smov [#allocation6]   ;;  %s364_s18 = int_to_ptr.hbm [resolvable:$true] %s363_s18 }
  0x20   : > { %s346_s30 = sshll.u32 %s5668_s1, 4  ;;  %s348_s19 = sshll.u32 %s4898_s3, 4  ;;  %s347_s30 = int_to_ptr.hbm [resolvable:$true] %s346_s30  ;;  %s349_s19 = int_to_ptr.vmem [resolvable:$true] %s348_s19 }
  0x21   : > { %4474 = dma.hbm_to_vmem [thread:$0]  (!%p5056_p12), %s364_s18, 4096, %s366_s20, [#allocation10], %s4896_s16, %s4896_s16, %s4897_s17  }
  0x22   : > { %4471 = dma.hbm_to_vmem [thread:$0]  (!%p5056_p12), %s347_s30, 12288, %s349_s19, [#allocation7], %s4899_s23, %s4899_s23, %s4900_s27  }
  0x23   : > { %s382_s1 = sshll.u32 %s4901_s29, 4  ;;  %s397_s18 = sshll.u32 %s5643_s8, 4  ;;  %s383_s1 = int_to_ptr.vmem [resolvable:$true] %s382_s1  ;;  %s398_s18 = int_to_ptr.hbm [resolvable:$true] %s397_s18 }
  0x24   : > { %s4902_s20 = smov 192   ;;  %s4903_s3 = smov 12  }
  0x25   : > { %4477 = dma.hbm_to_vmem [thread:$0]  (!%p5056_p12), %s381_s28, 3072, %s383_s1, [#allocation10], %s4902_s20, %s4902_s20, %s4903_s3  }
  0x26   : > { %s4904_s16 = smov [#allocation12]   ;;  %s4905_s27 = smov 64  }
  0x27   : > { %s399_s23 = sshll.u32 %s4904_s16, 4  ;;  %s4906_s21 = smov 4   ;;  %s400_s23 = int_to_ptr.vmem [resolvable:$true] %s399_s23 }
  0x28   : > { %4480 = dma.hbm_to_vmem [thread:$0]  (!%p5056_p12), %s398_s18, 1024, %s400_s23, [#allocation13], %s4905_s27, %s4905_s27, %s4906_s21  }
  0x29   : > { %440 = sbr.rel (%p5045_p10) target bundleno = 2249 (0x8c9), region = 64 }
  0x2e   : > { %4860 = dma.done.wait (%p4488_p9), [#allocation7], 12288  }
  0x2f   : > { %4862 = vsyncadd (%p4488_p9), [#allocation7], 4294955008 }
  0x30   : > { %4864 = dma.done.wait (%p4488_p9), [#allocation10], 7168  }
  0x31   : > { %4866 = vsyncadd (%p4488_p9), [#allocation10], 4294960128 }
  0x32   : > { %4868 = dma.done.wait (%p4488_p9), [#allocation13], 1024  }
  0x33   : > { %4870 = vsyncadd (%p4488_p9), [#allocation13], 4294966272  ;;  %v3771_v0 = vld [vmem:[#allocation6 + $0x150] sm:$0xf]  ;;  %v4332_v1 = vld [vmem:[#allocation6 + $0x164] sm:$0xf0] }
  0x34   : > { %v3963_v2 = vld [vmem:[#allocation6 + $0x2d0] sm:$0xf]  ;;  %v3772_v3 = vor.u32 %v4332_v1, %v3771_v0  ;;  %v4380_v4 = vld [vmem:[#allocation6 + $0x2e4] sm:$0xf0]  ;;  %v4329_v5 = vld [vmem:[#allocation6 + $0x154] sm:$0xf] }
  0x35   : > { %v3773_v6 = vld [vmem:[#allocation6 + $0x168] sm:$0xf0]  ;;  %v3964_v7 = vor.u32 %v4380_v4, %v3963_v2  ;;  %v4377_v9 = vld [vmem:[#allocation6 + $0x2d4] sm:$0xf]  ;;  %v3747_v11 = vld [vmem:[#allocation6 + $0x120] sm:$0xf] }
  0x36   : > { %v3776_v8 = vor.u32 %v4329_v5, %v3773_v6  ;;  %v3965_v10 = vld [vmem:[#allocation6 + $0x2e8] sm:$0xf0]  ;;  %1119 = vmatpush.bf16.msra.mxu0 %v3772_v3  ;;  %v4326_v13 = vld [vmem:[#allocation6 + $0x134] sm:$0xf0]  ;;  %v3939_v14 = vld [vmem:[#allocation6 + $0x2a0] sm:$0xf] }
  0x37   : > { %v3968_v12 = vor.u32 %v4377_v9, %v3965_v10  ;;  %v4374_v15 = vld [vmem:[#allocation6 + $0x2b4] sm:$0xf0]  ;;  %1132 = vmatpush.bf16.msra.mxu1 %v3964_v7  ;;  %v3748_v16 = vor.u32 %v4326_v13, %v3747_v11  ;;  %v4323_v18 = vld [vmem:[#allocation6 + $0x124] sm:$0xf]  ;;  %v3749_v19 = vld [vmem:[#allocation6 + $0x138] sm:$0xf0] }
  0x38   : > { %1145 = vmatpush.bf16.msra.mxu2 %v3776_v8  ;;  %v3940_v17 = vor.u32 %v4374_v15, %v3939_v14  ;;  %v4371_v20 = vld [vmem:[#allocation6 + $0x2a4] sm:$0xf]  ;;  %v3752_v21 = vor.u32 %v4323_v18, %v3749_v19  ;;  %v3941_v22 = vld [vmem:[#allocation6 + $0x2b8] sm:$0xf0]  ;;  %v3723_v23 = vld [vmem:[#allocation6 + $0xf0] sm:$0xf] }
  0x39   : > { %1158 = vmatpush.bf16.msra.mxu3 %v3968_v12  ;;  %v4320_v24 = vld [vmem:[#allocation6 + $0x104] sm:$0xf0]  ;;  %v3944_v25 = vor.u32 %v4371_v20, %v3941_v22  ;;  %v3915_v26 = vld [vmem:[#allocation6 + $0x270] sm:$0xf]  ;;  %v4317_v28 = vld [vmem:[#allocation6 + $0xf4] sm:$0xf] }
  0x3a   : > { %v4368_v27 = vld [vmem:[#allocation6 + $0x284] sm:$0xf0]  ;;  %1120 = vmatpush.bf16.msra.mxu0 %v3748_v16  ;;  %v3724_v29 = vor.u32 %v4320_v24, %v3723_v23  ;;  %v3725_v30 = vld [vmem:[#allocation6 + $0x108] sm:$0xf0]  ;;  %v4365_v31 = vld [vmem:[#allocation6 + $0x274] sm:$0xf] }
  0x3b   : > { %v3917_v32 = vld [vmem:[#allocation6 + $0x288] sm:$0xf0]  ;;  %1133 = vmatpush.bf16.msra.mxu1 %v3940_v17  ;;  %v3916_v33 = vor.u32 %v4368_v27, %v3915_v26  ;;  %v3728_v34 = vor.u32 %v4317_v28, %v3725_v30  ;;  %v3699_v35 = vld [vmem:[#allocation6 + $0xc0] sm:$0xf]  ;;  %v4314_v36 = vld [vmem:[#allocation6 + $0xd4] sm:$0xf0] }
  0x3c   : > { %1146 = vmatpush.bf16.msra.mxu2 %v3752_v21  ;;  %v3891_v37 = vld [vmem:[#allocation6 + $0x240] sm:$0xf]  ;;  %v3920_v38 = vor.u32 %v4365_v31, %v3917_v32  ;;  %v4362_v39 = vld [vmem:[#allocation6 + $0x254] sm:$0xf0]  ;;  %v4311_v40 = vld [vmem:[#allocation6 + $0xc4] sm:$0xf]  ;;  %v3700_v44 = vor.u32 %v4314_v36, %v3699_v35 }
  0x3d   : > { %1159 = vmatpush.bf16.msra.mxu3 %v3944_v25  ;;  %v3701_v41 = vld [vmem:[#allocation6 + $0xd8] sm:$0xf0]  ;;  %v4359_v42 = vld [vmem:[#allocation6 + $0x244] sm:$0xf]  ;;  %v3892_v45 = vor.u32 %v4362_v39, %v3891_v37  ;;  %v3675_v47 = vld [vmem:[#allocation6 + $0x90] sm:$0xf] }
  0x3e   : > { %v3893_v43 = vld [vmem:[#allocation6 + $0x258] sm:$0xf0]  ;;  %1121 = vmatpush.bf16.msra.mxu0 %v3724_v29  ;;  %v3704_v46 = vor.u32 %v4311_v40, %v3701_v41  ;;  %v4308_v48 = vld [vmem:[#allocation6 + $0xa4] sm:$0xf0]  ;;  %v3867_v49 = vld [vmem:[#allocation6 + $0x210] sm:$0xf] }
  0x3f   : > { %1134 = vmatpush.bf16.msra.mxu1 %v3916_v33  ;;  %v3896_v50 = vor.u32 %v4359_v42, %v3893_v43  ;;  %v4356_v51 = vld [vmem:[#allocation6 + $0x224] sm:$0xf0]  ;;  %v4305_v52 = vld [vmem:[#allocation6 + $0x94] sm:$0xf]  ;;  %v3677_v53 = vld [vmem:[#allocation6 + $0xa8] sm:$0xf0]  ;;  %v3676_v56 = vor.u32 %v4308_v48, %v3675_v47 }
  0x40   : > { %1147 = vmatpush.bf16.msra.mxu2 %v3728_v34  ;;  %v4353_v54 = vld [vmem:[#allocation6 + $0x214] sm:$0xf]  ;;  %v3869_v55 = vld [vmem:[#allocation6 + $0x228] sm:$0xf0]  ;;  %p511_p13 = scmp.lt.s32.totalorder %s5017_s25, 1  ;;  %v3868_v57 = vor.u32 %v4356_v51, %v3867_v49  ;;  %v3680_v58 = vor.u32 %v4305_v52, %v3677_v53  ;;  %s4907_s17 = smov 64  }
  0x41   : > { %1160 = vmatpush.bf16.msra.mxu3 %v3920_v38  ;;  %v3651_v59 = vld [vmem:[#allocation6 + $0x60] sm:$0xf]  ;;  %v4302_v60 = vld [vmem:[#allocation6 + $0x74] sm:$0xf0]  ;;  %v3872_v62 = vor.u32 %v4353_v54, %v3869_v55  ;;  %v4299_v0 = vld [vmem:[#allocation6 + $0x64] sm:$0xf] }
  0x42   : > { %1122 = vmatpush.bf16.msra.mxu0 %v3700_v44  ;;  %v3843_v61 = vld [vmem:[#allocation6 + $0x1e0] sm:$0xf]  ;;  %v4350_v63 = vld [vmem:[#allocation6 + $0x1f4] sm:$0xf0]  ;;  %v3653_v1 = vld [vmem:[#allocation6 + $0x78] sm:$0xf0]  ;;  %v3652_v4 = vor.u32 %v4302_v60, %v3651_v59 }
  0x43   : > { %1135 = vmatpush.bf16.msra.mxu1 %v3892_v45  ;;  %v4347_v2 = vld [vmem:[#allocation6 + $0x1e4] sm:$0xf]  ;;  %v3845_v3 = vld [vmem:[#allocation6 + $0x1f8] sm:$0xf0]  ;;  %s5095_s1 = scalar_select %p511_p13, %s5017_s25, 1  ;;  %v3844_v5 = vor.u32 %v4350_v63, %v3843_v61  ;;  %v3656_v6 = vor.u32 %v4299_v0, %v3653_v1  ;;  %vm1371_vm0 = vcmask 261120  }
  0x44   : > { %1148 = vmatpush.bf16.msra.mxu2 %v3704_v46  ;;  %v3627_v7 = vld [vmem:[#allocation6 + $0x30] sm:$0xf]  ;;  %v4296_v8 = vld [vmem:[#allocation6 + $0x44] sm:$0xf0]  ;;  %v3848_v10 = vor.u32 %v4347_v2, %v3845_v3  ;;  %v4293_v12 = vld [vmem:[#allocation6 + $0x34] sm:$0xf] }
  0x45   : > { %1161 = vmatpush.bf16.msra.mxu3 %v3896_v50  ;;  %v3819_v9 = vld [vmem:[#allocation6 + $0x1b0] sm:$0xf]  ;;  %v4344_v11 = vld [vmem:[#allocation6 + $0x1c4] sm:$0xf0]  ;;  %v3629_v13 = vld [vmem:[#allocation6 + $0x48] sm:$0xf0]  ;;  %v3628_v16 = vor.u32 %v4296_v8, %v3627_v7 }
  0x46   : > { %1123 = vmatpush.bf16.msra.mxu0 %v3676_v56  ;;  %v4341_v14 = vld [vmem:[#allocation6 + $0x1b4] sm:$0xf]  ;;  %v3821_v15 = vld [vmem:[#allocation6 + $0x1c8] sm:$0xf0]  ;;  %s4286_s9 = sshll.u32 %s5095_s1, 4  ;;  %v3820_v19 = vor.u32 %v4344_v11, %v3819_v9  ;;  %v3632_v20 = vor.u32 %v4293_v12, %v3629_v13  ;;  %s4908_s19 = smov 32  }
  0x47   : > { %1136 = vmatpush.bf16.msra.mxu1 %v3868_v57  ;;  %v3603_v17 = vld [vmem:[#allocation6] sm:$0xf]  ;;  %v4290_v18 = vld [vmem:[#allocation6 + $0x14] sm:$0xf0]  ;;  %v4287_v23 = vld [vmem:[#allocation6 + $0x4] sm:$0xf]  ;;  %v3824_v24 = vor.u32 %v4341_v14, %v3821_v15  ;;  %s515_s14 = scalar_lea.vmem %s5635_s0, %s4286_s9 }
  0x48   : > { %1149 = vmatpush.bf16.msra.mxu2 %v3680_v58  ;;  %v3795_v21 = vld [vmem:[#allocation6 + $0x180] sm:$0xf]  ;;  %v4338_v22 = vld [vmem:[#allocation6 + $0x194] sm:$0xf0]  ;;  %v3605_v25 = vld [vmem:[#allocation6 + $0x18] sm:$0xf0]  ;;  %v3604_v31 = vor.u32 %v4290_v18, %v3603_v17 }
  0x49   : > { %1162 = vmatpush.bf16.msra.mxu3 %v3872_v62  ;;  %v3779_v26 = vld [vmem:[#allocation6 + $0x158] sm:$0xf]  ;;  %v4333_v27 = vld [vmem:[#allocation6 + $0x16c] sm:$0xf0]  ;;  %v4330_v30 = vld [vmem:[#allocation6 + $0x15c] sm:$0xf]  ;;  %v3796_v35 = vor.u32 %v4338_v22, %v3795_v21  ;;  %v3608_v36 = vor.u32 %v4287_v23, %v3605_v25 }
  0x4a   : > { %1124 = vmatpush.bf16.msra.mxu0 %v3652_v4  ;;  %v3971_v28 = vld [vmem:[#allocation6 + $0x2d8] sm:$0xf]  ;;  %v4381_v29 = vld [vmem:[#allocation6 + $0x2ec] sm:$0xf0]  ;;  %v3781_v32 = vld [vmem:[#allocation6 + $0x170] sm:$0xf0]  ;;  %v3780_v40 = vor.u32 %v4333_v27, %v3779_v26 }
  0x4b   : > { %1137 = vmatpush.bf16.msra.mxu1 %v3844_v5  ;;  %v4335_v33 = vld [vmem:[#allocation6 + $0x184] sm:$0xf]  ;;  %v3797_v34 = vld [vmem:[#allocation6 + $0x198] sm:$0xf0]  ;;  %v525_v37 = vld [vmem:[%s515_s14] sm:$0xff]  ;;  %v3972_v41 = vor.u32 %v4381_v29, %v3971_v28  ;;  %v3784_v44 = vor.u32 %v4330_v30, %v3781_v32  ;;  %s4909_s28 = smov 96  }
  0x4c   : > { %1150 = vmatpush.bf16.msra.mxu2 %v3656_v6  ;;  %v4378_v38 = vld [vmem:[#allocation6 + $0x2dc] sm:$0xf]  ;;  %v3973_v39 = vld [vmem:[#allocation6 + $0x2f0] sm:$0xf0]  ;;  %v3755_v43 = vld [vmem:[#allocation6 + $0x128] sm:$0xf]  ;;  %v3800_v45 = vor.u32 %v4335_v33, %v3797_v34  ;;  %v5101_v49 = vpack.c.bf16 %v525_v37, %v525_v37 }
  0x4d   : > { %1163 = vmatpush.bf16.msra.mxu3 %v3848_v10  ;;  %v526_v42 = vld [vmem:[%s515_s14 + $0x8] sm:$0xff]  ;;  %v4327_v46 = vld [vmem:[#allocation6 + $0x13c] sm:$0xf0]  ;;  %v3947_v47 = vld [vmem:[#allocation6 + $0x2a8] sm:$0xf]  ;;  %v3976_v50 = vor.u32 %v4378_v38, %v3973_v39  ;;  %vm1539_vm2 = vcmask 64512  }
  0x4e   : > { %1125 = vmatpush.bf16.msra.mxu0 %v3628_v16  ;;  %v4375_v48 = vld [vmem:[#allocation6 + $0x2bc] sm:$0xf0]  ;;  %v4324_v51 = vld [vmem:[#allocation6 + $0x12c] sm:$0xf]  ;;  %v3757_v52 = vld [vmem:[#allocation6 + $0x140] sm:$0xf0]  ;;  %v5103_v53 = vpack.c.bf16 %v526_v42, %v526_v42  ;;  %v3756_v56 = vor.u32 %v4327_v46, %v3755_v43 }
  0x4f   : > { %1138 = vmatpush.bf16.msra.mxu1 %v3820_v19  ;;  %v4372_v54 = vld [vmem:[#allocation6 + $0x2ac] sm:$0xf]  ;;  %v3949_v55 = vld [vmem:[#allocation6 + $0x2c0] sm:$0xf0]  ;;  %v3948_v57 = vor.u32 %v4375_v48, %v3947_v47  ;;  %v3731_v58 = vld [vmem:[#allocation6 + $0xf8] sm:$0xf]  ;;  %v3760_v59 = vor.u32 %v4324_v51, %v3757_v52 }
  0x50   : > { %1151 = vmatpush.bf16.msra.mxu2 %v3632_v20  ;;  %v4321_v60 = vld [vmem:[#allocation6 + $0x10c] sm:$0xf0]  ;;  %v3923_v61 = vld [vmem:[#allocation6 + $0x278] sm:$0xf]  ;;  %v3952_v63 = vor.u32 %v4372_v54, %v3949_v55  ;;  %v4318_v0 = vld [vmem:[#allocation6 + $0xfc] sm:$0xf] }
  0x51   : > { %1164 = vmatpush.bf16.msra.mxu3 %v3824_v24  ;;  %v4369_v62 = vld [vmem:[#allocation6 + $0x28c] sm:$0xf0]  ;;  %v3733_v1 = vld [vmem:[#allocation6 + $0x110] sm:$0xf0]  ;;  %v4366_v2 = vld [vmem:[#allocation6 + $0x27c] sm:$0xf]  ;;  %v3732_v4 = vor.u32 %v4321_v60, %v3731_v58 }
  0x52   : > { %1126 = vmatpush.bf16.msra.mxu0 %v3604_v31  ;;  %v3925_v3 = vld [vmem:[#allocation6 + $0x290] sm:$0xf0]  ;;  %v3924_v5 = vor.u32 %v4369_v62, %v3923_v61  ;;  %v3707_v6 = vld [vmem:[#allocation6 + $0xc8] sm:$0xf]  ;;  %v3736_v7 = vor.u32 %v4318_v0, %v3733_v1  ;;  %v4315_v8 = vld [vmem:[#allocation6 + $0xdc] sm:$0xf0] }
  0x53   : > { %1139 = vmatpush.bf16.msra.mxu1 %v3796_v35  ;;  %v3899_v9 = vld [vmem:[#allocation6 + $0x248] sm:$0xf]  ;;  %v4363_v10 = vld [vmem:[#allocation6 + $0x25c] sm:$0xf0]  ;;  %v3928_v11 = vor.u32 %v4366_v2, %v3925_v3  ;;  %v4312_v12 = vld [vmem:[#allocation6 + $0xcc] sm:$0xf]  ;;  %v3708_v16 = vor.u32 %v4315_v8, %v3707_v6 }
  0x54   : > { %1152 = vmatpush.bf16.msra.mxu2 %v3608_v36  ;;  %v3709_v13 = vld [vmem:[#allocation6 + $0xe0] sm:$0xf0]  ;;  %v4360_v14 = vld [vmem:[#allocation6 + $0x24c] sm:$0xf]  ;;  %v3900_v17 = vor.u32 %v4363_v10, %v3899_v9  ;;  %v3683_v18 = vld [vmem:[#allocation6 + $0x98] sm:$0xf] }
  0x55   : > { %1165 = vmatpush.bf16.msra.mxu3 %v3800_v45  ;;  %1127 = vmatmul.bf16.vlgmr.msra.gmra.mxu0 %v5101_v49  ;;  %v3901_v15 = vld [vmem:[#allocation6 + $0x260] sm:$0xf0]  ;;  %v3712_v19 = vor.u32 %v4312_v12, %v3709_v13  ;;  %v4309_v20 = vld [vmem:[#allocation6 + $0xac] sm:$0xf0]  ;;  %v3875_v21 = vld [vmem:[#allocation6 + $0x218] sm:$0xf] }
  0x56   : > { %1171 = vmatpush.bf16.msrb.mxu0 %v3780_v40  ;;  %1140 = vmatmul.bf16.vlgmr.msra.gmra.mxu1 %v5103_v53  ;;  %v4357_v22 = vld [vmem:[#allocation6 + $0x22c] sm:$0xf0]  ;;  %v3904_v23 = vor.u32 %v4360_v14, %v3901_v15  ;;  %v4306_v24 = vld [vmem:[#allocation6 + $0x9c] sm:$0xf]  ;;  %v3685_v25 = vld [vmem:[#allocation6 + $0xb0] sm:$0xf0]  ;;  %v3684_v28 = vor.u32 %v4309_v20, %v3683_v18 }
  0x57   : > { %1184 = vmatpush.bf16.msrb.mxu1 %v3972_v41  ;;  %1153 = vmatmul.bf16.vlgmr.msra.gmra.mxu2 %v5101_v49  ;;  %v4354_v26 = vld [vmem:[#allocation6 + $0x21c] sm:$0xf]  ;;  %v3877_v27 = vld [vmem:[#allocation6 + $0x230] sm:$0xf0]  ;;  %v3876_v29 = vor.u32 %v4357_v22, %v3875_v21  ;;  %v3659_v30 = vld [vmem:[#allocation6 + $0x68] sm:$0xf]  ;;  %v3688_v31 = vor.u32 %v4306_v24, %v3685_v25 }
  0x58   : > { %1197 = vmatpush.bf16.msrb.mxu2 %v3784_v44  ;;  %1166 = vmatmul.bf16.vlgmr.msra.gmra.mxu3 %v5103_v53  ;;  %v4303_v32 = vld [vmem:[#allocation6 + $0x7c] sm:$0xf0]  ;;  %v3851_v33 = vld [vmem:[#allocation6 + $0x1e8] sm:$0xf]  ;;  %v3880_v35 = vor.u32 %v4354_v26, %v3877_v27  ;;  %v4300_v36 = vld [vmem:[#allocation6 + $0x6c] sm:$0xf] }
  0x59   : > { %1210 = vmatpush.bf16.msrb.mxu3 %v3976_v50  ;;  %v4351_v34 = vld [vmem:[#allocation6 + $0x1fc] sm:$0xf0]  ;;  %v3661_v37 = vld [vmem:[#allocation6 + $0x80] sm:$0xf0]  ;;  %v4348_v38 = vld [vmem:[#allocation6 + $0x1ec] sm:$0xf]  ;;  %v3660_v40 = vor.u32 %v4303_v32, %v3659_v30 }
  0x5a   : > { %1172 = vmatpush.bf16.msrb.mxu0 %v3756_v56  ;;  %v3853_v39 = vld [vmem:[#allocation6 + $0x200] sm:$0xf0]  ;;  %v3852_v41 = vor.u32 %v4351_v34, %v3851_v33  ;;  %v3635_v42 = vld [vmem:[#allocation6 + $0x38] sm:$0xf]  ;;  %v3664_v43 = vor.u32 %v4300_v36, %v3661_v37  ;;  %v4297_v44 = vld [vmem:[#allocation6 + $0x4c] sm:$0xf0] }
  0x5b   : > { %1185 = vmatpush.bf16.msrb.mxu1 %v3948_v57  ;;  %v3827_v45 = vld [vmem:[#allocation6 + $0x1b8] sm:$0xf]  ;;  %v4345_v46 = vld [vmem:[#allocation6 + $0x1cc] sm:$0xf0]  ;;  %v3856_v47 = vor.u32 %v4348_v38, %v3853_v39  ;;  %v4294_v48 = vld [vmem:[#allocation6 + $0x3c] sm:$0xf]  ;;  %v3636_v54 = vor.u32 %v4297_v44, %v3635_v42 }
  0x5c   : > { %1198 = vmatpush.bf16.msrb.mxu2 %v3760_v59  ;;  %v3637_v50 = vld [vmem:[#allocation6 + $0x50] sm:$0xf0]  ;;  %v4342_v51 = vld [vmem:[#allocation6 + $0x1bc] sm:$0xf]  ;;  %v3828_v55 = vor.u32 %v4345_v46, %v3827_v45  ;;  %v3611_v56 = vld [vmem:[#allocation6 + $0x8] sm:$0xf] }
  0x5d   : > { %1211 = vmatpush.bf16.msrb.mxu3 %v3952_v63  ;;  %v3829_v52 = vld [vmem:[#allocation6 + $0x1d0] sm:$0xf0]  ;;  %v4291_v57 = vld [vmem:[#allocation6 + $0x1c] sm:$0xf0]  ;;  %v3640_v58 = vor.u32 %v4294_v48, %v3637_v50  ;;  %v3803_v59 = vld [vmem:[#allocation6 + $0x188] sm:$0xf] }
  0x5e   : > { %1173 = vmatpush.bf16.msrb.mxu0 %v3732_v4  ;;  %v4339_v60 = vld [vmem:[#allocation6 + $0x19c] sm:$0xf0]  ;;  %v4288_v61 = vld [vmem:[#allocation6 + $0xc] sm:$0xf]  ;;  %v3832_v62 = vor.u32 %v4342_v51, %v3829_v52  ;;  %v3613_v63 = vld [vmem:[#allocation6 + $0x20] sm:$0xf0]  ;;  %v3612_v4 = vor.u32 %v4291_v57, %v3611_v56 }
  0x5f   : > { %1186 = vmatpush.bf16.msrb.mxu1 %v3924_v5  ;;  %v3979_v0 = vld [vmem:[#allocation6 + $0x2e0] sm:$0xf]  ;;  %v4382_v1 = vld [vmem:[#allocation6 + $0x2f4] sm:$0xf0]  ;;  %v4336_v2 = vld [vmem:[#allocation6 + $0x18c] sm:$0xf]  ;;  %v3804_v5 = vor.u32 %v4339_v60, %v3803_v59  ;;  %v3616_v6 = vor.u32 %v4288_v61, %v3613_v63 }
  0x60   : > { %1199 = vmatpush.bf16.msrb.mxu2 %v3736_v7  ;;  %v3805_v3 = vld [vmem:[#allocation6 + $0x1a0] sm:$0xf0]  ;;  %v3980_v7 = vor.u32 %v4382_v1, %v3979_v0  ;;  %v3955_v9 = vld [vmem:[#allocation6 + $0x2b0] sm:$0xf]  ;;  %v4376_v10 = vld [vmem:[#allocation6 + $0x2c4] sm:$0xf0] }
  0x61   : > { %1212 = vmatpush.bf16.msrb.mxu3 %v3928_v11  ;;  %v3808_v8 = vor.u32 %v4336_v2, %v3805_v3  ;;  %v3956_v11 = vor.u32 %v4376_v10, %v3955_v9  ;;  %v3931_v12 = vld [vmem:[#allocation6 + $0x280] sm:$0xf]  ;;  %v4370_v13 = vld [vmem:[#allocation6 + $0x294] sm:$0xf0]  ;;  %v3907_v15 = vld [vmem:[#allocation6 + $0x250] sm:$0xf] }
  0x62   : > { %1174 = vmatpush.bf16.msrb.mxu0 %v3708_v16  ;;  %v3932_v14 = vor.u32 %v4370_v13, %v3931_v12  ;;  %v4364_v16 = vld [vmem:[#allocation6 + $0x264] sm:$0xf0]  ;;  %v3883_v18 = vld [vmem:[#allocation6 + $0x220] sm:$0xf]  ;;  %v3859_v21 = vld [vmem:[#allocation6 + $0x1f0] sm:$0xf] }
  0x63   : > { %1187 = vmatpush.bf16.msrb.mxu1 %v3900_v17  ;;  %v3908_v17 = vor.u32 %v4364_v16, %v3907_v15  ;;  %v4352_v22 = vld [vmem:[#allocation6 + $0x204] sm:$0xf0]  ;;  %v3835_v24 = vld [vmem:[#allocation6 + $0x1c0] sm:$0xf]  ;;  %v4346_v25 = vld [vmem:[#allocation6 + $0x1d4] sm:$0xf0] }
  0x64   : > { %1200 = vmatpush.bf16.msrb.mxu2 %v3712_v19  ;;  %v4358_v19 = vld [vmem:[#allocation6 + $0x234] sm:$0xf0]  ;;  %v3836_v26 = vor.u32 %v4346_v25, %v3835_v24  ;;  %v3811_v27 = vld [vmem:[#allocation6 + $0x190] sm:$0xf]  ;;  %v5116_v33 = vld [vmem:[%s5637_s2] sm:$0x3f] }
  0x65   : > { %1213 = vmatpush.bf16.msrb.mxu3 %v3904_v23  ;;  %v3884_v20 = vor.u32 %v4358_v19, %v3883_v18  ;;  %v3860_v23 = vor.u32 %v4352_v22, %v3859_v21  ;;  %v627_v34 = vperm.slane %v5116_v33, 0  ;;  %v3763_v36 = vld [vmem:[#allocation6 + $0x130] sm:$0xf]  ;;  %v4328_v37 = vld [vmem:[#allocation6 + $0x144] sm:$0xf0]  ;;  %v630_v21 = vperm.slane %v5116_v33, 3 }
  0x66   : > { %1175 = vmatpush.bf16.msrb.mxu0 %v3684_v28  ;;  %v4340_v28 = vld [vmem:[#allocation6 + $0x1a4] sm:$0xf0]  ;;  %v3739_v42 = vld [vmem:[#allocation6 + $0x100] sm:$0xf]  ;;  %v3715_v46 = vld [vmem:[#allocation6 + $0xd0] sm:$0xf] }
  0x67   : > { %1188 = vmatpush.bf16.msrb.mxu1 %v3876_v29  ;;  %v3787_v29 = vld [vmem:[#allocation6 + $0x160] sm:$0xf]  ;;  %v3812_v30 = vor.u32 %v4340_v28, %v3811_v27  ;;  %v3667_v57 = vld [vmem:[#allocation6 + $0x70] sm:$0xf]  ;;  %v4292_v2 = vld [vmem:[#allocation6 + $0x24] sm:$0xf0] }
  0x68   : > { %1201 = vmatpush.bf16.msrb.mxu2 %v3688_v31  ;;  %v4334_v31 = vld [vmem:[#allocation6 + $0x174] sm:$0xf0]  ;;  %v3643_v61 = vld [vmem:[#allocation6 + $0x40] sm:$0xf]  ;;  %v3619_v1 = vld [vmem:[#allocation6 + $0x10] sm:$0xf] }
  0x69   : > { %1214 = vmatpush.bf16.msrb.mxu3 %v3880_v35  ;;  %v3788_v32 = vor.u32 %v4334_v31, %v3787_v29  ;;  %v3620_v3 = vor.u32 %v4292_v2, %v3619_v1  ;;  %v3981_v9 = vld [vmem:[#allocation6 + $0x2f8] sm:$0xf0]  ;;  %v4325_v10 = vld [vmem:[#allocation6 + $0x134] sm:$0xf]  ;;  %v628_v25 = vperm.slane %v5116_v33, 1  ;;  %vm1743_vm3 = vcmask 1043456  }
  0x6a   : > { %1176 = vmatpush.bf16.msrb.mxu0 %v3660_v40  ;;  %v3764_v40 = vor.u32 %v4328_v37, %v3763_v36  ;;  %v4373_v13 = vld [vmem:[#allocation6 + $0x2b4] sm:$0xf]  ;;  %v4295_v2 = vld [vmem:[#allocation6 + $0x44] sm:$0xf]  ;;  %s3599_s29 = sshll.u32 %s5095_s1, 3  ;;  %s5323_s27 = sand.u32 1, %s4885_s22  }
  0x6b   : > { %1189 = vmatpush.bf16.msrb.mxu1 %v3852_v41  ;;  %s519_s3 = scalar_lea.vmem %s5640_s5, %s3599_s29  ;;  %s3595_s21 = sshll.u32 %s5323_s27, 4 }
  0x6c   : > { %1202 = vmatpush.bf16.msrb.mxu2 %v3664_v43  ;;  %v4322_v43 = vld [vmem:[#allocation6 + $0x114] sm:$0xf0]  ;;  %s5331_s30 = scalar_lea.vmem [#allocation14], %s3595_s21  ;;  %s4911_s14 = smov 98  }
  0x6d   : > { %1215 = vmatpush.bf16.msrb.mxu3 %v3856_v47  ;;  %v3740_v44 = vor.u32 %v4322_v43, %v3739_v42  ;;  %v4316_v47 = vld [vmem:[#allocation6 + $0xe4] sm:$0xf0]  ;;  %v4367_v42 = vld [vmem:[#allocation6 + $0x284] sm:$0xf]  ;;  %s4912_s15 = smov 116   ;;  %s4913_s26 = smov 122  }
  0x6e   : > { %1177 = vmatpush.bf16.msrb.mxu0 %v3636_v54  ;;  %v3716_v50 = vor.u32 %v4316_v47, %v3715_v46  ;;  %v3691_v54 = vld [vmem:[#allocation6 + $0xa0] sm:$0xf]  ;;  %v4313_v46 = vld [vmem:[#allocation6 + $0xd4] sm:$0xf]  ;;  %v3717_v47 = vld [vmem:[#allocation6 + $0xe8] sm:$0xf0]  ;;  %s523_s9 = scalar_lea.vmem %s5645_s10, %s3599_s29 }
  0x6f   : > { %1190 = vmatpush.bf16.msrb.mxu1 %v3828_v55  ;;  %v4310_v55 = vld [vmem:[#allocation6 + $0xb4] sm:$0xf0]  ;;  %s4917_s18 = smov 80   ;;  %s4918_s20 = smov 74  }
  0x70   : > { %1203 = vmatpush.bf16.msrb.mxu2 %v3640_v58  ;;  %v3692_v56 = vor.u32 %v4310_v55, %v3691_v54  ;;  %v4304_v58 = vld [vmem:[#allocation6 + $0x84] sm:$0xf0]  ;;  %v4307_v54 = vld [vmem:[#allocation6 + $0xa4] sm:$0xf]  ;;  %v3693_v55 = vld [vmem:[#allocation6 + $0xb8] sm:$0xf0] }
  0x71   : > { %1216 = vmatpush.bf16.msrb.mxu3 %v3832_v62  ;;  %v3668_v60 = vor.u32 %v4304_v58, %v3667_v57  ;;  %v4298_v62 = vld [vmem:[#allocation6 + $0x54] sm:$0xf0]  ;;  %v3696_v57 = vor.u32 %v4307_v54, %v3693_v55  ;;  %v3885_v58 = vld [vmem:[#allocation6 + $0x238] sm:$0xf0]  ;;  %s4920_s16 = smov 68   ;;  %s4921_s1 = smov 12  }
  0x72   : > { %1178 = vmatpush.bf16.msrb.mxu0 %v3612_v4  ;;  %v3644_v0 = vor.u32 %v4298_v62, %v3643_v61  ;;  %v629_v4 = vperm.slane %v5116_v33, 2  ;;  %v3669_v61 = vld [vmem:[#allocation6 + $0x88] sm:$0xf0]  ;;  %v4349_v62 = vld [vmem:[#allocation6 + $0x1f4] sm:$0xf]  ;;  %s4922_s29 = smov 18  }
  0x73   : > { %1191 = vmatpush.bf16.msrb.mxu1 %v3804_v5  ;;  %v4331_v5 = vld [vmem:[#allocation6 + $0x164] sm:$0xf]  ;;  %s4923_s24 = smov 36   ;;  %s3409_s21 = sshll.u32 %s5331_s30, 4  ;;  %s3410_s21 = int_to_ptr.vmem [resolvable:$true] %s3409_s21 }
  0x74   : > { %1204 = vmatpush.bf16.msrb.mxu2 %v3616_v6  ;;  %v3789_v6 = vld [vmem:[#allocation6 + $0x178] sm:$0xf0] }
  0x75   : > { %1217 = vmatpush.bf16.msrb.mxu3 %v3808_v8  ;;  %1179 = vmatmul.bf16.vlgmr.msrb.gmra.mxu0 %v5101_v49  ;;  %v3792_v8 = vor.u32 %v4331_v5, %v3789_v6  ;;  %v3837_v6 = vld [vmem:[#allocation6 + $0x1d8] sm:$0xf0] }
  0x76   : > { %1192 = vmatmul.bf16.vlgmr.msrb.gmra.mxu1 %v5103_v53  ;;  %1223 = vmatpush.bf16.msra.mxu0 %v3788_v32 }
  0x77   : > { %1236 = vmatpush.bf16.msra.mxu1 %v3980_v7  ;;  %1205 = vmatmul.bf16.vlgmr.msrb.gmra.mxu2 %v5101_v49  ;;  %v4379_v7 = vld [vmem:[#allocation6 + $0x2e4] sm:$0xf] }
  0x78   : > { %1218 = vmatmul.bf16.vlgmr.msrb.gmra.mxu3 %v5103_v53  ;;  %v3984_v12 = vor.u32 %v4379_v7, %v3981_v9  ;;  %1249 = vmatpush.bf16.msra.mxu2 %v3792_v8  ;;  %v4289_v8 = vld [vmem:[#allocation6 + $0x14] sm:$0xf]  ;;  %v3621_v9 = vld [vmem:[#allocation6 + $0x28] sm:$0xf0] }
  0x7a   : > { %1224 = vmatpush.bf16.msra.mxu0 %v3764_v40  ;;  %1262 = vmatpush.bf16.msra.mxu3 %v3984_v12  ;;  %v4319_v40 = vld [vmem:[#allocation6 + $0x104] sm:$0xf]  ;;  %v3813_v12 = vld [vmem:[#allocation6 + $0x1a8] sm:$0xf0] }
  0x7b   : > { %1237 = vmatpush.bf16.msra.mxu1 %v3956_v11  ;;  %v3765_v11 = vld [vmem:[#allocation6 + $0x148] sm:$0xf0] }
  0x7e   : > { %1225 = vmatpush.bf16.msra.mxu0 %v3740_v44  ;;  %v3933_v44 = vld [vmem:[#allocation6 + $0x298] sm:$0xf0] }
  0x7f   : > { %1238 = vmatpush.bf16.msra.mxu1 %v3932_v14  ;;  %v3957_v14 = vld [vmem:[#allocation6 + $0x2c8] sm:$0xf0] }
  0x80   : > { %v3960_v19 = vor.u32 %v4373_v13, %v3957_v14 }
  0x82   : > { %1226 = vmatpush.bf16.msra.mxu0 %v3716_v50  ;;  %1263 = vmatpush.bf16.msra.mxu3 %v3960_v19  ;;  %v3720_v50 = vor.u32 %v4313_v46, %v3717_v47 }
  0x83   : > { %1239 = vmatpush.bf16.msra.mxu1 %v3908_v17  ;;  %v3768_v17 = vor.u32 %v4325_v10, %v3765_v11  ;;  %v4337_v10 = vld [vmem:[#allocation6 + $0x194] sm:$0xf]  ;;  %v3624_v11 = vor.u32 %v4289_v8, %v3621_v9 }
  0x84   : > { %v3816_v13 = vor.u32 %v4337_v10, %v3813_v12 }
  0x85   : > { %1250 = vmatpush.bf16.msra.mxu2 %v3768_v17 }
  0x86   : > { %1227 = vmatpush.bf16.msra.mxu0 %v3692_v56  ;;  %v4355_v56 = vld [vmem:[#allocation6 + $0x224] sm:$0xf] }
  0x87   : > { %1240 = vmatpush.bf16.msra.mxu1 %v3884_v20 }
  0x8a   : > { %1228 = vmatpush.bf16.msra.mxu0 %v3668_v60  ;;  %v4301_v60 = vld [vmem:[#allocation6 + $0x74] sm:$0xf] }
  0x8b   : > { %1241 = vmatpush.bf16.msra.mxu1 %v3860_v23 }
  0x8e   : > { %1229 = vmatpush.bf16.msra.mxu0 %v3644_v0  ;;  %v3861_v0 = vld [vmem:[#allocation6 + $0x208] sm:$0xf0] }
  0x8f   : > { %1242 = vmatpush.bf16.msra.mxu1 %v3836_v26  ;;  %v3864_v1 = vor.u32 %v4349_v62, %v3861_v0 }
  0x92   : > { %1230 = vmatpush.bf16.msra.mxu0 %v3620_v3  ;;  %v3645_v3 = vld [vmem:[#allocation6 + $0x58] sm:$0xf0] }
  0x93   : > { %1243 = vmatpush.bf16.msra.mxu1 %v3812_v30  ;;  %v3648_v5 = vor.u32 %v4295_v2, %v3645_v3 }
  0x95   : > { %1231 = vmatmul.bf16.vlgmr.msra.gmra.mxu0 %v5101_v49 }
  0x96   : > { %1244 = vmatmul.bf16.vlgmr.msra.gmra.mxu1 %v5103_v53 }
  0xd2   : > { %v1128_v35 = vpop.f32.mrf.mxu0 }
  0xd3   : > { %v1129_v38 = vadd.f32 %v1128_v35, %v627_v34  ;;  %v1141_v39 = vpop.f32.mrf.mxu1 }
  0xd5   : > { %v5120_v41 = vadd.f32 %v1141_v39, %v1129_v38 }
  0xd7   : > { %1291 = vrot.lane.b32.xlu1 %v5120_v41, %s4907_s17  ;;  %v1307_v34 = vpack.c.bf16 %v5120_v41, %v5120_v41 }
  0xda   : > { %v5124_v45 = vpop.f32.mrf.mxu2  ;;  %v1130_v48 = vpop.f32.mrf.mxu0 }
  0xdb   : > { %v1143_v51 = vpop.f32.mrf.mxu1  ;;  %v5126_v52 = vpop.f32.mrf.mxu3  ;;  %v1155_v31 = vadd.f32 %v5124_v45, %v628_v25  ;;  %v3936_v45 = vor.u32 %v4367_v42, %v3933_v44  ;;  %v4361_v48 = vld [vmem:[#allocation6 + $0x254] sm:$0xf] }
  0xdc   : > { %v3909_v51 = vld [vmem:[#allocation6 + $0x268] sm:$0xf0] }
  0xdd   : > { %v1168_v37 = vadd.f32 %v5126_v52, %v1155_v31  ;;  %1264 = vmatpush.bf16.msra.mxu3 %v3936_v45  ;;  %v3912_v52 = vor.u32 %v4361_v48, %v3909_v51 }
  0xdf   : > { %1294 = vrot.lane.b32.xlu1 %v5120_v41, %s4908_s19  ;;  %v1311_v39 = vpack.c.bf16 %v1168_v37, %v1168_v37 }
  0xe1   : > { %1265 = vmatpush.bf16.msra.mxu3 %v3912_v52 }
  0xe2   : > { %v1156_v59 = vpop.f32.mrf.mxu2 }
  0xe3   : > { %v1169_v63 = vpop.f32.mrf.mxu3  ;;  %v3888_v59 = vor.u32 %v4355_v56, %v3885_v58 }
  0xe4   : > { %v3672_v63 = vor.u32 %v4301_v60, %v3669_v61 }
  0xe5   : > { %1266 = vmatpush.bf16.msra.mxu3 %v3888_v59 }
  0xe7   : > { %1288 = vrot.lane.b32.xlu1 %v5120_v41, %s4909_s28  ;;  %v3741_v41 = vld [vmem:[#allocation6 + $0x118] sm:$0xf0] }
  0xe8   : > { %v3744_v43 = vor.u32 %v4319_v40, %v3741_v41  ;;  %v1524_v41 = vlaneseq }
  0xe9   : > { %1267 = vmatpush.bf16.msra.mxu3 %v3864_v1 }
  0xea   : > { %1251 = vmatpush.bf16.msra.mxu2 %v3744_v43  ;;  %v1525_v43 = vshrl.u32 %v1524_v41, 7  ;;  %v1527_v44 = vand.u32 127, %v1524_v41 }
  0xec   : > { %vm5167_vm1 = vcmp.le.s32.totalorder %v1527_v44, %v1525_v43 }
  0xee   : > { %1252 = vmatpush.bf16.msra.mxu2 %v3720_v50 }
  0xf2   : > { %v1180_v15 = vpop.f32.mrf.mxu0  ;;  %1253 = vmatpush.bf16.msra.mxu2 %v3696_v57 }
  0xf3   : > { %v1193_v16 = vpop.f32.mrf.mxu1  ;;  %v1181_v18 = vadd.f32 %v1180_v15, %v629_v4  ;;  %v4343_v4 = vld [vmem:[#allocation6 + $0x1c4] sm:$0xf] }
  0xf4   : > { %v3840_v7 = vor.u32 %v4343_v4, %v3837_v6 }
  0xf5   : > { %v1194_v20 = vadd.f32 %v1193_v16, %v1181_v18 }
  0xf6   : > { %1254 = vmatpush.bf16.msra.mxu2 %v3672_v63  ;;  %1268 = vmatpush.bf16.msra.mxu3 %v3840_v7  ;;  %v632_v63 = vperm.slane %v5116_v33, 5 }
  0xf7   : > { %1316 = vrot.lane.b32.xlu2 %v1194_v20, %s4909_s28  ;;  %1319 = vrot.lane.b32.xlu0 %v1194_v20, %s4907_s17  ;;  %v1335_v22 = vpack.c.bf16 %v1194_v20, %v1194_v20 }
  0xf9   : > { %v1376_v24 = vsel %vm1371_vm0, %v1335_v22, 0 }
  0xfa   : > { %v1206_v23 = vpop.f32.mrf.mxu2  ;;  %v1182_v27 = vpop.f32.mrf.mxu0  ;;  %1385 = vmatpush.bf16.xpose.msrb.mxu1 %v1376_v24  ;;  %1255 = vmatpush.bf16.msra.mxu2 %v3648_v5 }
  0xfb   : > { %v1207_v26 = vadd.f32 %v1206_v23, %v630_v21  ;;  %v1195_v28 = vpop.f32.mrf.mxu1  ;;  %v1219_v29 = vpop.f32.mrf.mxu3  ;;  %1269 = vmatpush.bf16.msra.mxu3 %v3816_v13 }
  0xfc   : > { %v631_v28 = vperm.slane %v5116_v33, 4 }
  0xfd   : > { %v1220_v30 = vadd.f32 %v1219_v29, %v1207_v26 }
  0xfe   : > { %1256 = vmatpush.bf16.msra.mxu2 %v3624_v11  ;;  %1270 = vmatmul.bf16.vlgmr.msra.gmra.mxu3 %v5103_v53 }
  0xff   : > { %1326 = vrot.lane.b32.xlu1 %v1220_v30, %s4909_s28  ;;  %v1339_v32 = vpack.c.bf16 %v1220_v30, %v1220_v30  ;;  %1322 = vrot.lane.b32.xlu0 %v1194_v20, %s4908_s19 }
 0x100   : > { %1329 = vrot.lane.b32.xlu2 %v1220_v30, %s4907_s17 }
 0x101   : > { %v1452_v35 = vsel %vm1371_vm0, %v1339_v32, 0  ;;  %3985 = vmatmul.msk.bf16.vlgmr.msrb.gmra.mxu1 %vm1371_vm0, %v1307_v34  ;;  %1257 = vmatmul.bf16.vlgmr.msra.gmra.mxu2 %v5101_v49 }
 0x102   : > { %1461 = vmatpush.bf16.xpose.msrb.mxu0 %v1452_v35  ;;  %v1208_v36 = vpop.f32.mrf.mxu2 }
 0x103   : > { %v1221_v38 = vpop.f32.mrf.mxu3 }
 0x107   : > { %1332 = vrot.lane.b32.xlu0 %v1220_v30, %s4908_s19 }
 0x108   : > { %1301 = vrot.lane.b32.xlu2 %v1168_v37, %s4907_s17 }
 0x109   : > { %3989 = vmatmul.msk.bf16.vlgmr.msrb.gmra.mxu0 %vm1371_vm0, %v1311_v39 }
 0x10f   : > { %1304 = vrot.lane.b32.xlu0 %v1168_v37, %s4908_s19 }
 0x110   : > { %1298 = vrot.lane.b32.xlu2 %v1168_v37, %s4909_s28 }
 0x112   : > { %v1232_v30 = vpop.f32.mrf.mxu0 }
 0x113   : > { %v1245_v15 = vpop.f32.mrf.mxu1  ;;  %v1233_v34 = vadd.f32 %v1232_v30, %v631_v28 }
 0x115   : > { %v5161_v38 = vadd.f32 %v1245_v15, %v1233_v34 }
 0x117   : > { %v1363_v62 = vpack.c.bf16 %v5161_v38, %v5161_v38 }
 0x119   : > { %v1745_v0 = vsel %vm1743_vm3, %v1363_v62, 0 }
 0x11a   : > { %v1234_v45 = vpop.f32.mrf.mxu0  ;;  %1754 = vmatpush.bf16.msra.mxu0 %v1745_v0 }
 0x11b   : > { %v1247_v20 = vpop.f32.mrf.mxu1 }
 0x149   : > { %v1292_v14 = vpop.permute.xlu1 %1291 }
 0x14a   : > { %v1309_v35 = vpack.c.bf16 %v1292_v14, %v1292_v14 }
 0x151   : > { %v1317_v16 = vpop.permute.xlu2 %1316  ;;  %v1295_v19 = vpop.permute.xlu1 %1294 }
 0x152   : > { %v1336_v17 = vpack.c.bf16 %v1317_v16, %v1317_v16  ;;  %v1310_v47 = vpack.c.bf16 %v1295_v19, %v1295_v19 }
 0x154   : > { %v1395_v18 = vsel %vm1371_vm0, %v1336_v17, 0 }
 0x155   : > { %1404 = vmatpush.bf16.xpose.msra.mxu1 %v1395_v18 }
 0x159   : > { %v1289_v21 = vpop.permute.xlu1 %1288 }
 0x15a   : > { %v1308_v22 = vpack.c.bf16 %v1289_v21, %v1289_v21  ;;  %v1330_v23 = vpop.permute.xlu2 %1329 }
 0x15b   : > { %v1341_v24 = vpack.c.bf16 %v1330_v23, %v1330_v23 }
 0x15c   : > { %3986 = vmatmul.msk.bf16.vlgmr.msra.gmra.mxu1 %vm1371_vm0, %v1308_v22 }
 0x15d   : > { %v1490_v53 = vsel %vm1371_vm0, %v1341_v24, 0 }
 0x162   : > { %v1302_v49 = vpop.permute.xlu2 %1301 }
 0x163   : > { %v1313_v55 = vpack.c.bf16 %v1302_v49, %v1302_v49 }
 0x169   : > { %v1320_v25 = vpop.permute.xlu0 %1319 }
 0x16a   : > { %v1337_v26 = vpack.c.bf16 %v1320_v25, %v1320_v25  ;;  %v1299_v40 = vpop.permute.xlu2 %1298 }
 0x16b   : > { %v1312_v42 = vpack.c.bf16 %v1299_v40, %v1299_v40 }
 0x16c   : > { %v1414_v27 = vsel %vm1371_vm0, %v1337_v26, 0 }
 0x16d   : > { %1423 = vmatpush.bf16.xpose.msrb.mxu2 %v1414_v27 }
 0x171   : > { %v1327_v29 = vpop.permute.xlu1 %1326  ;;  %v1323_v32 = vpop.permute.xlu0 %1322 }
 0x172   : > { %v1340_v31 = vpack.c.bf16 %v1327_v29, %v1327_v29  ;;  %v1338_v36 = vpack.c.bf16 %v1323_v32, %v1323_v32 }
 0x174   : > { %v1471_v37 = vsel %vm1371_vm0, %v1340_v31, 0  ;;  %v1433_v39 = vsel %vm1371_vm0, %v1338_v36, 0  ;;  %3987 = vmatmul.msk.bf16.vlgmr.msrb.gmra.mxu2 %vm1371_vm0, %v1309_v35 }
 0x175   : > { %1499 = vmatpush.bf16.xpose.msra.mxu2 %v1490_v53  ;;  %1480 = vmatpush.bf16.xpose.msrb.mxu1 %v1471_v37 }
 0x176   : > { %1442 = vmatpush.bf16.xpose.msrb.mxu3 %v1433_v39 }
 0x179   : > { %v1333_v46 = vpop.permute.xlu0 %1332 }
 0x17a   : > { %v1342_v48 = vpack.c.bf16 %v1333_v46, %v1333_v46 }
 0x17c   : > { %3990 = vmatmul.msk.bf16.vlgmr.msrb.gmra.mxu1 %vm1371_vm0, %v1312_v42  ;;  %v1509_v51 = vsel %vm1371_vm0, %v1342_v48, 0 }
 0x17d   : > { %3988 = vmatmul.msk.bf16.vlgmr.msrb.gmra.mxu3 %vm1371_vm0, %v1310_v47 }
 0x17e   : > { %1518 = vmatpush.bf16.xpose.msra.mxu3 %v1509_v51  ;;  %v1387_v52 = vpop.f32.mrf.mxu1 }
 0x17f   : > { %v5174_v54 = vsel %vm5167_vm1, %v1387_v52, -10000.0 }
 0x180   : > { %v1540_v56 = vsel %vm1539_vm2, %v5174_v54, -inf }
 0x181   : > { %1541 = vmax.xlane.f32.xlu2 %v1540_v56  ;;  %v1305_v57 = vpop.permute.xlu0 %1304  ;;  %v1271_v2 = vpop.f32.mrf.mxu3 }
 0x182   : > { %v1314_v60 = vpack.c.bf16 %v1305_v57, %v1305_v57 }
 0x184   : > { %3991 = vmatmul.msk.bf16.vlgmr.msra.gmra.mxu2 %vm1371_vm0, %v1313_v55  ;;  %v1258_v1 = vpop.f32.mrf.mxu2 }
 0x185   : > { %v1259_v3 = vadd.f32 %v1258_v1, %v632_v63 }
 0x186   : > { %v1463_v58 = vpop.f32.mrf.mxu0  ;;  %v1389_v59 = vpop.f32.mrf.mxu1 }
 0x187   : > { %v5184_v4 = vadd.f32 %v1271_v2, %v1259_v3  ;;  %v5197_v16 = vsel %vm5167_vm1, %v1463_v58, -10000.0 }
 0x188   : > { %v1552_v21 = vsel %vm1539_vm2, %v5197_v16, -inf }
 0x189   : > { %v1273_v6 = vpop.f32.mrf.mxu3  ;;  %v1367_v7 = vpack.c.bf16 %v5184_v4, %v5184_v4 }
 0x18b   : > { %v1821_v8 = vsel %vm1743_vm3, %v1367_v7, 0 }
 0x18c   : > { %v1260_v5 = vpop.f32.mrf.mxu2  ;;  %1830 = vmatpush.bf16.msrb.mxu0 %v1821_v8 }
 0x18d   : > { %3992 = vmatmul.msk.bf16.vlgmr.msra.gmra.mxu3 %vm1371_vm0, %v1314_v60 }
 0x18e   : > { %v1465_v61 = vpop.f32.mrf.mxu0 }
 0x1d9   : > { %v1406_v9 = vpop.f32.mrf.mxu1 }
 0x1da   : > { %v1532_v33 = vsel %vm5167_vm1, %v1406_v9, -10000.0 }
 0x1db   : > { %v1543_v10 = vsel %vm1539_vm2, %v1532_v33, -inf }
 0x1dc   : > { %1544 = vmax.xlane.f32.xlu2 %v1543_v10 }
 0x1e1   : > { %v1408_v11 = vpop.f32.mrf.mxu1 }
 0x1f4   : > { %v1542_v32 = vpop.xlane.xlu2 %1541 }
 0x1f5   : > { %v1564_v6 = vsub.f32 %v5174_v54, %v1542_v32 }
 0x1f7   : > { %v1425_v12 = vpop.f32.mrf.mxu2  ;;  %v1572_v9 = vmul.f32 1.442695, %v1564_v6 }
 0x1f8   : > { %v1533_v13 = vsel %vm5167_vm1, %v1425_v12, -10000.0 }
 0x1f9   : > { %v1482_v14 = vpop.f32.mrf.mxu1  ;;  %v1546_v15 = vsel %vm1539_vm2, %v1533_v13, -inf }
 0x1fa   : > { %1547 = vmax.xlane.f32.xlu0 %v1546_v15  ;;  %v1536_v23 = vsel %vm5167_vm1, %v1482_v14, -10000.0 }
 0x1fb   : > { %v1555_v53 = vsel %vm1539_vm2, %v1536_v23, -inf }
 0x1ff   : > { %v1427_v17 = vpop.f32.mrf.mxu2 }
 0x200   : > { %v1444_v18 = vpop.f32.mrf.mxu3 }
 0x201   : > { %v1534_v19 = vsel %vm5167_vm1, %v1444_v18, -10000.0  ;;  %v1484_v20 = vpop.f32.mrf.mxu1 }
 0x202   : > { %v1549_v22 = vsel %vm1539_vm2, %v1534_v19, -inf  ;;  %1553 = vmax.xlane.f32.xlu0 %v1552_v21 }
 0x203   : > { %1550 = vmax.xlane.f32.xlu1 %v1549_v22 }
 0x207   : > { %v1501_v25 = vpop.f32.mrf.mxu2 }
 0x208   : > { %v1446_v24 = vpop.f32.mrf.mxu3  ;;  %v1537_v26 = vsel %vm5167_vm1, %v1501_v25, -10000.0 }
 0x209   : > { %v1558_v49 = vsel %vm1539_vm2, %v1537_v26, -inf }
 0x20a   : > { %1559 = vmax.xlane.f32.xlu2 %v1558_v49 }
 0x20b   : > { %1556 = vmax.xlane.f32.xlu1 %v1555_v53 }
 0x20f   : > { %v1503_v27 = vpop.f32.mrf.mxu2 }
 0x210   : > { %v1520_v28 = vpop.f32.mrf.mxu3 }
 0x211   : > { %v1538_v29 = vsel %vm5167_vm1, %v1520_v28, -10000.0 }
 0x212   : > { %v1561_v30 = vsel %vm1539_vm2, %v1538_v29, -inf }
 0x213   : > { %1562 = vmax.xlane.f32.xlu0 %v1561_v30 }
 0x218   : > { %v1522_v31 = vpop.f32.mrf.mxu3 }
 0x24f   : > { %v1545_v34 = vpop.xlane.xlu2 %1544 }
 0x250   : > { %v1565_v35 = vsub.f32 %v1532_v33, %v1545_v34 }
 0x252   : > { %v1574_v36 = vmul.f32 1.442695, %v1565_v35 }
 0x254   : > { %4591 = vpow2.f32 %v1574_v36 }
 0x25a   : > { %v5213_v37 = vpop.eup %4591 }
 0x25b   : > { %v1591_v39 = vsel %vm1539_vm2, %v5213_v37, 0.0 }
 0x25c   : > { %1592 = vadd.xlane.f32.xlu2 %v1591_v39 }
 0x26d   : > { %v1548_v40 = vpop.xlane.xlu0 %1547 }
 0x26e   : > { %v1566_v41 = vsub.f32 %v1533_v13, %v1548_v40 }
 0x270   : > { %v1576_v42 = vmul.f32 1.442695, %v1566_v41 }
 0x272   : > { %4593 = vpow2.f32 %v1576_v42 }
 0x275   : > { %v1554_v48 = vpop.xlane.xlu0 %1553 }
 0x276   : > { %v1551_v43 = vpop.xlane.xlu1 %1550  ;;  %v1568_v5 = vsub.f32 %v5197_v16, %v1554_v48 }
 0x277   : > { %v1567_v44 = vsub.f32 %v1534_v19, %v1551_v43 }
 0x278   : > { %v5217_v45 = vpop.eup %4593  ;;  %v1580_v8 = vmul.f32 1.442695, %v1568_v5 }
 0x279   : > { %v1578_v46 = vmul.f32 1.442695, %v1567_v44  ;;  %v1594_v47 = vsel %vm1539_vm2, %v5217_v45, 0.0 }
 0x27a   : > { %1595 = vadd.xlane.f32.xlu0 %v1594_v47 }
 0x27b   : > { %4595 = vpow2.f32 %v1578_v46 }
 0x27d   : > { %v1560_v51 = vpop.xlane.xlu2 %1559 }
 0x27e   : > { %v1570_v52 = vsub.f32 %v1537_v26, %v1560_v51  ;;  %v1557_v1 = vpop.xlane.xlu1 %1556 }
 0x27f   : > { %v1569_v2 = vsub.f32 %v1536_v23, %v1557_v1 }
 0x280   : > { %v1584_v55 = vmul.f32 1.442695, %v1570_v52 }
 0x281   : > { %v5221_v56 = vpop.eup %4595  ;;  %v1582_v3 = vmul.f32 1.442695, %v1569_v2 }
 0x282   : > { %4597 = vpow2.f32 %v1584_v55  ;;  %v1597_v57 = vsel %vm1539_vm2, %v5221_v56, 0.0 }
 0x283   : > { %1598 = vadd.xlane.f32.xlu1 %v1597_v57 }
 0x286   : > { %v1563_v58 = vpop.xlane.xlu0 %1562 }
 0x287   : > { %v1571_v59 = vsub.f32 %v1538_v29, %v1563_v58 }
 0x288   : > { %v5225_v60 = vpop.eup %4597 }
 0x289   : > { %v1586_v61 = vmul.f32 1.442695, %v1571_v59  ;;  %v1606_v62 = vsel %vm1539_vm2, %v5225_v60, 0.0 }
 0x28a   : > { %1607 = vadd.xlane.f32.xlu2 %v1606_v62 }
 0x28b   : > { %4599 = vpow2.f32 %v1586_v61 }
 0x28c   : > { %4601 = vpow2.f32 %v1582_v3 }
 0x28d   : > { %4603 = vpow2.f32 %v1580_v8 }
 0x28e   : > { %1350 = vrot.lane.b32.xlu0 %v5161_v38, %s4908_s19  ;;  %4605 = vpow2.f32 %v1572_v9 }
 0x291   : > { %v5231_v63 = vpop.eup %4599 }
 0x292   : > { %v1609_v0 = vsel %vm1539_vm2, %v5231_v63, 0.0  ;;  %v5247_v7 = vpop.eup %4601 }
 0x293   : > { %1610 = vadd.xlane.f32.xlu2 %v1609_v0  ;;  %v1603_v33 = vsel %vm1539_vm2, %v5247_v7, 0.0 }
 0x296   : > { %1357 = vrot.lane.b32.xlu0 %v5184_v4, %s4907_s17 }
 0x29c   : > { %1347 = vrot.lane.b32.xlu1 %v5161_v38, %s4907_s17 }
 0x29e   : > { %1360 = vrot.lane.b32.xlu0 %v5184_v4, %s4908_s19 }
 0x2a6   : > { %1354 = vrot.lane.b32.xlu0 %v5184_v4, %s4909_s28  ;;  %v5251_v4 = vpop.eup %4603 }
 0x2a7   : > { %v1600_v10 = vsel %vm1539_vm2, %v5251_v4, 0.0 }
 0x2ab   : > { %1344 = vrot.lane.b32.xlu2 %v5161_v38, %s4909_s28  ;;  %v5253_v38 = vpop.eup %4605 }
 0x2ac   : > { %v1588_v54 = vsel %vm1539_vm2, %v5253_v38, 0.0 }
 0x2c6   : > { %1604 = vadd.xlane.f32.xlu1 %v1603_v33 }
 0x2cf   : > { %v1593_v11 = vpop.xlane.xlu2 %1592 }
 0x2d0   : > { %1601 = vadd.xlane.f32.xlu0 %v1600_v10  ;;  %4607 = vrcp.f32 %v1593_v11  ;;  %vm1632_vm5 = vweird.f32 %v1593_v11  ;;  %v1636_v29 = vand.u32 2147483647, %v1593_v11  ;;  %v1638_v35 = vand.u32 2147483648, %v1593_v11 }
 0x2d2   : > { %v1639_v52 = vor.u32 1.1754944e-38, %v1638_v35  ;;  %vm1637_vm14 = vcmp.eq.f32.partialorder %v1636_v29, 8.507059e+37 }
 0x2d4   : > { %1589 = vadd.xlane.f32.xlu2 %v1588_v54 }
 0x2d6   : > { %v4608_v13 = vpop.eup %4607 }
 0x2d7   : > { %v1628_v16 = vmul.f32 %v4608_v13, %v1593_v11  ;;  %vm1633_vm6 = vweird.f32 %v4608_v13 }
 0x2d8   : > { %vm1634_vm11 = vmor %vm1632_vm5, %vm1633_vm6 }
 0x2d9   : > { %v1629_v18 = vsub.f32 1.0, %v1628_v16 }
 0x2db   : > { %v1630_v23 = vmul.f32 %v4608_v13, %v1629_v18 }
 0x2dd   : > { %v1631_v31 = vadd.f32 %v4608_v13, %v1630_v23 }
 0x2df   : > { %v1635_v46 = vsel %vm1634_vm11, %v4608_v13, %v1631_v31 }
 0x2e0   : > { %v1640_v59 = vsel %vm1637_vm14, %v1639_v52, %v1635_v46 }
 0x2ed   : > { %v1596_v12 = vpop.xlane.xlu0 %1595 }
 0x2ee   : > { %4609 = vrcp.f32 %v1596_v12  ;;  %v1653_v41 = vand.u32 2147483648, %v1596_v12  ;;  %vm1647_vm12 = vweird.f32 %v1596_v12  ;;  %v1651_v43 = vand.u32 2147483647, %v1596_v12 }
 0x2f0   : > { %v1654_v57 = vor.u32 1.1754944e-38, %v1653_v41  ;;  %vm1652_vm15 = vcmp.eq.f32.partialorder %v1651_v43, 8.507059e+37 }
 0x2f4   : > { %v4610_v14 = vpop.eup %4609 }
 0x2f5   : > { %v1643_v17 = vmul.f32 %v4610_v14, %v1596_v12  ;;  %vm1648_vm8 = vweird.f32 %v4610_v14 }
 0x2f6   : > { %v1599_v15 = vpop.xlane.xlu1 %1598  ;;  %vm1649_vm13 = vmor %vm1647_vm12, %vm1648_vm8 }
 0x2f7   : > { %4611 = vrcp.f32 %v1599_v15  ;;  %v1644_v20 = vsub.f32 1.0, %v1643_v17  ;;  %v1668_v49 = vand.u32 2147483648, %v1599_v15  ;;  %v1666_v28 = vand.u32 2147483647, %v1599_v15 }
 0x2f8   : > { %vm1662_vm7 = vweird.f32 %v1599_v15 }
 0x2f9   : > { %v1645_v26 = vmul.f32 %v4610_v14, %v1644_v20  ;;  %v1669_v39 = vor.u32 1.1754944e-38, %v1668_v49  ;;  %vm1667_vm10 = vcmp.eq.f32.partialorder %v1666_v28, 8.507059e+37 }
 0x2fb   : > { %v1646_v36 = vadd.f32 %v4610_v14, %v1645_v26 }
 0x2fd   : > { %v4612_v19 = vpop.eup %4611  ;;  %v5259_v21 = vpop.xlane.xlu2 %1607  ;;  %v1650_v55 = vsel %vm1649_vm13, %v4610_v14, %v1646_v36 }
 0x2fe   : > { %v1658_v22 = vmul.f32 %v4612_v19, %v1599_v15  ;;  %4613 = vrcp.f32 %v5259_v21  ;;  %vm1663_vm4 = vweird.f32 %v4612_v19  ;;  %v1655_v62 = vsel %vm1652_vm15, %v1654_v57, %v1650_v55 }
 0x2ff   : > { %vm1664_vm9 = vmor %vm1662_vm7, %vm1663_vm4  ;;  %v1656_v8 = vmul.f32 %v5217_v45, %v1655_v62  ;;  %v1711_v26 = vand.u32 2147483647, %v5259_v21 }
 0x300   : > { %v1659_v24 = vsub.f32 1.0, %v1658_v22  ;;  %v1351_v25 = vpop.permute.xlu0 %1350 }
 0x301   : > { %v1366_v53 = vpack.c.bf16 %v1351_v25, %v1351_v25  ;;  %vm1712_vm11 = vcmp.eq.f32.partialorder %v1711_v26, 8.507059e+37 }
 0x302   : > { %v1660_v27 = vmul.f32 %v4612_v19, %v1659_v24  ;;  %v1713_v24 = vand.u32 2147483648, %v5259_v21 }
 0x303   : > { %v1802_v30 = vsel %vm1743_vm3, %v1366_v53, 0 }
 0x304   : > { %v1661_v32 = vadd.f32 %v4612_v19, %v1660_v27  ;;  %1811 = vmatpush.bf16.msrb.mxu3 %v1802_v30  ;;  %v5263_v34 = vpop.eup %4613  ;;  %v1714_v30 = vor.u32 1.1754944e-38, %v1713_v24  ;;  %v4910_v24 = vmov 0.0  }
 0x305   : > { %v1703_v48 = vmul.f32 %v5263_v34, %v5259_v21  ;;  %vm1708_vm7 = vweird.f32 %v5263_v34  ;;  %1893 = vst [vmem:[#allocation3] sm:$0xff] %v4910_v24 }
 0x306   : > { %v1611_v40 = vpop.xlane.xlu2 %1610  ;;  %v1665_v42 = vsel %vm1664_vm9, %v4612_v19, %v1661_v32  ;;  %v1734_v19 = vpack.c.bf16 %v1656_v8, %v1656_v8  ;;  %vm1707_vm9 = vweird.f32 %v5259_v21  ;;  %1894 = vst [vmem:[#allocation3 + $0x8] sm:$0xff] %v4910_v24 }
 0x307   : > { %4615 = vrcp.f32 %v1611_v40  ;;  %v1670_v44 = vsel %vm1667_vm10, %v1669_v39, %v1665_v42  ;;  %v1704_v0 = vsub.f32 1.0, %v1703_v48  ;;  %v1726_v54 = vand.u32 2147483647, %v1611_v40  ;;  %vm1709_vm10 = vmor %vm1707_vm9, %vm1708_vm7  ;;  %3244 = vst [vmem:[#allocation5] sm:$0xff] %v4910_v24  ;;  %v4388_v24 = vld [vmem:[#allocation9 + $0x24] sm:$0xf0] }
 0x308   : > { %v1671_v47 = vmul.f32 %v5221_v56, %v1670_v44  ;;  %v1358_v51 = vpop.permute.xlu0 %1357  ;;  %v1641_v56 = vmul.f32 %v5213_v37, %v1640_v59  ;;  %v1728_v11 = vand.u32 2147483648, %v1611_v40  ;;  %vm1722_vm5 = vweird.f32 %v1611_v40 }
 0x309   : > { %v1369_v3 = vpack.c.bf16 %v1358_v51, %v1358_v51  ;;  %v1705_v10 = vmul.f32 %v5263_v34, %v1704_v0  ;;  %vm1727_vm8 = vcmp.eq.f32.partialorder %v1726_v54, 8.507059e+37 }
 0x30a   : > { %v1735_v58 = vpack.c.bf16 %v1671_v47, %v1671_v47  ;;  %v1733_v17 = vpack.c.bf16 %v1641_v56, %v1641_v56  ;;  %v1729_v20 = vor.u32 1.1754944e-38, %v1728_v11 }
 0x30b   : > { %v1859_v37 = vsel %vm1743_vm3, %v1369_v3, 0  ;;  %v1706_v22 = vadd.f32 %v5263_v34, %v1705_v10 }
 0x30c   : > { %3996 = vmatmul.msk.bf16.vlgmr.msrb.gmra.mxu3 %vm1539_vm2, %v1735_v58 }
 0x30d   : > { %v4616_v61 = vpop.eup %4615  ;;  %v1710_v27 = vsel %vm1709_vm10, %v5263_v34, %v1706_v22 }
 0x30e   : > { %v1718_v1 = vmul.f32 %v4616_v61, %v1611_v40  ;;  %v1345_v2 = vpop.permute.xlu2 %1344  ;;  %v1348_v6 = vpop.permute.xlu1 %1347  ;;  %vm1723_vm4 = vweird.f32 %v4616_v61  ;;  %v1715_v32 = vsel %vm1712_vm11, %v1714_v30, %v1710_v27  ;;  %v4414_v27 = vld [vmem:[#allocation9 + $0xf4] sm:$0xf0]  ;;  %v4412_v30 = vld [vmem:[#allocation9 + $0xe4] sm:$0xf0] }
 0x30f   : > { %v1364_v5 = vpack.c.bf16 %v1345_v2, %v1345_v2  ;;  %v1365_v33 = vpack.c.bf16 %v1348_v6, %v1348_v6  ;;  %vm1724_vm6 = vmor %vm1722_vm5, %vm1723_vm4  ;;  %v1716_v35 = vmul.f32 %v5225_v60, %v1715_v32  ;;  %v4398_v32 = vld [vmem:[#allocation9 + $0x74] sm:$0xf0] }
 0x310   : > { %v1719_v9 = vsub.f32 1.0, %v1718_v1  ;;  %v1361_v13 = vpop.permute.xlu0 %1360 }
 0x311   : > { %v1764_v12 = vsel %vm1743_vm3, %v1364_v5, 0  ;;  %v1783_v15 = vsel %vm1743_vm3, %v1365_v33, 0  ;;  %v1370_v16 = vpack.c.bf16 %v1361_v13, %v1361_v13  ;;  %v1738_v36 = vpack.c.bf16 %v1716_v35, %v1716_v35 }
 0x312   : > { %v1720_v14 = vmul.f32 %v4616_v61, %v1719_v9  ;;  %1773 = vmatpush.bf16.msra.mxu1 %v1764_v12  ;;  %1792 = vmatpush.bf16.msrb.mxu2 %v1783_v15 }
 0x313   : > { %v1878_v18 = vsel %vm1743_vm3, %v1370_v16, 0 }
 0x314   : > { %v1721_v45 = vadd.f32 %v4616_v61, %v1720_v14  ;;  %1887 = vmatpush.bf16.msra.mxu3 %v1878_v18 }
 0x315   : > { %3994 = vmatmul.msk.bf16.vlgmr.msra.gmra.mxu1 %vm1539_vm2, %v1733_v17  ;;  %3995 = vmatmul.msk.bf16.vlgmr.msrb.gmra.mxu2 %vm1539_vm2, %v1734_v19 }
 0x316   : > { %1868 = vmatpush.bf16.msra.mxu2 %v1859_v37  ;;  %v1725_v23 = vsel %vm1724_vm6, %v4616_v61, %v1721_v45 }
 0x317   : > { %v1730_v25 = vsel %vm1727_vm8, %v1729_v20, %v1725_v23 }
 0x318   : > { %v1731_v49 = vmul.f32 %v5231_v63, %v1730_v25  ;;  %v1355_v53 = vpop.permute.xlu0 %1354 }
 0x319   : > { %v1368_v28 = vpack.c.bf16 %v1355_v53, %v1355_v53  ;;  %v4123_v53 = vld [vmem:[#allocation9 + $0xf0] sm:$0xf] }
 0x31a   : > { %v1739_v29 = vpack.c.bf16 %v1731_v49, %v1731_v49 }
 0x31b   : > { %v1840_v31 = vsel %vm1743_vm3, %v1368_v28, 0  ;;  %v4115_v28 = vld [vmem:[#allocation9 + $0xe0] sm:$0xf] }
 0x31c   : > { %4000 = vmatmul.msk.bf16.vlgmr.msra.gmra.mxu3 %vm1539_vm2, %v1739_v29  ;;  %1849 = vmatpush.bf16.msrb.mxu1 %v1840_v31  ;;  %v4124_v29 = vor.u32 %v4414_v27, %v4123_v53  ;;  %v4059_v31 = vld [vmem:[#allocation9 + $0x70] sm:$0xf]  ;;  %v4045_v53 = vld [vmem:[#allocation9 + $0x58] sm:$0xf0] }
 0x31d   : > { %v4060_v35 = vor.u32 %v4398_v32, %v4059_v31  ;;  %v4436_v31 = vld [vmem:[#allocation11 + $0xac] sm:$0xf] }
 0x320   : > { %2145 = vmatpush.bf16.msra.mxu1 %v4124_v29  ;;  %v4405_v29 = vld [vmem:[#allocation9 + $0xb4] sm:$0xf] }
 0x325   : > { %3999 = vmatmul.msk.bf16.vlgmr.msra.gmra.mxu2 %vm1539_vm2, %v1738_v36  ;;  %v4051_v36 = vld [vmem:[#allocation9 + $0x60] sm:$0xf] }
 0x339   : > { %v1605_v63 = vpop.xlane.xlu1 %1604 }
 0x33a   : > { %4617 = vrcp.f32 %v1605_v63  ;;  %v1698_v41 = vand.u32 2147483648, %v1605_v63  ;;  %v1696_v43 = vand.u32 2147483647, %v1605_v63  ;;  %vm1692_vm13 = vweird.f32 %v1605_v63 }
 0x33c   : > { %v1699_v60 = vor.u32 1.1754944e-38, %v1698_v41  ;;  %vm1697_vm15 = vcmp.eq.f32.partialorder %v1696_v43, 8.507059e+37  ;;  %v4125_v43 = vld [vmem:[#allocation9 + $0xf8] sm:$0xf0] }
 0x340   : > { %v4618_v21 = vpop.eup %4617 }
 0x341   : > { %v1688_v39 = vmul.f32 %v4618_v21, %v1605_v63  ;;  %vm1693_vm12 = vweird.f32 %v4618_v21  ;;  %v4116_v63 = vor.u32 %v4412_v30, %v4115_v28  ;;  %v4093_v30 = vld [vmem:[#allocation9 + $0xb8] sm:$0xf0] }
 0x342   : > { %vm1694_vm14 = vmor %vm1692_vm13, %vm1693_vm12  ;;  %v4096_v32 = vor.u32 %v4405_v29, %v4093_v30  ;;  %vm1906_vm12 = vcmask 785920   ;;  %vm1912_vm13 = vcmask 1048320  }
 0x343   : > { %v1689_v34 = vsub.f32 1.0, %v1688_v39  ;;  %v1602_v40 = vpop.xlane.xlu0 %1601  ;;  %v4396_v39 = vld [vmem:[#allocation9 + $0x64] sm:$0xf0]  ;;  %2146 = vmatpush.bf16.msra.mxu1 %v4116_v63  ;;  %v4386_v63 = vld [vmem:[#allocation9 + $0x14] sm:$0xf0] }
 0x344   : > { %4619 = vrcp.f32 %v1602_v40  ;;  %v1683_v10 = vand.u32 2147483648, %v1602_v40  ;;  %vm1677_vm9 = vweird.f32 %v1602_v40  ;;  %v1681_v54 = vand.u32 2147483647, %v1602_v40 }
 0x345   : > { %v1690_v42 = vmul.f32 %v4618_v21, %v1689_v34  ;;  %v4052_v41 = vor.u32 %v4396_v39, %v4051_v36  ;;  %v4011_v36 = vld [vmem:[#allocation9 + $0x10] sm:$0xf] }
 0x346   : > { %v1684_v12 = vor.u32 1.1754944e-38, %v1683_v10  ;;  %vm1682_vm11 = vcmp.eq.f32.partialorder %v1681_v54, 8.507059e+37  ;;  %v4409_v54 = vld [vmem:[#allocation9 + $0xd4] sm:$0xf]  ;;  %v4012_v39 = vor.u32 %v4386_v63, %v4011_v36  ;;  %v4418_v36 = vld [vmem:[#allocation11 + $0x1c] sm:$0xf] }
 0x347   : > { %v1590_v44 = vpop.xlane.xlu2 %1589  ;;  %v1691_v46 = vadd.f32 %v4618_v21, %v1690_v42  ;;  %v4413_v42 = vld [vmem:[#allocation9 + $0xf4] sm:$0xf]  ;;  %v4145_v63 = vld [vmem:[#allocation11 + $0x24] sm:$0xf0] }
 0x348   : > { %4621 = vrcp.f32 %v1590_v44  ;;  %v1623_v62 = vand.u32 2147483648, %v1590_v44  ;;  %v1621_v1 = vand.u32 2147483647, %v1590_v44  ;;  %vm1617_vm5 = vweird.f32 %v1590_v44 }
 0x349   : > { %v1695_v47 = vsel %vm1694_vm14, %v4618_v21, %v1691_v46  ;;  %v4107_v21 = vld [vmem:[#allocation9 + $0xd0] sm:$0xf]  ;;  %vm2528_vm14 = vcmask 48128  }
 0x34a   : > { %v1700_v48 = vsel %vm1697_vm15, %v1699_v60, %v1695_v47  ;;  %v4620_v52 = vpop.eup %4619  ;;  %v1624_v3 = vor.u32 1.1754944e-38, %v1623_v62  ;;  %vm1622_vm7 = vcmp.eq.f32.partialorder %v1621_v1, 8.507059e+37  ;;  %v4043_v46 = vld [vmem:[#allocation9 + $0x50] sm:$0xf]  ;;  %v4394_v60 = vld [vmem:[#allocation9 + $0x54] sm:$0xf0] }
 0x34b   : > { %v1701_v51 = vmul.f32 %v5247_v7, %v1700_v48  ;;  %v1673_v59 = vmul.f32 %v4620_v52, %v1602_v40  ;;  %vm1678_vm8 = vweird.f32 %v4620_v52  ;;  %v4410_v40 = vld [vmem:[#allocation9 + $0xd4] sm:$0xf0]  ;;  %v4411_v47 = vld [vmem:[#allocation9 + $0xe4] sm:$0xf]  ;;  %v4117_v48 = vld [vmem:[#allocation9 + $0xe8] sm:$0xf0] }
 0x34c   : > { %vm1679_vm10 = vmor %vm1677_vm9, %vm1678_vm8  ;;  %v4091_v62 = vld [vmem:[#allocation9 + $0xb0] sm:$0xf] }
 0x34d   : > { %v1737_v57 = vpack.c.bf16 %v1701_v51, %v1701_v51  ;;  %v1674_v2 = vsub.f32 1.0, %v1673_v59  ;;  %v4108_v51 = vor.u32 %v4410_v40, %v4107_v21  ;;  %v4037_v40 = vld [vmem:[#allocation9 + $0x48] sm:$0xf0] }
 0x34e   : > { %v4622_v55 = vpop.eup %4621 }
 0x34f   : > { %v1613_v58 = vmul.f32 %v4622_v55, %v1590_v44  ;;  %3998 = vmatmul.msk.bf16.vlgmr.msrb.gmra.mxu1 %vm1539_vm2, %v1737_v57  ;;  %vm1618_vm4 = vweird.f32 %v4622_v55  ;;  %v1675_v6 = vmul.f32 %v4620_v52, %v1674_v2  ;;  %v4128_v44 = vor.u32 %v4413_v42, %v4125_v43  ;;  %v4408_v57 = vld [vmem:[#allocation9 + $0xc4] sm:$0xf0]  ;;  %v4085_v43 = vld [vmem:[#allocation9 + $0xa8] sm:$0xf0] }
 0x350   : > { %vm1619_vm6 = vmor %vm1617_vm5, %vm1618_vm4  ;;  %2147 = vmatpush.bf16.msra.mxu1 %v4108_v51  ;;  %v4384_v51 = vld [vmem:[#allocation9 + $0x4] sm:$0xf0] }
 0x351   : > { %v1614_v61 = vsub.f32 1.0, %v1613_v58  ;;  %v1676_v33 = vadd.f32 %v4620_v52, %v1675_v6  ;;  %2171 = vmatpush.bf16.msrb.mxu3 %v4128_v44  ;;  %v4044_v58 = vor.u32 %v4394_v60, %v4043_v46  ;;  %v4404_v6 = vld [vmem:[#allocation9 + $0xa4] sm:$0xf0]  ;;  %v4433_v44 = vld [vmem:[#allocation11 + $0x94] sm:$0xf] }
 0x352   : > { %v4205_v46 = vld [vmem:[#allocation11 + $0x9c] sm:$0xf0] }
 0x353   : > { %v1615_v0 = vmul.f32 %v4622_v55, %v1614_v61  ;;  %v1680_v11 = vsel %vm1679_vm10, %v4620_v52, %v1676_v33  ;;  %v4120_v52 = vor.u32 %v4411_v47, %v4117_v48  ;;  %v4208_v47 = vor.u32 %v4433_v44, %v4205_v46  ;;  %v4003_v48 = vld [vmem:[#allocation9] sm:$0xf]  ;;  %v4143_v46 = vld [vmem:[#allocation11 + $0x18] sm:$0xf] }
 0x354   : > { %v1685_v13 = vsel %vm1682_vm11, %v1684_v12, %v1680_v11  ;;  %v4109_v11 = vld [vmem:[#allocation9 + $0xd8] sm:$0xf0]  ;;  %v4027_v12 = vld [vmem:[#allocation9 + $0x30] sm:$0xf] }
 0x355   : > { %v1616_v56 = vadd.f32 %v4622_v55, %v1615_v0  ;;  %v1686_v14 = vmul.f32 %v5251_v4, %v1685_v13  ;;  %2172 = vmatpush.bf16.msrb.mxu3 %v4120_v52  ;;  %v4406_v0 = vld [vmem:[#allocation9 + $0xb4] sm:$0xf0]  ;;  %v4112_v13 = vor.u32 %v4409_v54, %v4109_v11  ;;  %v4389_v52 = vld [vmem:[#allocation9 + $0x34] sm:$0xf]  ;;  %v4434_v11 = vld [vmem:[#allocation11 + $0x98] sm:$0xf0] }
 0x356   : > { %v4092_v1 = vor.u32 %v4406_v0, %v4091_v62  ;;  %v4215_v0 = vld [vmem:[#allocation11 + $0xa8] sm:$0xf] }
 0x357   : > { %v1620_v5 = vsel %vm1619_vm6, %v4622_v55, %v1616_v56  ;;  %v1736_v15 = vpack.c.bf16 %v1686_v14, %v1686_v14  ;;  %v4099_v55 = vld [vmem:[#allocation9 + $0xc0] sm:$0xf]  ;;  %v4390_v14 = vld [vmem:[#allocation9 + $0x34] sm:$0xf0] }
 0x358   : > { %v1625_v7 = vsel %vm1622_vm7, %v1624_v3, %v1620_v5  ;;  %v4100_v59 = vor.u32 %v4408_v57, %v4099_v55  ;;  %v4035_v56 = vld [vmem:[#allocation9 + $0x40] sm:$0xf]  ;;  %v4392_v3 = vld [vmem:[#allocation9 + $0x44] sm:$0xf0]  ;;  %v4004_v55 = vor.u32 %v4384_v51, %v4003_v48  ;;  %v4029_v57 = vld [vmem:[#allocation9 + $0x38] sm:$0xf0] }
 0x359   : > { %v1626_v8 = vmul.f32 %v5253_v38, %v1625_v7  ;;  %v4083_v5 = vld [vmem:[#allocation9 + $0xa0] sm:$0xf]  ;;  %v4036_v7 = vor.u32 %v4392_v3, %v4035_v56  ;;  %2173 = vmatpush.bf16.msrb.mxu3 %v4112_v13  ;;  %v4193_v3 = vld [vmem:[#allocation11 + $0x84] sm:$0xf0]  ;;  %v4181_v13 = vld [vmem:[#allocation11 + $0x6c] sm:$0xf0] }
 0x35a   : > { %2148 = vmatpush.bf16.msra.mxu1 %v4100_v59  ;;  %v4084_v33 = vor.u32 %v4404_v6, %v4083_v5  ;;  %v4077_v59 = vld [vmem:[#allocation9 + $0x98] sm:$0xf0]  ;;  %v4387_v5 = vld [vmem:[#allocation9 + $0x24] sm:$0xf]  ;;  %v4131_v48 = vld [vmem:[#allocation11] sm:$0xf] }
 0x35b   : > { %v1732_v9 = vpack.c.bf16 %v1626_v8, %v1626_v8  ;;  %v4397_v8 = vld [vmem:[#allocation9 + $0x74] sm:$0xf]  ;;  %v4416_v51 = vld [vmem:[#allocation11 + $0x8] sm:$0xf0] }
 0x35d   : > { %3993 = vmatmul.msk.bf16.vlgmr.msra.gmra.mxu0 %vm1539_vm2, %v1732_v9  ;;  %v4061_v9 = vld [vmem:[#allocation9 + $0x78] sm:$0xf0] }
 0x35e   : > { %2132 = vmatpush.bf16.msra.mxu0 %v4060_v35  ;;  %2149 = vmatpush.bf16.msra.mxu1 %v4092_v1  ;;  %v4064_v10 = vor.u32 %v4397_v8, %v4061_v9  ;;  %v4217_v35 = vld [vmem:[#allocation11 + $0xb4] sm:$0xf0]  ;;  %v4437_v1 = vld [vmem:[#allocation11 + $0xb0] sm:$0xf0]  ;;  %v4399_v9 = vld [vmem:[#allocation9 + $0x84] sm:$0xf] }
 0x35f   : > { %v4220_v21 = vor.u32 %v4436_v31, %v4217_v35  ;;  %v4216_v56 = vor.u32 %v4437_v1, %v4215_v0  ;;  %v4167_v31 = vld [vmem:[#allocation11 + $0x48] sm:$0xf] }
 0x360   : > { %2158 = vmatpush.bf16.msrb.mxu2 %v4064_v10  ;;  %v4203_v10 = vld [vmem:[#allocation11 + $0x90] sm:$0xf]  ;;  %v2186_v0 = vld [vmem:[%s519_s3] sm:$0xff]  ;;  %s4919_s3 = smov 86  }
 0x361   : > { %v5315_v1 = vpack.c.bf16 %v2186_v0, %v2186_v0 }
 0x362   : > { %2133 = vmatpush.bf16.msra.mxu0 %v4052_v41  ;;  %2150 = vmatpush.bf16.msra.mxu1 %v4084_v33  ;;  %v4403_v41 = vld [vmem:[#allocation9 + $0xa4] sm:$0xf]  ;;  %v4069_v33 = vld [vmem:[#allocation9 + $0x88] sm:$0xf0] }
 0x363   : > { %v4088_v60 = vor.u32 %v4403_v41, %v4085_v43  ;;  %v4072_v54 = vor.u32 %v4399_v9, %v4069_v33  ;;  %v4133_v41 = vld [vmem:[#allocation11 + $0xc] sm:$0xf0]  ;;  %v5329_v9 = vld [vmem:[%s5642_s7] sm:$0x7] }
 0x366   : > { %2134 = vmatpush.bf16.msra.mxu0 %v4044_v58  ;;  %v4401_v58 = vld [vmem:[#allocation9 + $0x94] sm:$0xf] }
 0x367   : > { %v4080_v62 = vor.u32 %v4401_v58, %v4077_v59 }
 0x36a   : > { %2135 = vmatpush.bf16.msra.mxu0 %v4036_v7  ;;  %v4021_v7 = vld [vmem:[#allocation9 + $0x28] sm:$0xf0] }
 0x36b   : > { %v4024_v8 = vor.u32 %v4387_v5, %v4021_v7 }
 0x36d   : > { %3997 = vmatmul.msk.bf16.vlgmr.msrb.gmra.mxu0 %vm1539_vm2, %v1736_v15  ;;  %v4075_v15 = vld [vmem:[#allocation9 + $0x90] sm:$0xf] }
 0x38f   : > { %v1813_v16 = vpop.f32.mrf.mxu3 }
 0x392   : > { %v1775_v38 = vpop.f32.mrf.mxu1 }
 0x393   : > { %1897 = vrot.lane.b32.xlu0 %v1775_v38, %s4908_s19  ;;  %v4028_v38 = vor.u32 %v4390_v14, %v4027_v12  ;;  %v4427_v12 = vld [vmem:[#allocation11 + $0x64] sm:$0xf]  ;;  %v4204_v14 = vor.u32 %v4434_v11, %v4203_v10 }
 0x395   : > { %2136 = vmatpush.bf16.msra.mxu0 %v4028_v38  ;;  %v4013_v38 = vld [vmem:[#allocation9 + $0x18] sm:$0xf0] }
 0x397   : > { %v1815_v37 = vpop.f32.mrf.mxu3 }
 0x398   : > { %v1794_v17 = vpop.f32.mrf.mxu2 }
 0x39a   : > { %v1777_v45 = vpop.f32.mrf.mxu1 }
 0x39b   : > { %v4053_v45 = vld [vmem:[#allocation9 + $0x68] sm:$0xf0] }
 0x39f   : > { %v1889_v18 = vpop.f32.mrf.mxu3 }
 0x3a0   : > { %v1796_v19 = vpop.f32.mrf.mxu2 }
 0x3a7   : > { %v1891_v20 = vpop.f32.mrf.mxu3 }
 0x3a8   : > { %v1870_v22 = vpop.f32.mrf.mxu2  ;;  %v4101_v20 = vld [vmem:[#allocation9 + $0xc8] sm:$0xf0] }
 0x3a9   : > { %1921 = vrot.lane.b32.xlu2 %v1870_v22, %s4907_s17 }
 0x3b0   : > { %v1872_v23 = vpop.f32.mrf.mxu2 }
 0x3b1   : > { %v4019_v23 = vld [vmem:[#allocation9 + $0x20] sm:$0xf] }
 0x3cc   : > { %v1851_v4 = vpop.f32.mrf.mxu1 }
 0x3cd   : > { %1916 = vrot.lane.b32.xlu1 %v1851_v4, %s4908_s19  ;;  %v4067_v4 = vld [vmem:[#allocation9 + $0x80] sm:$0xf]  ;;  %s4915_s19 = smov 92  }
 0x3d4   : > { %v1853_v25 = vpop.f32.mrf.mxu1 }
 0x3d5   : > { %1903 = vrot.lane.b32.xlu1 %v1794_v17, %s4907_s17  ;;  %v4395_v17 = vld [vmem:[#allocation9 + $0x64] sm:$0xf]  ;;  %v4020_v25 = vor.u32 %v4388_v24, %v4019_v23  ;;  %v4005_v24 = vld [vmem:[#allocation9 + $0x8] sm:$0xf0]  ;;  %s4914_s17 = smov 110  }
 0x3d6   : > { %v4056_v19 = vor.u32 %v4395_v17, %v4053_v45  ;;  %v4431_v45 = vld [vmem:[#allocation11 + $0x80] sm:$0xf0] }
 0x3d7   : > { %2137 = vmatpush.bf16.msra.mxu0 %v4020_v25  ;;  %v4383_v23 = vld [vmem:[#allocation9 + $0x4] sm:$0xf] }
 0x3d8   : > { %2159 = vmatpush.bf16.msrb.mxu2 %v4056_v19  ;;  %v4169_v19 = vld [vmem:[#allocation11 + $0x54] sm:$0xf0]  ;;  %v4008_v25 = vor.u32 %v4383_v23, %v4005_v24 }
 0x3da   : > { %v1756_v26 = vpop.f32.mrf.mxu0 }
 0x3db   : > { %1895 = vst.msk [vmem:[#allocation3] sm:$0xff] %vm1371_vm0, %v1756_v26  ;;  %v4400_v26 = vld [vmem:[#allocation9 + $0x84] sm:$0xf0]  ;;  %2138 = vmatpush.bf16.msra.mxu0 %v4012_v39  ;;  %v4148_v39 = vor.u32 %v4418_v36, %v4145_v63  ;;  %v4175_v63 = vld [vmem:[#allocation11 + $0x50] sm:$0xf] }
 0x3dc   : > { %v4068_v27 = vor.u32 %v4400_v26, %v4067_v4  ;;  %v4179_v4 = vld [vmem:[#allocation11 + $0x60] sm:$0xf]  ;;  %v4428_v26 = vld [vmem:[#allocation11 + $0x68] sm:$0xf0] }
 0x3dd   : > { %1926 = vrot.lane.b32.xlu1 %v1889_v18, %s4909_s28  ;;  %v4407_v18 = vld [vmem:[#allocation9 + $0xc4] sm:$0xf] }
 0x3de   : > { %v4104_v22 = vor.u32 %v4407_v18, %v4101_v20  ;;  %v4424_v18 = vld [vmem:[#allocation11 + $0x4c] sm:$0xf] }
 0x3df   : > { %2139 = vmatpush.bf16.msra.mxu0 %v4004_v55 }
 0x3e0   : > { %2174 = vmatpush.bf16.msrb.mxu3 %v4104_v22  ;;  %v4172_v22 = vor.u32 %v4424_v18, %v4169_v19 }
 0x3e2   : > { %v1758_v49 = vpop.f32.mrf.mxu0 }
 0x3e3   : > { %v4393_v49 = vld [vmem:[#allocation9 + $0x54] sm:$0xf]  ;;  %2357 = vmatpush.bf16.msrb.mxu0 %v4216_v56  ;;  %v1966_v56 = vld [vmem:[%s5639_s4] sm:$0x3] }
 0x3e4   : > { %v4048_v28 = vor.u32 %v4393_v49, %v4045_v53  ;;  %2175 = vmatpush.bf16.msrb.mxu3 %v4096_v32  ;;  %v4421_v49 = vld [vmem:[#allocation11 + $0x34] sm:$0xf]  ;;  %v4157_v53 = vld [vmem:[#allocation11 + $0x3c] sm:$0xf0]  ;;  %v1969_v10 = vperm.slane %v1966_v56, 1 }
 0x3e5   : > { %1909 = vrot.lane.b32.xlu1 %v1813_v16, %s4909_s28  ;;  %v4402_v16 = vld [vmem:[#allocation9 + $0x94] sm:$0xf0]  ;;  %v4425_v32 = vld [vmem:[#allocation11 + $0x50] sm:$0xf0]  ;;  %s4916_s28 = smov 104  }
 0x3e6   : > { %v4076_v37 = vor.u32 %v4402_v16, %v4075_v15  ;;  %2160 = vmatpush.bf16.msrb.mxu2 %v4048_v28  ;;  %v4184_v15 = vor.u32 %v4427_v12, %v4181_v13  ;;  %v4385_v16 = vld [vmem:[#allocation9 + $0x14] sm:$0xf]  ;;  %v4160_v28 = vor.u32 %v4421_v49, %v4157_v53  ;;  %v4168_v35 = vor.u32 %v4425_v32, %v4167_v31  ;;  %v4211_v49 = vld [vmem:[#allocation11 + $0x98] sm:$0xf]  ;;  %v4435_v53 = vld [vmem:[#allocation11 + $0xa0] sm:$0xf0] }
 0x3e7   : > { %2358 = vmatpush.bf16.msrb.mxu0 %v4204_v14  ;;  %v4016_v17 = vor.u32 %v4385_v16, %v4013_v38  ;;  %v4187_v32 = vld [vmem:[#allocation11 + $0x68] sm:$0xf] }
 0x3e8   : > { %2151 = vmatpush.bf16.msra.mxu1 %v4076_v37  ;;  %2176 = vmatpush.bf16.msrb.mxu3 %v4088_v60  ;;  %v4191_v37 = vld [vmem:[#allocation11 + $0x78] sm:$0xf]  ;;  %v4419_v60 = vld [vmem:[#allocation11 + $0x20] sm:$0xf0] }
 0x3e9   : > { %v4192_v20 = vor.u32 %v4431_v45, %v4191_v37  ;;  %v2223_v45 = vperm.slane %v5329_v9, 0 }
 0x3ea   : > { %v1832_v34 = vpop.f32.mrf.mxu0 }
 0x3eb   : > { %1914 = vst.msk [vmem:[#allocation3 + $0x8] sm:$0xff] %vm1371_vm0, %v1832_v34  ;;  %vm1900_vm0 = vcmask 523520   ;;  %v4391_v34 = vld [vmem:[#allocation9 + $0x44] sm:$0xf]  ;;  %2359 = vmatpush.bf16.msrb.mxu0 %v4192_v20 }
 0x3ec   : > { %2152 = vmatpush.bf16.msra.mxu1 %v4068_v27  ;;  %v4040_v42 = vor.u32 %v4391_v34, %v4037_v40  ;;  %2177 = vmatpush.bf16.msrb.mxu3 %v4080_v62  ;;  %v4180_v27 = vor.u32 %v4428_v26, %v4179_v4  ;;  %v4422_v34 = vld [vmem:[#allocation11 + $0x38] sm:$0xf0]  ;;  %v4415_v40 = vld [vmem:[#allocation11 + $0x4] sm:$0xf]  ;;  %v4223_v4 = vld [vmem:[#allocation11 + $0xb0] sm:$0xf] }
 0x3ed   : > { %v4136_v43 = vor.u32 %v4415_v40, %v4133_v41  ;;  %v4423_v40 = vld [vmem:[#allocation11 + $0x40] sm:$0xf0] }
 0x3ee   : > { %2161 = vmatpush.bf16.msrb.mxu2 %v4040_v42 }
 0x3ef   : > { %2360 = vmatpush.bf16.msrb.mxu0 %v4180_v27 }
 0x3f0   : > { %2370 = vmatpush.bf16.msrb.mxu1 %v4220_v21  ;;  %2178 = vmatpush.bf16.msrb.mxu3 %v4072_v54  ;;  %v4155_v21 = vld [vmem:[#allocation11 + $0x30] sm:$0xf]  ;;  %v2224_v54 = vperm.slane %v5329_v9, 1 }
 0x3f1   : > { %v4156_v42 = vor.u32 %v4422_v34, %v4155_v21  ;;  %v4426_v21 = vld [vmem:[#allocation11 + $0x58] sm:$0xf0]  ;;  %v4163_v34 = vld [vmem:[#allocation11 + $0x38] sm:$0xf] }
 0x3f2   : > { %v1834_v61 = vpop.f32.mrf.mxu0  ;;  %v4164_v41 = vor.u32 %v4423_v40, %v4163_v34 }
 0x3f3   : > { %v4032_v61 = vor.u32 %v4389_v52, %v4029_v57  ;;  %2361 = vmatpush.bf16.msrb.mxu0 %v4168_v35  ;;  %v4132_v52 = vor.u32 %v4416_v51, %v4131_v48  ;;  %v4429_v35 = vld [vmem:[#allocation11 + $0x70] sm:$0xf0] }
 0x3f4   : > { %2371 = vmatpush.bf16.msrb.mxu1 %v4208_v47  ;;  %v4144_v47 = vor.u32 %v4419_v60, %v4143_v46  ;;  %v4188_v36 = vor.u32 %v4429_v35, %v4187_v32  ;;  %v4139_v46 = vld [vmem:[#allocation11 + $0x8] sm:$0xf]  ;;  %v4417_v60 = vld [vmem:[#allocation11 + $0x10] sm:$0xf0] }
 0x3f5   : > { %2162 = vmatpush.bf16.msrb.mxu2 %v4032_v61 }
 0x3f7   : > { %2362 = vmatpush.bf16.msrb.mxu0 %v4156_v42  ;;  %v4151_v42 = vld [vmem:[#allocation11 + $0x20] sm:$0xf] }
 0x3f9   : > { %2163 = vmatpush.bf16.msrb.mxu2 %v4024_v8 }
 0x3fb   : > { %2363 = vmatpush.bf16.msrb.mxu0 %v4144_v47  ;;  %v4140_v47 = vor.u32 %v4417_v60, %v4139_v46 }
 0x3fd   : > { %2164 = vmatpush.bf16.msrb.mxu2 %v4016_v17 }
 0x3ff   : > { %2364 = vmatpush.bf16.msrb.mxu0 %v4132_v52 }
 0x401   : > { %2165 = vmatpush.bf16.msrb.mxu2 %v4008_v25  ;;  %v4438_v25 = vld [vmem:[#allocation11 + $0xb8] sm:$0xf0] }
 0x402   : > { %v4224_v26 = vor.u32 %v4438_v25, %v4223_v4 }
 0x403   : > { %v1922_v30 = vpop.permute.xlu2 %1921 }
 0x405   : > { %v1898_v2 = vpop.permute.xlu0 %1897  ;;  %2383 = vmatpush.bf16.msra.mxu2 %v4224_v26  ;;  %v5372_v26 = vld [vmem:[%s523_s9] sm:$0xff] }
 0x406   : > { %1901 = vst.msk [vmem:[#allocation3] sm:$0xff] %vm1900_vm0, %v1898_v2  ;;  %v4430_v2 = vld [vmem:[#allocation11 + $0x7c] sm:$0xf] }
 0x407   : > { %v4196_v6 = vor.u32 %v4430_v2, %v4193_v3  ;;  %v1968_v3 = vperm.slane %v1966_v56, 0 }
 0x409   : > { %2372 = vmatpush.bf16.msrb.mxu1 %v4196_v6 }
 0x40d   : > { %2373 = vmatpush.bf16.msrb.mxu1 %v4184_v15 }
 0x411   : > { %2374 = vmatpush.bf16.msrb.mxu1 %v4172_v22 }
 0x415   : > { %2375 = vmatpush.bf16.msrb.mxu1 %v4160_v28  ;;  %v4212_v28 = vor.u32 %v4435_v53, %v4211_v49 }
 0x417   : > { %2384 = vmatpush.bf16.msra.mxu2 %v4212_v28 }
 0x419   : > { %2376 = vmatpush.bf16.msrb.mxu1 %v4148_v39  ;;  %v4176_v39 = vor.u32 %v4426_v21, %v4175_v63 }
 0x41d   : > { %2377 = vmatpush.bf16.msrb.mxu1 %v4136_v43  ;;  %v4420_v43 = vld [vmem:[#allocation11 + $0x28] sm:$0xf0] }
 0x43f   : > { %v1917_v29 = vpop.permute.xlu1 %1916 }
 0x440   : > { %1919 = vst.msk [vmem:[#allocation3 + $0x8] sm:$0xff] %vm1900_vm0, %v1917_v29  ;;  %v4199_v29 = vld [vmem:[#allocation11 + $0x80] sm:$0xf] }
 0x441   : > { %1924 = vst.msk [vmem:[#allocation3 + $0x8] sm:$0xff] %vm1906_vm12, %v1922_v30  ;;  %v4432_v30 = vld [vmem:[#allocation11 + $0x88] sm:$0xf0] }
 0x442   : > { %v4200_v31 = vor.u32 %v4432_v30, %v4199_v29 }
 0x444   : > { %2385 = vmatpush.bf16.msra.mxu2 %v4200_v31 }
 0x447   : > { %v1904_v44 = vpop.permute.xlu1 %1903 }
 0x448   : > { %1907 = vst.msk [vmem:[#allocation3] sm:$0xff] %vm1906_vm12, %v1904_v44  ;;  %2386 = vmatpush.bf16.msra.mxu2 %v4188_v36  ;;  %v4152_v44 = vor.u32 %v4420_v43, %v4151_v42 }
 0x44c   : > { %2387 = vmatpush.bf16.msra.mxu2 %v4176_v39 }
 0x44f   : > { %v1927_v55 = vpop.permute.xlu1 %1926 }
 0x450   : > { %1929 = vst.msk [vmem:[#allocation3 + $0x8] sm:$0xff] %vm1912_vm13, %v1927_v55  ;;  %2388 = vmatpush.bf16.msra.mxu2 %v4164_v41 }
 0x454   : > { %2389 = vmatpush.bf16.msra.mxu2 %v4152_v44 }
 0x457   : > { %v1910_v57 = vpop.permute.xlu1 %1909  ;;  %v1931_v58 = vld [vmem:[#allocation3 + $0x8] sm:$0xff] }
 0x458   : > { %1913 = vst.msk [vmem:[#allocation3] sm:$0xff] %vm1912_vm13, %v1910_v57  ;;  %v1933_v59 = vpack.c.bf16 %v1931_v58, %v1931_v58  ;;  %2390 = vmatpush.bf16.msra.mxu2 %v4140_v47 }
 0x45a   : > { %2153 = vmatmul.bf16.vlgmr.msra.gmra.mxu1 %v1933_v59  ;;  %2179 = vmatmul.bf16.vlgmr.msrb.gmra.mxu3 %v1933_v59 }
 0x45f   : > { %v1930_v61 = vld [vmem:[#allocation3] sm:$0xff] }
 0x460   : > { %v1932_v62 = vpack.c.bf16 %v1930_v61, %v1930_v61 }
 0x462   : > { %2140 = vmatmul.bf16.vlgmr.msra.gmra.mxu0 %v1932_v62  ;;  %2166 = vmatmul.bf16.vlgmr.msrb.gmra.mxu2 %v1932_v62 }
 0x46a   : > { %2378 = vmatmul.bf16.vlgmr.msrb.gmra.mxu1 %v5315_v1 }
 0x472   : > { %2365 = vmatmul.bf16.vlgmr.msrb.gmra.mxu0 %v5315_v1  ;;  %2391 = vmatmul.bf16.vlgmr.msra.gmra.mxu2 %v5315_v1 }
 0x4d7   : > { %v2154_v2 = vpop.f32.mrf.mxu1 }
 0x4dd   : > { %v2180_v5 = vpop.f32.mrf.mxu3 }
 0x4df   : > { %v2141_v7 = vpop.f32.mrf.mxu0  ;;  %v2156_v6 = vpop.f32.mrf.mxu1 }
 0x4e0   : > { %v2142_v8 = vadd.f32 %v2141_v7, %v1968_v3 }
 0x4e2   : > { %v2155_v33 = vadd.f32 %v2154_v2, %v2142_v8 }
 0x4e4   : > { %2184 = vst [vmem:[%s5331_s30] sm:$0xff] %v2155_v33 }
 0x4e5   : > { %v2167_v11 = vpop.f32.mrf.mxu2  ;;  %v2182_v12 = vpop.f32.mrf.mxu3 }
 0x4e6   : > { %v2168_v13 = vadd.f32 %v2167_v11, %v1969_v10 }
 0x4e7   : > { %v2143_v14 = vpop.f32.mrf.mxu0  ;;  %v2379_v15 = vpop.f32.mrf.mxu1 }
 0x4e8   : > { %v2181_v16 = vadd.f32 %v2180_v5, %v2168_v13  ;;  %v2380_v38 = vadd.f32 %v2379_v15, %v2224_v54 }
 0x4ea   : > { %2185 = vst [vmem:[%s5331_s30 + $0x8] sm:$0xff] %v2181_v16  ;;  %v2475_v37 = vpack.c.bf16 %v2380_v38, %v2380_v38 }
 0x4ec   : > { %v2533_v17 = vsel %vm2528_vm14, %v2475_v37, 0 }
 0x4ed   : > { %v2169_v18 = vpop.f32.mrf.mxu2  ;;  %2542 = vmatpush.bf16.xpose.msra.mxu3 %v2533_v17 }
 0x4ef   : > { %v2366_v19 = vpop.f32.mrf.mxu0  ;;  %v2381_v20 = vpop.f32.mrf.mxu1 }
 0x4f0   : > { %v2367_v22 = vadd.f32 %v2366_v19, %v2223_v45 }
 0x4f2   : > { %v4575_v23 = vpack.i.bf16 %v2367_v22, %v2380_v38  ;;  %v2433_v24 = vpack.c.bf16 %v2367_v22, %v2367_v22 }
 0x4f4   : > { %4576 = vrot.lane.b32.xlu1 %v4575_v23, %s4911_s14  ;;  %4571 = vrot.lane.b32.xlu0 %v4575_v23, %s4912_s15 }
 0x4f5   : > { %4566 = vrot.lane.b32.xlu2 %v4575_v23, %s4913_s26  ;;  %4225 = vmatmul.msk.bf16.vlgmr.msra.gmra.mxu3 %vm2528_vm14, %v2433_v24  ;;  %v2392_v47 = vpop.f32.mrf.mxu2 }
 0x4f7   : > { %v2368_v27 = vpop.f32.mrf.mxu0 }
 0x4fc   : > { %2451 = vrot.lane.b32.xlu1 %v2380_v38, %s4914_s17  ;;  %4586 = vrot.lane.b32.xlu0 %v4575_v23, %s4915_s19 }
 0x4fd   : > { %4581 = vrot.lane.b32.xlu2 %v4575_v23, %s4916_s28 }
 0x504   : > { %2466 = vrot.lane.b32.xlu1 %v2380_v38, %s4917_s18  ;;  %2409 = vrot.lane.b32.xlu0 %v2367_v22, %s4914_s17 }
 0x505   : > { %2469 = vrot.lane.b32.xlu2 %v2380_v38, %s4918_s20 }
 0x50c   : > { %2463 = vrot.lane.b32.xlu1 %v2380_v38, %s4919_s3  ;;  %2427 = vrot.lane.b32.xlu0 %v2367_v22, %s4918_s20 }
 0x50d   : > { %2472 = vrot.lane.b32.xlu2 %v2380_v38, %s4920_s16 }
 0x514   : > { %2421 = vrot.lane.b32.xlu1 %v2367_v22, %s4919_s3  ;;  %2430 = vrot.lane.b32.xlu0 %v2367_v22, %s4920_s16 }
 0x515   : > { %2424 = vrot.lane.b32.xlu2 %v2367_v22, %s4917_s18 }
 0x54f   : > { %v4567_v48 = vpop.permute.xlu2 %4566 }
 0x550   : > { %v4568_v51 = vunpack.i.l.bf16 %v4567_v48  ;;  %v4569_v57 = vunpack.i.h.bf16 %v4567_v48  ;;  %v2394_v48 = vpop.f32.mrf.mxu2 }
 0x552   : > { %v2476_v52 = vpack.c.bf16 %v4568_v51, %v4568_v51  ;;  %v2434_v61 = vpack.c.bf16 %v4569_v57, %v4569_v57  ;;  %v2225_v51 = vperm.slane %v5329_v9, 2 }
 0x554   : > { %v2552_v55 = vsel %vm2528_vm14, %v2476_v52, 0  ;;  %v5387_v52 = vadd.f32 %v2392_v47, %v2225_v51 }
 0x555   : > { %2561 = vmatpush.bf16.xpose.msrb.mxu3 %v2552_v55 }
 0x556   : > { %v2517_v55 = vpack.c.bf16 %v5387_v52, %v5387_v52 }
 0x557   : > { %v4582_v58 = vpop.permute.xlu2 %4581 }
 0x558   : > { %v4583_v59 = vunpack.i.l.bf16 %v4582_v58  ;;  %v4584_v2 = vunpack.i.h.bf16 %v4582_v58 }
 0x55a   : > { %v2479_v62 = vpack.c.bf16 %v4583_v59, %v4583_v59  ;;  %v2437_v56 = vpack.c.bf16 %v4584_v2, %v4584_v2  ;;  %v3039_v59 = vsel %vm1743_vm3, %v2517_v55, 0 }
 0x55c   : > { %4226 = vmatmul.msk.bf16.vlgmr.msrb.gmra.mxu3 %vm2528_vm14, %v2434_v61  ;;  %v2609_v0 = vsel %vm2528_vm14, %v2479_v62, 0 }
 0x55d   : > { %2618 = vmatpush.bf16.xpose.msrb.mxu2 %v2609_v0 }
 0x55f   : > { %v2470_v3 = vpop.permute.xlu2 %2469 }
 0x560   : > { %v2484_v8 = vpack.c.bf16 %v2470_v3, %v2470_v3 }
 0x562   : > { %v2704_v12 = vsel %vm2528_vm14, %v2484_v8, 0 }
 0x564   : > { %4229 = vmatmul.msk.bf16.vlgmr.msrb.gmra.mxu2 %vm2528_vm14, %v2437_v56 }
 0x566   : > { %v4577_v1 = vpop.permute.xlu1 %4576  ;;  %v4572_v5 = vpop.permute.xlu0 %4571 }
 0x567   : > { %v4578_v7 = vunpack.i.l.bf16 %v4577_v1  ;;  %v4573_v6 = vunpack.i.l.bf16 %v4572_v5  ;;  %v4579_v13 = vunpack.i.h.bf16 %v4577_v1  ;;  %v4574_v14 = vunpack.i.h.bf16 %v4572_v5  ;;  %v2473_v15 = vpop.permute.xlu2 %2472 }
 0x568   : > { %v2485_v45 = vpack.c.bf16 %v2473_v15, %v2473_v15 }
 0x569   : > { %v2480_v33 = vpack.c.bf16 %v4578_v7, %v4578_v7  ;;  %v2477_v10 = vpack.c.bf16 %v4573_v6, %v4573_v6  ;;  %v2438_v18 = vpack.c.bf16 %v4579_v13, %v4579_v13  ;;  %v2435_v19 = vpack.c.bf16 %v4574_v14, %v4574_v14 }
 0x56a   : > { %v2723_v24 = vsel %vm2528_vm14, %v2485_v45, 0 }
 0x56b   : > { %v2571_v54 = vsel %vm2528_vm14, %v2477_v10, 0  ;;  %v2628_v11 = vsel %vm2528_vm14, %v2480_v33, 0 }
 0x56c   : > { %2580 = vmatpush.bf16.xpose.msra.mxu0 %v2571_v54  ;;  %2637 = vmatpush.bf16.xpose.msra.mxu3 %v2628_v11 }
 0x56e   : > { %v2452_v16 = vpop.permute.xlu1 %2451  ;;  %v4587_v38 = vpop.permute.xlu0 %4586 }
 0x56f   : > { %v2478_v37 = vpack.c.bf16 %v2452_v16, %v2452_v16  ;;  %v4588_v17 = vunpack.i.l.bf16 %v4587_v38  ;;  %v2425_v31 = vpop.permute.xlu2 %2424  ;;  %v4589_v35 = vunpack.i.h.bf16 %v4587_v38 }
 0x570   : > { %v2441_v21 = vpack.c.bf16 %v2425_v31, %v2425_v31 }
 0x571   : > { %v2590_v20 = vsel %vm2528_vm14, %v2478_v37, 0  ;;  %v2481_v22 = vpack.c.bf16 %v4588_v17, %v4588_v17  ;;  %v2439_v40 = vpack.c.bf16 %v4589_v35, %v4589_v35 }
 0x572   : > { %2599 = vmatpush.bf16.xpose.msra.mxu1 %v2590_v20 }
 0x573   : > { %4227 = vmatmul.msk.bf16.vlgmr.msra.gmra.mxu0 %vm2528_vm14, %v2435_v19  ;;  %4230 = vmatmul.msk.bf16.vlgmr.msra.gmra.mxu3 %vm2528_vm14, %v2438_v18  ;;  %v2647_v23 = vsel %vm2528_vm14, %v2481_v22, 0 }
 0x574   : > { %2713 = vmatpush.bf16.xpose.msrb.mxu3 %v2704_v12  ;;  %2656 = vmatpush.bf16.xpose.msrb.mxu0 %v2647_v23 }
 0x576   : > { %v2467_v4 = vpop.permute.xlu1 %2466  ;;  %v2410_v25 = vpop.permute.xlu0 %2409 }
 0x577   : > { %v2483_v49 = vpack.c.bf16 %v2467_v4, %v2467_v4  ;;  %v2436_v53 = vpack.c.bf16 %v2410_v25, %v2410_v25 }
 0x578   : > { %v2544_v27 = vpop.f32.mrf.mxu3 }
 0x579   : > { %v2685_v28 = vsel %vm2528_vm14, %v2483_v49, 0  ;;  %v2738_v29 = vsel %vm5167_vm1, %v2544_v27, -10000.0  ;;  %4228 = vmatmul.msk.bf16.vlgmr.msra.gmra.mxu1 %vm2528_vm14, %v2436_v53 }
 0x57a   : > { %v2749_v30 = vadd.f32 %v2738_v29, %v5372_v26  ;;  %2694 = vmatpush.bf16.xpose.msra.mxu2 %v2685_v28 }
 0x57c   : > { %2732 = vmatpush.bf16.xpose.msra.mxu0 %v2723_v24  ;;  %v2760_v32 = vsel %vm1539_vm2, %v2749_v30, -inf }
 0x57d   : > { %2761 = vmax.xlane.f32.xlu1 %v2760_v32 }
 0x57e   : > { %v2464_v36 = vpop.permute.xlu1 %2463  ;;  %v2428_v63 = vpop.permute.xlu0 %2427 }
 0x57f   : > { %v2482_v39 = vpack.c.bf16 %v2464_v36, %v2464_v36  ;;  %v2442_v42 = vpack.c.bf16 %v2428_v63, %v2428_v63 }
 0x580   : > { %v2546_v34 = vpop.f32.mrf.mxu3 }
 0x581   : > { %v2666_v41 = vsel %vm2528_vm14, %v2482_v39, 0  ;;  %4233 = vmatmul.msk.bf16.vlgmr.msra.gmra.mxu2 %vm2528_vm14, %v2441_v21 }
 0x582   : > { %2675 = vmatpush.bf16.xpose.msrb.mxu1 %v2666_v41 }
 0x583   : > { %4231 = vmatmul.msk.bf16.vlgmr.msrb.gmra.mxu0 %vm2528_vm14, %v2439_v40  ;;  %4234 = vmatmul.msk.bf16.vlgmr.msrb.gmra.mxu3 %vm2528_vm14, %v2442_v42 }
 0x586   : > { %v2422_v43 = vpop.permute.xlu1 %2421  ;;  %v2431_v46 = vpop.permute.xlu0 %2430 }
 0x587   : > { %v2440_v44 = vpack.c.bf16 %v2422_v43, %v2422_v43  ;;  %v2443_v60 = vpack.c.bf16 %v2431_v46, %v2431_v46 }
 0x589   : > { %4232 = vmatmul.msk.bf16.vlgmr.msrb.gmra.mxu1 %vm2528_vm14, %v2440_v44 }
 0x58a   : > { %3048 = vmatpush.bf16.msra.mxu1 %v3039_v59 }
 0x593   : > { %4235 = vmatmul.msk.bf16.vlgmr.msra.gmra.mxu0 %vm2528_vm14, %v2443_v60 }
 0x5df   : > { %v2563_v57 = vpop.f32.mrf.mxu3 }
 0x5e0   : > { %v2739_v58 = vsel %vm5167_vm1, %v2563_v57, -10000.0 }
 0x5e1   : > { %v5395_v61 = vadd.f32 %v2739_v58, %v5372_v26 }
 0x5e3   : > { %v2763_v62 = vsel %vm1539_vm2, %v5395_v61, -inf }
 0x5e4   : > { %2764 = vmax.xlane.f32.xlu2 %v2763_v62 }
 0x5e7   : > { %v2565_v9 = vpop.f32.mrf.mxu3  ;;  %v2620_v0 = vpop.f32.mrf.mxu2 }
 0x5e8   : > { %v2742_v2 = vsel %vm5167_vm1, %v2620_v0, -10000.0 }
 0x5e9   : > { %v5402_v56 = vadd.f32 %v2742_v2, %v5372_v26 }
 0x5eb   : > { %v2772_v3 = vsel %vm1539_vm2, %v5402_v56, -inf }
 0x5ec   : > { %2773 = vmax.xlane.f32.xlu2 %v2772_v3 }
 0x5ef   : > { %v2622_v1 = vpop.f32.mrf.mxu2 }
 0x5f0   : > { %v2582_v5 = vpop.f32.mrf.mxu0  ;;  %v2762_v11 = vpop.xlane.xlu1 %2761 }
 0x5f1   : > { %v2740_v7 = vsel %vm5167_vm1, %v2582_v5, -10000.0  ;;  %v2793_v15 = vsub.f32 %v2749_v30, %v2762_v11 }
 0x5f2   : > { %v5409_v6 = vadd.f32 %v2740_v7, %v5372_v26 }
 0x5f3   : > { %v2804_v37 = vmul.f32 1.442695, %v2793_v15 }
 0x5f4   : > { %v2766_v8 = vsel %vm1539_vm2, %v5409_v6, -inf }
 0x5f5   : > { %2767 = vmax.xlane.f32.xlu0 %v2766_v8  ;;  %4623 = vpow2.f32 %v2804_v37 }
 0x5f6   : > { %v2601_v33 = vpop.f32.mrf.mxu1  ;;  %v2639_v10 = vpop.f32.mrf.mxu3 }
 0x5f7   : > { %v2741_v54 = vsel %vm5167_vm1, %v2601_v33, -10000.0  ;;  %v2743_v27 = vsel %vm5167_vm1, %v2639_v10, -10000.0 }
 0x5f8   : > { %v5416_v12 = vadd.f32 %v2741_v54, %v5372_v26  ;;  %v2584_v13 = vpop.f32.mrf.mxu0  ;;  %v5443_v31 = vadd.f32 %v2743_v27, %v5372_v26 }
 0x5fa   : > { %v2769_v14 = vsel %vm1539_vm2, %v5416_v12, -inf  ;;  %v2775_v34 = vsel %vm1539_vm2, %v5443_v31, -inf }
 0x5fb   : > { %2770 = vmax.xlane.f32.xlu1 %v2769_v14  ;;  %v5432_v49 = vpop.eup %4623 }
 0x5fc   : > { %v2826_v29 = vsel %vm1539_vm2, %v5432_v49, 0.0 }
 0x5fe   : > { %v2603_v16 = vpop.f32.mrf.mxu1  ;;  %v2641_v38 = vpop.f32.mrf.mxu3 }
 0x600   : > { %v2658_v17 = vpop.f32.mrf.mxu0 }
 0x601   : > { %v2744_v45 = vsel %vm5167_vm1, %v2658_v17, -10000.0 }
 0x602   : > { %v5423_v18 = vadd.f32 %v2744_v45, %v5372_v26 }
 0x604   : > { %v2696_v19 = vpop.f32.mrf.mxu2  ;;  %v2778_v20 = vsel %vm1539_vm2, %v5423_v18, -inf }
 0x605   : > { %2779 = vmax.xlane.f32.xlu0 %v2778_v20  ;;  %v2746_v30 = vsel %vm5167_vm1, %v2696_v19, -10000.0 }
 0x606   : > { %v2677_v22 = vpop.f32.mrf.mxu1  ;;  %v2715_v23 = vpop.f32.mrf.mxu3  ;;  %v5446_v36 = vadd.f32 %v2746_v30, %v5372_v26 }
 0x607   : > { %v2745_v24 = vsel %vm5167_vm1, %v2677_v22, -10000.0  ;;  %v2747_v42 = vsel %vm5167_vm1, %v2715_v23, -10000.0 }
 0x608   : > { %v5430_v4 = vadd.f32 %v2745_v24, %v5372_v26  ;;  %v2660_v25 = vpop.f32.mrf.mxu0  ;;  %v2784_v41 = vsel %vm1539_vm2, %v5446_v36, -inf  ;;  %v5462_v43 = vadd.f32 %v2747_v42, %v5372_v26 }
 0x60a   : > { %v2781_v53 = vsel %vm1539_vm2, %v5430_v4, -inf  ;;  %v2787_v46 = vsel %vm1539_vm2, %v5462_v43, -inf }
 0x60b   : > { %2782 = vmax.xlane.f32.xlu2 %v2781_v53 }
 0x60c   : > { %v2698_v28 = vpop.f32.mrf.mxu2 }
 0x60d   : > { %2827 = vadd.xlane.f32.xlu0 %v2826_v29 }
 0x60e   : > { %v2679_v32 = vpop.f32.mrf.mxu1  ;;  %v2717_v35 = vpop.f32.mrf.mxu3 }
 0x610   : > { %v2734_v63 = vpop.f32.mrf.mxu0 }
 0x611   : > { %v2748_v21 = vsel %vm5167_vm1, %v2734_v63, -10000.0 }
 0x612   : > { %v5451_v39 = vadd.f32 %v2748_v21, %v5372_v26 }
 0x613   : > { %2776 = vmax.xlane.f32.xlu2 %v2775_v34 }
 0x614   : > { %v2790_v40 = vsel %vm1539_vm2, %v5451_v39, -inf }
 0x615   : > { %2791 = vmax.xlane.f32.xlu1 %v2790_v40  ;;  %2785 = vmax.xlane.f32.xlu0 %v2784_v41 }
 0x618   : > { %v2736_v44 = vpop.f32.mrf.mxu0 }
 0x61d   : > { %2788 = vmax.xlane.f32.xlu0 %v2787_v46 }
 0x631   : > { %2490 = vrot.lane.b32.xlu0 %v5387_v52, %s4912_s15  ;;  %s4925_s15 = smov 24  }
 0x639   : > { %2499 = vrot.lane.b32.xlu0 %v5387_v52, %s4911_s14  ;;  %s4924_s14 = smov 30  }
 0x641   : > { %2502 = vrot.lane.b32.xlu0 %v5387_v52, %s4915_s19  ;;  %s4928_s19 = smov 48  }
 0x649   : > { %2493 = vrot.lane.b32.xlu0 %v5387_v52, %s4914_s17  ;;  %s4927_s17 = smov 54  }
 0x651   : > { %2496 = vrot.lane.b32.xlu0 %v5387_v52, %s4916_s28  ;;  %s4929_s28 = smov 42  }
 0x657   : > { %v2765_v50 = vpop.xlane.xlu2 %2764 }
 0x658   : > { %v2794_v26 = vsub.f32 %v5395_v61, %v2765_v50 }
 0x659   : > { %2511 = vrot.lane.b32.xlu0 %v5387_v52, %s4918_s20  ;;  %s4447_s20 = sshll.u32 %s5017_s25, 4 }
 0x65a   : > { %v2806_v60 = vmul.f32 1.442695, %v2794_v26  ;;  %s3407_s23 = scalar_lea.hbm %s5646_s11, %s4447_s20 }
 0x65b   : > { %s3411_s9 = sshll.u32 %s3407_s23, 4  ;;  %s3412_s9 = int_to_ptr.hbm [resolvable:$true] %s3411_s9 }
 0x65c   : > { %4625 = vpow2.f32 %v2806_v60 }
 0x65f   : > { %v2774_v0 = vpop.xlane.xlu2 %2773 }
 0x660   : > { %v2797_v35 = vsub.f32 %v5402_v56, %v2774_v0 }
 0x661   : > { %2505 = vrot.lane.b32.xlu0 %v5387_v52, %s4919_s3 }
 0x662   : > { %v5481_v47 = vpop.eup %4625  ;;  %v2812_v34 = vmul.f32 1.442695, %v2797_v35 }
 0x663   : > { %v2829_v48 = vsel %vm1539_vm2, %v5481_v47, 0.0 }
 0x664   : > { %2830 = vadd.xlane.f32.xlu1 %v2829_v48 }
 0x668   : > { %v2768_v51 = vpop.xlane.xlu0 %2767 }
 0x669   : > { %v2795_v55 = vsub.f32 %v5409_v6, %v2768_v51 }
 0x66b   : > { %v2808_v57 = vmul.f32 1.442695, %v2795_v55 }
 0x66d   : > { %4627 = vpow2.f32 %v2808_v57 }
 0x66e   : > { %v2771_v58 = vpop.xlane.xlu1 %2770 }
 0x66f   : > { %v2796_v59 = vsub.f32 %v5416_v12, %v2771_v58 }
 0x671   : > { %v2810_v61 = vmul.f32 1.442695, %v2796_v59 }
 0x673   : > { %v5487_v62 = vpop.eup %4627  ;;  %4629 = vpow2.f32 %v2810_v61 }
 0x674   : > { %v2832_v9 = vsel %vm1539_vm2, %v5487_v62, 0.0 }
 0x675   : > { %2833 = vadd.xlane.f32.xlu2 %v2832_v9 }
 0x678   : > { %v2780_v2 = vpop.xlane.xlu0 %2779 }
 0x679   : > { %v5491_v3 = vpop.eup %4629  ;;  %v2799_v1 = vsub.f32 %v5423_v18, %v2780_v2 }
 0x67a   : > { %v2835_v7 = vsel %vm1539_vm2, %v5491_v3, 0.0 }
 0x67b   : > { %v2816_v5 = vmul.f32 1.442695, %v2799_v1 }
 0x67d   : > { %4631 = vpow2.f32 %v2816_v5  ;;  %2487 = vrot.lane.b32.xlu1 %v5387_v52, %s4913_s26  ;;  %2836 = vadd.xlane.f32.xlu2 %v2835_v7  ;;  %s4926_s26 = smov 6  }
 0x67e   : > { %v2783_v6 = vpop.xlane.xlu2 %2782 }
 0x67f   : > { %v2800_v8 = vsub.f32 %v5430_v4, %v2783_v6 }
 0x680   : > { %v2828_v33 = vpop.xlane.xlu0 %2827 }
 0x681   : > { %v2818_v10 = vmul.f32 1.442695, %v2800_v8  ;;  %4633 = vrcp.f32 %v2828_v33  ;;  %v2870_v45 = vand.u32 2147483648, %v2828_v33  ;;  %v2868_v20 = vand.u32 2147483647, %v2828_v33 }
 0x682   : > { %vm2864_vm15 = vweird.f32 %v2828_v33 }
 0x683   : > { %v5499_v54 = vpop.eup %4631  ;;  %4635 = vpow2.f32 %v2818_v10  ;;  %v2871_v24 = vor.u32 1.1754944e-38, %v2870_v45  ;;  %vm2869_vm5 = vcmp.eq.f32.partialorder %v2868_v20, 8.507059e+37 }
 0x684   : > { %v2844_v11 = vsel %vm1539_vm2, %v5499_v54, 0.0 }
 0x685   : > { %2845 = vadd.xlane.f32.xlu2 %v2844_v11 }
 0x686   : > { %v2777_v12 = vpop.xlane.xlu2 %2776 }
 0x687   : > { %v4634_v13 = vpop.eup %4633  ;;  %v2798_v14 = vsub.f32 %v5443_v31, %v2777_v12 }
 0x688   : > { %v2860_v15 = vmul.f32 %v4634_v13, %v2828_v33  ;;  %v2786_v16 = vpop.xlane.xlu0 %2785  ;;  %vm2865_vm1 = vweird.f32 %v4634_v13  ;;  %v2792_v53 = vpop.xlane.xlu1 %2791 }
 0x689   : > { %v5504_v38 = vpop.eup %4635  ;;  %v2814_v37 = vmul.f32 1.442695, %v2798_v14  ;;  %v2801_v18 = vsub.f32 %v5446_v36, %v2786_v16  ;;  %vm2866_vm4 = vmor %vm2864_vm15, %vm2865_vm1  ;;  %v2803_v30 = vsub.f32 %v5451_v39, %v2792_v53 }
 0x68a   : > { %v2861_v17 = vsub.f32 1.0, %v2860_v15  ;;  %v2847_v22 = vsel %vm1539_vm2, %v5504_v38, 0.0 }
 0x68b   : > { %4637 = vpow2.f32 %v2814_v37  ;;  %v2820_v4 = vmul.f32 1.442695, %v2801_v18  ;;  %v2824_v36 = vmul.f32 1.442695, %v2803_v30 }
 0x68c   : > { %v2862_v19 = vmul.f32 %v4634_v13, %v2861_v17 }
 0x68d   : > { %2848 = vadd.xlane.f32.xlu2 %v2847_v22  ;;  %4639 = vpow2.f32 %v2820_v4 }
 0x68e   : > { %v2863_v23 = vadd.f32 %v4634_v13, %v2862_v19  ;;  %4641 = vpow2.f32 %v2824_v36 }
 0x68f   : > { %4643 = vpow2.f32 %v2812_v34 }
 0x690   : > { %v2867_v25 = vsel %vm2866_vm4, %v4634_v13, %v2863_v23  ;;  %v2789_v63 = vpop.xlane.xlu0 %2788 }
 0x691   : > { %v5509_v27 = vpop.eup %4637  ;;  %v2872_v28 = vsel %vm2869_vm5, %v2871_v24, %v2867_v25 }
 0x692   : > { %v2873_v29 = vmul.f32 %v5432_v49, %v2872_v28  ;;  %v2841_v32 = vsel %vm1539_vm2, %v5509_v27, 0.0  ;;  %v2802_v49 = vsub.f32 %v5462_v43, %v2789_v63 }
 0x693   : > { %v5517_v21 = vpop.eup %4639 }
 0x694   : > { %v3024_v31 = vpack.c.bf16 %v2873_v29, %v2873_v29  ;;  %v2850_v39 = vsel %vm1539_vm2, %v5517_v21, 0.0  ;;  %v2822_v40 = vmul.f32 1.442695, %v2802_v49  ;;  %v5522_v41 = vpop.eup %4641 }
 0x695   : > { %2842 = vadd.xlane.f32.xlu2 %v2841_v32  ;;  %v5524_v56 = vpop.eup %4643  ;;  %v2856_v46 = vsel %vm1539_vm2, %v5522_v41, 0.0 }
 0x696   : > { %4236 = vmatmul.msk.bf16.vlgmr.msra.gmra.mxu1 %vm1539_vm2, %v3024_v31  ;;  %4645 = vpow2.f32 %v2822_v40  ;;  %v2838_v43 = vsel %vm1539_vm2, %v5524_v56, 0.0 }
 0x69c   : > { %v5531_v26 = vpop.eup %4645 }
 0x69d   : > { %2851 = vadd.xlane.f32.xlu2 %v2850_v39  ;;  %v2853_v48 = vsel %vm1539_vm2, %v5531_v26, 0.0 }
 0x6a3   : > { %v2491_v42 = vpop.permute.xlu0 %2490 }
 0x6a4   : > { %v2519_v44 = vpack.c.bf16 %v2491_v42, %v2491_v42 }
 0x6a5   : > { %2857 = vadd.xlane.f32.xlu2 %v2856_v46 }
 0x6a6   : > { %v3077_v50 = vsel %vm1743_vm3, %v2519_v44, 0 }
 0x6a7   : > { %2839 = vadd.xlane.f32.xlu1 %v2838_v43  ;;  %3086 = vmatpush.bf16.msra.mxu3 %v3077_v50 }
 0x6ab   : > { %v2500_v60 = vpop.permute.xlu0 %2499 }
 0x6ac   : > { %v2522_v18 = vpack.c.bf16 %v2500_v60, %v2500_v60 }
 0x6ad   : > { %2854 = vadd.xlane.f32.xlu2 %v2853_v48 }
 0x6ae   : > { %v3134_v28 = vsel %vm1743_vm3, %v2522_v18, 0 }
 0x6b3   : > { %v2503_v51 = vpop.permute.xlu0 %2502 }
 0x6b4   : > { %v2523_v55 = vpack.c.bf16 %v2503_v51, %v2503_v51 }
 0x6b6   : > { %v3153_v57 = vsel %vm1743_vm3, %v2523_v55, 0 }
 0x6b7   : > { %3162 = vmatpush.bf16.msrb.mxu3 %v3153_v57 }
 0x6bb   : > { %v2494_v58 = vpop.permute.xlu0 %2493 }
 0x6bc   : > { %v2520_v59 = vpack.c.bf16 %v2494_v58, %v2494_v58 }
 0x6be   : > { %v3096_v61 = vsel %vm1743_vm3, %v2520_v59, 0 }
 0x6bf   : > { %3105 = vmatpush.bf16.msrb.mxu0 %v3096_v61 }
 0x6c0   : > { %2508 = vrot.lane.b32.xlu1 %v5387_v52, %s4917_s18  ;;  %s4930_s18 = smov 60  }
 0x6c3   : > { %v2497_v9 = vpop.permute.xlu0 %2496 }
 0x6c4   : > { %v2521_v0 = vpack.c.bf16 %v2497_v9, %v2497_v9 }
 0x6c5   : > { %2514 = vrot.lane.b32.xlu2 %v5387_v52, %s4920_s16 }
 0x6c6   : > { %v3115_v2 = vsel %vm1743_vm3, %v2521_v0, 0 }
 0x6c7   : > { %3124 = vmatpush.bf16.msrb.mxu1 %v3115_v2 }
 0x6cb   : > { %v2512_v1 = vpop.permute.xlu0 %2511 }
 0x6cc   : > { %v2526_v4 = vpack.c.bf16 %v2512_v1, %v2512_v1 }
 0x6ce   : > { %v3210_v35 = vsel %vm1743_vm3, %v2526_v4, 0 }
 0x6d3   : > { %v2506_v5 = vpop.permute.xlu0 %2505 }
 0x6d4   : > { %v2524_v7 = vpack.c.bf16 %v2506_v5, %v2506_v5 }
 0x6d6   : > { %v3172_v6 = vsel %vm1743_vm3, %v2524_v7, 0 }
 0x6d7   : > { %v2831_v8 = vpop.xlane.xlu1 %2830  ;;  %3181 = vmatpush.bf16.msra.mxu0 %v3172_v6 }
 0x6d8   : > { %4647 = vrcp.f32 %v2831_v8  ;;  %v2885_v14 = vand.u32 2147483648, %v2831_v8  ;;  %vm2879_vm7 = vweird.f32 %v2831_v8  ;;  %v2883_v52 = vand.u32 2147483647, %v2831_v8 }
 0x6da   : > { %v2886_v37 = vor.u32 1.1754944e-38, %v2885_v14  ;;  %vm2884_vm9 = vcmp.eq.f32.partialorder %v2883_v52, 8.507059e+37 }
 0x6de   : > { %v4648_v33 = vpop.eup %4647 }
 0x6df   : > { %v2875_v10 = vmul.f32 %v4648_v33, %v2831_v8  ;;  %vm2880_vm6 = vweird.f32 %v4648_v33 }
 0x6e0   : > { %vm2881_vm8 = vmor %vm2879_vm7, %vm2880_vm6 }
 0x6e1   : > { %v2876_v11 = vsub.f32 1.0, %v2875_v10 }
 0x6e3   : > { %v2877_v12 = vmul.f32 %v4648_v33, %v2876_v11 }
 0x6e5   : > { %v2878_v13 = vadd.f32 %v4648_v33, %v2877_v12 }
 0x6e7   : > { %v2882_v16 = vsel %vm2881_vm8, %v4648_v33, %v2878_v13 }
 0x6e8   : > { %v2834_v15 = vpop.xlane.xlu2 %2833  ;;  %v2887_v17 = vsel %vm2884_vm9, %v2886_v37, %v2882_v16 }
 0x6e9   : > { %4649 = vrcp.f32 %v2834_v15  ;;  %v2888_v20 = vmul.f32 %v5481_v47, %v2887_v17  ;;  %v2900_v29 = vand.u32 2147483648, %v2834_v15  ;;  %v2898_v31 = vand.u32 2147483647, %v2834_v15 }
 0x6ea   : > { %vm2894_vm11 = vweird.f32 %v2834_v15 }
 0x6eb   : > { %v3025_v32 = vpack.c.bf16 %v2888_v20, %v2888_v20  ;;  %v2901_v63 = vor.u32 1.1754944e-38, %v2900_v29  ;;  %vm2899_vm12 = vcmp.eq.f32.partialorder %v2898_v31, 8.507059e+37 }
 0x6ef   : > { %v4650_v45 = vpop.eup %4649  ;;  %v2488_v19 = vpop.permute.xlu1 %2487 }
 0x6f0   : > { %v2890_v22 = vmul.f32 %v4650_v45, %v2834_v15  ;;  %v2518_v23 = vpack.c.bf16 %v2488_v19, %v2488_v19  ;;  %v2837_v24 = vpop.xlane.xlu2 %2836  ;;  %vm2895_vm10 = vweird.f32 %v4650_v45 }
 0x6f1   : > { %4651 = vrcp.f32 %v2837_v24  ;;  %vm2896_vm0 = vmor %vm2894_vm11, %vm2895_vm10  ;;  %v2915_v46 = vand.u32 2147483648, %v2837_v24  ;;  %v2913_v60 = vand.u32 2147483647, %v2837_v24  ;;  %vm2909_vm1 = vweird.f32 %v2837_v24 }
 0x6f2   : > { %v2891_v25 = vsub.f32 1.0, %v2890_v22  ;;  %v3058_v53 = vsel %vm1743_vm3, %v2518_v23, 0 }
 0x6f3   : > { %3067 = vmatpush.bf16.msrb.mxu2 %v3058_v53  ;;  %v2916_v55 = vor.u32 1.1754944e-38, %v2915_v46  ;;  %vm2914_vm4 = vcmp.eq.f32.partialorder %v2913_v60, 8.507059e+37 }
 0x6f4   : > { %v2892_v30 = vmul.f32 %v4650_v45, %v2891_v25 }
 0x6f6   : > { %v2893_v47 = vadd.f32 %v4650_v45, %v2892_v30  ;;  %4237 = vmatmul.msk.bf16.vlgmr.msrb.gmra.mxu2 %vm1539_vm2, %v3025_v32 }
 0x6f7   : > { %3143 = vmatpush.bf16.msra.mxu2 %v3134_v28  ;;  %v4652_v36 = vpop.eup %4651 }
 0x6f8   : > { %v2897_v34 = vsel %vm2896_vm0, %v4650_v45, %v2893_v47  ;;  %v2905_v49 = vmul.f32 %v4652_v36, %v2837_v24  ;;  %v2846_v39 = vpop.xlane.xlu2 %2845  ;;  %vm2910_vm13 = vweird.f32 %v4652_v36 }
 0x6f9   : > { %v2902_v40 = vsel %vm2899_vm12, %v2901_v63, %v2897_v34  ;;  %4653 = vrcp.f32 %v2846_v39  ;;  %vm2911_vm15 = vmor %vm2909_vm1, %vm2910_vm13  ;;  %v2960_v0 = vand.u32 2147483648, %v2846_v39  ;;  %v2958_v1 = vand.u32 2147483647, %v2846_v39 }
 0x6fa   : > { %v2903_v42 = vmul.f32 %v5487_v62, %v2902_v40  ;;  %v2906_v44 = vsub.f32 1.0, %v2905_v49  ;;  %vm2954_vm6 = vweird.f32 %v2846_v39 }
 0x6fb   : > { %3219 = vmatpush.bf16.msrb.mxu2 %v3210_v35  ;;  %v2961_v8 = vor.u32 1.1754944e-38, %v2960_v0  ;;  %vm2959_vm8 = vcmp.eq.f32.partialorder %v2958_v1, 8.507059e+37 }
 0x6fc   : > { %v3026_v50 = vpack.c.bf16 %v2903_v42, %v2903_v42  ;;  %v2907_v43 = vmul.f32 %v4652_v36, %v2906_v44 }
 0x6fe   : > { %v2908_v48 = vadd.f32 %v4652_v36, %v2907_v43  ;;  %4238 = vmatmul.msk.bf16.vlgmr.msra.gmra.mxu3 %vm1539_vm2, %v3026_v50 }
 0x6ff   : > { %v4654_v51 = vpop.eup %4653 }
 0x700   : > { %v2912_v57 = vsel %vm2911_vm15, %v4652_v36, %v2908_v48  ;;  %v2950_v58 = vmul.f32 %v4654_v51, %v2846_v39  ;;  %v2849_v59 = vpop.xlane.xlu2 %2848  ;;  %vm2955_vm5 = vweird.f32 %v4654_v51 }
 0x701   : > { %v2917_v61 = vsel %vm2914_vm4, %v2916_v55, %v2912_v57  ;;  %4655 = vrcp.f32 %v2849_v59  ;;  %vm2956_vm7 = vmor %vm2954_vm6, %vm2955_vm5  ;;  %v2975_v14 = vand.u32 2147483648, %v2849_v59  ;;  %v2973_v16 = vand.u32 2147483647, %v2849_v59 }
 0x702   : > { %v2918_v62 = vmul.f32 %v5491_v3, %v2917_v61  ;;  %v2951_v9 = vsub.f32 1.0, %v2950_v58  ;;  %vm2969_vm10 = vweird.f32 %v2849_v59 }
 0x703   : > { %v2976_v45 = vor.u32 1.1754944e-38, %v2975_v14  ;;  %vm2974_vm0 = vcmp.eq.f32.partialorder %v2973_v16, 8.507059e+37 }
 0x704   : > { %v2952_v2 = vmul.f32 %v4654_v51, %v2951_v9  ;;  %v3027_v5 = vpack.c.bf16 %v2918_v62, %v2918_v62 }
 0x706   : > { %v2953_v7 = vadd.f32 %v4654_v51, %v2952_v2  ;;  %4239 = vmatmul.msk.bf16.vlgmr.msrb.gmra.mxu0 %vm1539_vm2, %v3027_v5 }
 0x707   : > { %v4656_v6 = vpop.eup %4655 }
 0x708   : > { %v2957_v33 = vsel %vm2956_vm7, %v4654_v51, %v2953_v7  ;;  %v2965_v10 = vmul.f32 %v4656_v6, %v2849_v59  ;;  %v2843_v11 = vpop.xlane.xlu2 %2842  ;;  %vm2970_vm9 = vweird.f32 %v4656_v6 }
 0x709   : > { %v2962_v12 = vsel %vm2959_vm8, %v2961_v8, %v2957_v33  ;;  %4657 = vrcp.f32 %v2843_v11  ;;  %vm2971_vm11 = vmor %vm2969_vm10, %vm2970_vm9  ;;  %v2945_v24 = vand.u32 2147483648, %v2843_v11  ;;  %v2943_v28 = vand.u32 2147483647, %v2843_v11 }
 0x70a   : > { %v2963_v3 = vmul.f32 %v5499_v54, %v2962_v12  ;;  %v2966_v13 = vsub.f32 1.0, %v2965_v10  ;;  %vm2939_vm13 = vweird.f32 %v2843_v11 }
 0x70b   : > { %v2946_v30 = vor.u32 1.1754944e-38, %v2945_v24  ;;  %vm2944_vm15 = vcmp.eq.f32.partialorder %v2943_v28, 8.507059e+37 }
 0x70c   : > { %v3030_v52 = vpack.c.bf16 %v2963_v3, %v2963_v3  ;;  %v2967_v15 = vmul.f32 %v4656_v6, %v2966_v13 }
 0x70e   : > { %v2968_v37 = vadd.f32 %v4656_v6, %v2967_v15  ;;  %4242 = vmatmul.msk.bf16.vlgmr.msrb.gmra.mxu3 %vm1539_vm2, %v3030_v52 }
 0x70f   : > { %v4658_v17 = vpop.eup %4657 }
 0x710   : > { %v2972_v18 = vsel %vm2971_vm11, %v4656_v6, %v2968_v37  ;;  %v2935_v19 = vmul.f32 %v4658_v17, %v2843_v11  ;;  %v5554_v20 = vpop.xlane.xlu2 %2851  ;;  %vm2940_vm12 = vweird.f32 %v4658_v17 }
 0x711   : > { %v2977_v22 = vsel %vm2974_vm0, %v2976_v45, %v2972_v18  ;;  %vm2941_vm1 = vmor %vm2939_vm13, %vm2940_vm12  ;;  %4659 = vrcp.f32 %v5554_v20 }
 0x712   : > { %v2978_v54 = vmul.f32 %v5504_v38, %v2977_v22  ;;  %v2936_v23 = vsub.f32 1.0, %v2935_v19  ;;  %v2988_v22 = vand.u32 2147483647, %v5554_v20 }
 0x713   : > { %v3050_v4 = vpop.f32.mrf.mxu1 }
 0x714   : > { %v3031_v25 = vpack.c.bf16 %v2978_v54, %v2978_v54  ;;  %v2937_v53 = vmul.f32 %v4658_v17, %v2936_v23  ;;  %3245 = vst.msk [vmem:[#allocation5] sm:$0xff] %vm2528_vm14, %v3050_v4 }
 0x716   : > { %v2938_v29 = vadd.f32 %v4658_v17, %v2937_v53  ;;  %4243 = vmatmul.msk.bf16.vlgmr.msra.gmra.mxu0 %vm1539_vm2, %v3031_v25 }
 0x717   : > { %v5561_v34 = vpop.eup %4659 }
 0x718   : > { %v2942_v31 = vsel %vm2941_vm1, %v4658_v17, %v2938_v29  ;;  %v2858_v38 = vpop.xlane.xlu2 %2857  ;;  %v2980_v44 = vmul.f32 %v5561_v34, %v5554_v20  ;;  %vm2985_vm13 = vweird.f32 %v5561_v34 }
 0x719   : > { %v2947_v32 = vsel %vm2944_vm15, %v2946_v30, %v2942_v31  ;;  %4661 = vrcp.f32 %v2858_v38  ;;  %v3018_v43 = vand.u32 2147483647, %v2858_v38  ;;  %vm3014_vm4 = vweird.f32 %v2858_v38 }
 0x71a   : > { %v2948_v35 = vmul.f32 %v5509_v27, %v2947_v32  ;;  %v2840_v47 = vpop.xlane.xlu1 %2839  ;;  %v3020_v27 = vand.u32 2147483648, %v2858_v38  ;;  %v2981_v51 = vsub.f32 1.0, %v2980_v44  ;;  %vm2984_vm15 = vweird.f32 %v5554_v20 }
 0x71b   : > { %4663 = vrcp.f32 %v2840_v47  ;;  %v3052_v36 = vpop.f32.mrf.mxu1  ;;  %v2930_v55 = vand.u32 2147483648, %v2840_v47  ;;  %v2928_v59 = vand.u32 2147483647, %v2840_v47  ;;  %vm3019_vm7 = vcmp.eq.f32.partialorder %v3018_v43, 8.507059e+37 }
 0x71c   : > { %v3029_v63 = vpack.c.bf16 %v2948_v35, %v2948_v35  ;;  %v3021_v62 = vor.u32 1.1754944e-38, %v3020_v27  ;;  %vm2924_vm8 = vweird.f32 %v2840_v47  ;;  %v2982_v5 = vmul.f32 %v5561_v34, %v2981_v51  ;;  %v4445_v51 = vld [vmem:[#allocation12 + $0x30] sm:$0xff] }
 0x71d   : > { %v2931_v6 = vor.u32 1.1754944e-38, %v2930_v55  ;;  %vm2929_vm10 = vcmp.eq.f32.partialorder %v2928_v59, 8.507059e+37  ;;  %v4444_v55 = vld [vmem:[#allocation12 + $0x28] sm:$0xff]  ;;  %v4441_v59 = vld [vmem:[#allocation12 + $0x10] sm:$0xff] }
 0x71e   : > { %4241 = vmatmul.msk.bf16.vlgmr.msra.gmra.mxu2 %vm1539_vm2, %v3029_v63 }
 0x71f   : > { %v4662_v49 = vpop.eup %4661 }
 0x720   : > { %v3010_v39 = vmul.f32 %v4662_v49, %v2858_v38  ;;  %v2855_v40 = vpop.xlane.xlu2 %2854  ;;  %vm3015_vm14 = vweird.f32 %v4662_v49 }
 0x721   : > { %v4664_v42 = vpop.eup %4663  ;;  %4665 = vrcp.f32 %v2855_v40  ;;  %vm3016_vm6 = vmor %vm3014_vm4, %vm3015_vm14  ;;  %v3003_v3 = vand.u32 2147483647, %v2855_v40  ;;  %v3005_v13 = vand.u32 2147483648, %v2855_v40  ;;  %vm2999_vm0 = vweird.f32 %v2855_v40 }
 0x722   : > { %v3011_v46 = vsub.f32 1.0, %v3010_v39  ;;  %v2920_v50 = vmul.f32 %v4664_v42, %v2840_v47  ;;  %vm2925_vm5 = vweird.f32 %v4664_v42  ;;  %vm2986_vm14 = vmor %vm2984_vm15, %vm2985_vm13  ;;  %vm2989_vm4 = vcmp.eq.f32.partialorder %v2988_v22, 8.507059e+37 }
 0x723   : > { %vm2926_vm9 = vmor %vm2924_vm8, %vm2925_vm5  ;;  %v3006_v45 = vor.u32 1.1754944e-38, %v3005_v13  ;;  %vm3004_vm1 = vcmp.eq.f32.partialorder %v3003_v3, 8.507059e+37  ;;  %vm3262_vm5 = vcmask 195728   ;;  %vm3280_vm8 = vcmask 343328  }
 0x724   : > { %v3012_v60 = vmul.f32 %v4662_v49, %v3011_v46  ;;  %v2921_v48 = vsub.f32 1.0, %v2920_v50 }
 0x726   : > { %v3013_v57 = vadd.f32 %v4662_v49, %v3012_v60  ;;  %v2922_v58 = vmul.f32 %v4664_v42, %v2921_v48  ;;  %v4446_v48 = vld [vmem:[#allocation12 + $0x38] sm:$0xff] }
 0x727   : > { %v4666_v61 = vpop.eup %4665  ;;  %3376 = vmatpush.bf16.msrb.mxu0 %v4446_v48 }
 0x728   : > { %v3017_v9 = vsel %vm3016_vm6, %v4662_v49, %v3013_v57  ;;  %v2923_v0 = vadd.f32 %v4664_v42, %v2922_v58  ;;  %v2995_v2 = vmul.f32 %v4666_v61, %v2855_v40  ;;  %v2515_v1 = vpop.permute.xlu2 %2514  ;;  %vm3000_vm11 = vweird.f32 %v4666_v61  ;;  %v4443_v57 = vld [vmem:[#allocation12 + $0x20] sm:$0xff]  ;;  %v4442_v58 = vld [vmem:[#allocation12 + $0x18] sm:$0xff] }
 0x729   : > { %v3022_v7 = vsel %vm3019_vm7, %v3021_v62, %v3017_v9  ;;  %v2527_v8 = vpack.c.bf16 %v2515_v1, %v2515_v1  ;;  %vm3001_vm12 = vmor %vm2999_vm0, %vm3000_vm11  ;;  %v4440_v62 = vld [vmem:[#allocation12 + $0x8] sm:$0xff]  ;;  %v4439_v9 = vld [vmem:[#allocation12] sm:$0xff]  ;;  %vm3268_vm6 = vcmask 244928   ;;  %vm3274_vm7 = vcmask 294128  }
 0x72a   : > { %v3023_v33 = vmul.f32 %v5522_v41, %v3022_v7  ;;  %v2927_v10 = vsel %vm2926_vm9, %v4664_v42, %v2923_v0  ;;  %v2996_v11 = vsub.f32 1.0, %v2995_v2  ;;  %v2983_v41 = vadd.f32 %v5561_v34, %v2982_v5 }
 0x72b   : > { %v2932_v12 = vsel %vm2929_vm10, %v2931_v6, %v2927_v10  ;;  %v3229_v14 = vsel %vm1743_vm3, %v2527_v8, 0  ;;  %3377 = vmatpush.bf16.msrb.mxu0 %v4445_v51  ;;  %vm3286_vm9 = vcmask 392528   ;;  %vm3292_vm10 = vcmask 441728  }
 0x72c   : > { %v3034_v52 = vpack.c.bf16 %v3023_v33, %v3023_v33  ;;  %v2933_v15 = vmul.f32 %v5524_v56, %v2932_v12  ;;  %v2997_v16 = vmul.f32 %v4666_v61, %v2996_v11  ;;  %3238 = vmatpush.bf16.msra.mxu3 %v3229_v14  ;;  %v2990_v56 = vand.u32 2147483648, %v5554_v20 }
 0x72d   : > { %v2987_v4 = vsel %vm2986_vm14, %v5561_v34, %v2983_v41  ;;  %vm3298_vm11 = vcmask 490928   ;;  %vm3304_vm0 = vcmask 540128  }
 0x72e   : > { %v3028_v37 = vpack.c.bf16 %v2933_v15, %v2933_v15  ;;  %v2998_v17 = vadd.f32 %v4666_v61, %v2997_v16  ;;  %v2991_v53 = vor.u32 1.1754944e-38, %v2990_v56 }
 0x72f   : > { %4246 = vmatmul.msk.bf16.vlgmr.msra.gmra.mxu3 %vm1539_vm2, %v3034_v52  ;;  %3378 = vmatpush.bf16.msrb.mxu0 %v4444_v55 }
 0x730   : > { %v3002_v18 = vsel %vm3001_vm12, %v4666_v61, %v2998_v17  ;;  %4240 = vmatmul.msk.bf16.vlgmr.msrb.gmra.mxu1 %vm1539_vm2, %v3028_v37  ;;  %v2992_v29 = vsel %vm2989_vm4, %v2991_v53, %v2987_v4 }
 0x731   : > { %v3007_v19 = vsel %vm3004_vm1, %v3006_v45, %v3002_v18  ;;  %v2993_v30 = vmul.f32 %v5517_v21, %v2992_v29 }
 0x732   : > { %v3008_v54 = vmul.f32 %v5531_v26, %v3007_v19  ;;  %v2509_v23 = vpop.permute.xlu1 %2508 }
 0x733   : > { %v2525_v24 = vpack.c.bf16 %v2509_v23, %v2509_v23  ;;  %v3032_v31 = vpack.c.bf16 %v2993_v30, %v2993_v30  ;;  %3379 = vmatpush.bf16.msrb.mxu0 %v4443_v57 }
 0x734   : > { %v3033_v25 = vpack.c.bf16 %v3008_v54, %v3008_v54 }
 0x735   : > { %v3191_v28 = vsel %vm1743_vm3, %v2525_v24, 0  ;;  %vm3256_vm3 = vcmask 146528  }
 0x736   : > { %3200 = vmatpush.bf16.msra.mxu1 %v3191_v28  ;;  %4245 = vmatmul.msk.bf16.vlgmr.msrb.gmra.mxu2 %vm1539_vm2, %v3033_v25 }
 0x737   : > { %3380 = vmatpush.bf16.msrb.mxu0 %v4442_v58 }
 0x73b   : > { %3381 = vmatpush.bf16.msrb.mxu0 %v4441_v59 }
 0x73f   : > { %3382 = vmatpush.bf16.msrb.mxu0 %v4440_v62 }
 0x740   : > { %4244 = vmatmul.msk.bf16.vlgmr.msra.gmra.mxu1 %vm1539_vm2, %v3032_v31  ;;  %vm3250_vm2 = vcmask 97328  }
 0x743   : > { %3383 = vmatpush.bf16.msrb.mxu0 %v4439_v9 }
 0x779   : > { %v3069_v26 = vpop.f32.mrf.mxu2 }
 0x781   : > { %v3071_v20 = vpop.f32.mrf.mxu2  ;;  %v3088_v38 = vpop.f32.mrf.mxu3 }
 0x782   : > { %3253 = vrot.lane.b32.xlu0 %v3088_v38, %s4921_s1  ;;  %s3391_s1 = scalar_lea.sflag [#allocation8], %s5323_s27 }
 0x783   : > { %v3107_v32 = vpop.f32.mrf.mxu0 }
 0x784   : > { %3259 = vrot.lane.b32.xlu2 %v3107_v32, %s4922_s29  ;;  %s4801_s29 = sshra.s32 %s3412_s9, 4  ;;  %s4802_s29 = int_to_ptr.hbm [resolvable:$true] %s4801_s29 }
 0x785   : > { %p4808_p3 = scmp.lt.s32.totalorder %s4802_s29, %s5646_s11 }
 0x789   : > { %v3090_v35 = vpop.f32.mrf.mxu3 }
 0x78b   : > { %v3109_v47 = vpop.f32.mrf.mxu0 }
 0x791   : > { %v3164_v36 = vpop.f32.mrf.mxu3 }
 0x792   : > { %3277 = vrot.lane.b32.xlu1 %v3164_v36, %s4923_s24  ;;  %s4803_s24 = scalar_lea.hbm %s4802_s29, 16 }
 0x793   : > { %v3183_v63 = vpop.f32.mrf.mxu0  ;;  %p4804_p0 = scmp.ne.s32.totalorder %s4802_s29, %s4803_s24 }
 0x795   : > { %p4805_p1 = pnand %p4804_p0, %p5034_p5 }
 0x797   : > { %p4806_p2 = pneg %p4805_p1 }
 0x799   : > { %v3166_v34 = vpop.f32.mrf.mxu3 }
 0x79b   : > { %v3185_v49 = vpop.f32.mrf.mxu0 }
 0x7a1   : > { %v3145_v21 = vpop.f32.mrf.mxu2 }
 0x7a2   : > { %3271 = vrot.lane.b32.xlu2 %v3145_v21, %s4924_s14 }
 0x7a9   : > { %v3147_v39 = vpop.f32.mrf.mxu2 }
 0x7ad   : > { %v3126_v40 = vpop.f32.mrf.mxu1 }
 0x7ae   : > { %3265 = vrot.lane.b32.xlu0 %v3126_v40, %s4925_s15 }
 0x7b2   : > { %v3240_v42 = vpop.f32.mrf.mxu3 }
 0x7b5   : > { %v3128_v44 = vpop.f32.mrf.mxu1 }
 0x7b6   : > { %3247 = vrot.lane.b32.xlu0 %v3069_v26, %s4926_s26  ;;  %s4807_s26 = scalar_lea.hbm %s5646_s11, 32 }
 0x7b7   : > { %p4809_p4 = scmp.lt.s32.totalorder %s4807_s26, %s4803_s24 }
 0x7b9   : > { %v3221_v46 = vpop.f32.mrf.mxu2  ;;  %p4810_p7 = por %p4809_p4, %p4808_p3 }
 0x7ba   : > { %3295 = vrot.lane.b32.xlu1 %v3221_v46, %s4927_s17  ;;  %v3242_v50 = vpop.f32.mrf.mxu3 }
 0x7bb   : > { %p4811_p8 = pnand %p4810_p7, %p4806_p2 }
 0x7bd   : > { %v3202_v43 = vpop.f32.mrf.mxu1 }
 0x7be   : > { %3289 = vrot.lane.b32.xlu2 %v3202_v43, %s4928_s19  ;;  %3283 = vrot.lane.b32.xlu0 %v3183_v63, %s4929_s28 }
 0x7c1   : > { %v3223_v27 = vpop.f32.mrf.mxu2 }
 0x7c5   : > { %v3204_v60 = vpop.f32.mrf.mxu1 }
 0x7c6   : > { %3301 = vrot.lane.b32.xlu0 %v3240_v42, %s4930_s18 }
 0x7de   : > { %v3260_v2 = vpop.permute.xlu2 %3259 }
 0x7f4   : > { %v3254_v61 = vpop.permute.xlu0 %3253 }
 0x7fc   : > { %v3272_v5 = vpop.permute.xlu2 %3271 }
 0x804   : > { %v3278_v7 = vpop.permute.xlu1 %3277 }
 0x818   : > { %v3290_v8 = vpop.permute.xlu2 %3289 }
 0x820   : > { %v3266_v0 = vpop.permute.xlu0 %3265 }
 0x828   : > { %v3248_v1 = vpop.permute.xlu0 %3247 }
 0x829   : > { %3251 = vst.msk [vmem:[#allocation5] sm:$0xff] %vm3250_vm2, %v3248_v1 }
 0x82a   : > { %3257 = vst.msk [vmem:[#allocation5] sm:$0xff] %vm3256_vm3, %v3254_v61 }
 0x82b   : > { %3263 = vst.msk [vmem:[#allocation5] sm:$0xff] %vm3262_vm5, %v3260_v2 }
 0x82c   : > { %3269 = vst.msk [vmem:[#allocation5] sm:$0xff] %vm3268_vm6, %v3266_v0  ;;  %v3296_v33 = vpop.permute.xlu1 %3295 }
 0x82d   : > { %3275 = vst.msk [vmem:[#allocation5] sm:$0xff] %vm3274_vm7, %v3272_v5 }
 0x82e   : > { %3281 = vst.msk [vmem:[#allocation5] sm:$0xff] %vm3280_vm8, %v3278_v7 }
 0x830   : > { %v3284_v6 = vpop.permute.xlu0 %3283 }
 0x831   : > { %3287 = vst.msk [vmem:[#allocation5] sm:$0xff] %vm3286_vm9, %v3284_v6 }
 0x832   : > { %3293 = vst.msk [vmem:[#allocation5] sm:$0xff] %vm3292_vm10, %v3290_v8 }
 0x833   : > { %3299 = vst.msk [vmem:[#allocation5] sm:$0xff] %vm3298_vm11, %v3296_v33 }
 0x838   : > { %v3302_v10 = vpop.permute.xlu0 %3301 }
 0x839   : > { %3305 = vst.msk [vmem:[#allocation5] sm:$0xff] %vm3304_vm0, %v3302_v10 }
 0x840   : > { %v3306_v11 = vld [vmem:[#allocation5] sm:$0xff] }
 0x841   : > { %v3307_v12 = vpack.c.bf16 %v3306_v11, %v3306_v11 }
 0x843   : > { %3384 = vmatmul.bf16.vlgmr.msrb.gmra.mxu0 %v3307_v12 }
 0x844   : > { %4814 = shalt.err (!%p4811_p8)
}
 0x845   : > { %4464 = dma.vmem_to_hbm [thread:$0]  (%p5034_p5), %s3410_s21, 256, %s3412_s9, %s3391_s1  }
 0x846   : > { %s4283_s30 = sshll.u32 %s5017_s25, 3  ;;  %s3596_s28 = sshll.u32 %s5323_s27, 3 }
 0x847   : > { %s3421_s3 = scalar_lea.hbm %s5647_s12, %s4283_s30  ;;  %s5671_s29 = sld [smem:[#allocation30_spill]] }
 0x848   : > { %s510_s24 = scalar_lea.vmem [#allocation15], %s3596_s28  ;;  %s3425_s15 = sshll.u32 %s3421_s3, 4  ;;  %s3426_s15 = int_to_ptr.hbm [resolvable:$true] %s3425_s15 }
 0x849   : > { %s3423_s14 = sshll.u32 %s510_s24, 4  ;;  %s3396_s21 = scalar_lea.sflag [#allocation16], %s5323_s27  ;;  %s3424_s14 = int_to_ptr.vmem [resolvable:$true] %s3423_s14 }
 0x84a   : > { %s4829_s25 = sshra.s32 %s3426_s15, 4  ;;  %s4835_s17 = scalar_lea.hbm %s5647_s12, 16  ;;  %s4830_s25 = int_to_ptr.hbm [resolvable:$true] %s4829_s25 }
 0x84b   : > { %s4831_s9 = scalar_lea.hbm %s4830_s25, 8  ;;  %p4836_p12 = scmp.lt.s32.totalorder %s4830_s25, %s5647_s12 }
 0x84c   : > { %p4832_p9 = scmp.ne.s32.totalorder %s4830_s25, %s4831_s9  ;;  %p4837_p13 = scmp.lt.s32.totalorder %s4835_s17, %s4831_s9 }
 0x84d   : > { %v4590_v3 = vld [vmem:[%s5671_s29] ss:$0 sm:$0xff] }
 0x84e   : > { %p4833_p10 = pnand %p4832_p9, %p5034_p5  ;;  %p4838_p0 = por %p4837_p13, %p4836_p12 }
 0x850   : > { %p4834_p11 = pneg %p4833_p10 }
 0x852   : > { %p4839_p1 = pnand %p4838_p0, %p4834_p11 }
 0x8c0   : > { %v3385_v13 = vpop.f32.mrf.mxu0 }
 0x8c1   : > { %v3386_v14 = vadd.f32 %v4590_v3, %v3385_v13 }
 0x8c3   : > { %3389 = vst [vmem:[%s510_s24] sm:$0xff] %v3386_v14 }
 0x8c4   : > { %4842 = shalt.err (!%p4839_p1)
}
 0x8c5   : > { %4465 = dma.vmem_to_hbm [thread:$0]  (%p5034_p5), %s3424_s14, 128, %s3426_s15, %s3396_s21  }
 0x8c8   : > { %v3387_v52 = vpop.f32.mrf.mxu0 }
 0x8c9 PF: > { %s5672_s27 = sld [smem:[#allocation24_spill]] }
 0x8ca   : > { %s5673_s28 = sld [smem:[#allocation22_spill]] }
 0x8cf   : > { %p4496_p2 = scmp.ge.s32.totalorder %s5672_s27, 2 }
 0x8d0   : > { %s3437_s20 = sand.u32 1, %s5673_s28  }
 0x8d1   : > { %p4482_p3 = pnand %p4496_p2, %p5038_p6  ;;  %s3438_s3 = scalar_lea.sflag [#allocation8], %s3437_s20 }
 0x8d3   : > { %p4483_p4 = pneg %p4482_p3 }
 0x8d5   : > { %4872 = dma.done.wait (%p4483_p4), %s3438_s3, 256  }
 0x8d6   : > { %4874 = vsyncadd (%p4483_p4), %s3438_s3, 4294967040  ;;  %s3448_s16 = scalar_lea.sflag [#allocation16], %s3437_s20 }
 0x8d7   : > { %4876 = dma.done.wait (%p4483_p4), %s3448_s16, 128  }
 0x8d8   : > { %4878 = vsyncadd (%p4483_p4), %s3448_s16, 4294967168  ;;  %s5675_s24 = sld [smem:[#allocation25_spill]]  ;;  %s5678_s21 = smov %s4885_s22 }
 0x8d9   : > { %s5676_s13 = sld [smem:[#allocation23_spill]] }
 0x8da   : > { %s5677_s23 = sld [smem:[#allocation26_spill]] }
 0x8de   : > { %p29_p5 = scmp.ge.s32.totalorder %s5675_s24, 4  }
 0x8df   : > { %s5679_s22 = smov %s5676_s13 }
 0x8e0   :  { %31 = sbr.rel (!%p29_p5) target bundleno = 12 (0xc), region = 139 }
 0x8e5   :  { %3454 = vsyncpa [#allocation7], 1 }
 0x8e6   :  { %3456 = vsyncpa [#allocation7 + $0x1], 1 }
 0x8e7   :  { %3457 = vsyncpa [#allocation10], 1 }
 0x8e8   :  { %3458 = vsyncpa [#allocation13], 1 }
 0x8e9   :  { %3459 = vsyncpa [#allocation8], 1 }
 0x8ea   :  { %3461 = vsyncpa [#allocation8 + $0x1], 1 }
 0x8eb   :  { %3462 = vsyncpa [#allocation16], 1 }
 0x8ec   :  { %3464 = vsyncpa [#allocation16 + $0x1], 1 }

</bundles_post_ra>
